<compile_context>
chip_gen: v7x
topology: tpu7x:2x2x1
jax: 0.10.0
libtpu: 0.0.40
codegen_flags: <defaults>
</compile_context>

<pallas_src>
import math
import functools

import jax
import jax.numpy as jnp
from jax.experimental import pallas as pl
from jax.experimental.pallas import tpu as pltpu


# ---------------------------------------------------------------------------
# Tile selection / VMEM budgeting helpers
# ---------------------------------------------------------------------------

def _pick_tile(dim, preferred, align):
    """Largest multiple of `align` <= preferred that divides dim, else full dim."""
    t = min(preferred, dim)
    t -= t % align
    while t >= align:
        if dim % t == 0:
            return t
        t -= align
    return dim  # full-extent block (always legal)


def _pick_tn(proj_dim, preferred=256):
    """Lane-dense output tile; prefer an even block count (v7x megacore balance)."""
    for t in (preferred, 128):
        if t <= proj_dim and proj_dim % t == 0 and (proj_dim // t) % 2 == 0:
            return t
    return _pick_tile(proj_dim, preferred, 128)


def _pick_tm(batch, compute_dtype):
    # bf16 packs 16 rows per vreg; align tm to 16 when the batch allows.
    align = 16 if jnp.dtype(compute_dtype).itemsize < 4 else 8
    return _pick_tile(batch, 256, align)


def _vmem_limit(nbytes):
    """Explicit scoped-VMEM budget with headroom (8 MiB floor, 48 MiB cap)."""
    return int(min(max(int(nbytes * 1.5) + (2 << 20), 8 << 20), 48 << 20))


# ---------------------------------------------------------------------------
# One-time dense-S build kernel (cached across forward calls)
# ---------------------------------------------------------------------------

def _build_s_kernel(idx_ref, sgn_ref, s_ref, *, c, tn):
    # idx_ref / sgn_ref: (tk, c); s_ref: one (tk, tn) tile of S.
    n0 = pl.program_id(1) * tn
    col = jax.lax.broadcasted_iota(jnp.int32, (1, tn), 1)   # small (1, tn) iota
    idx = idx_ref[...] - n0                                  # (tk, c), tile-local
    sgn = sgn_ref[...]                                       # (tk, c) f32 (+-1)
    # Build in f32 (portable across v5e/v6e/v7x); cast once at the store.
    tile = None
    for j in range(c):                                       # c is tiny & static
        sel = jnp.where(idx[:, j:j + 1] == col, sgn[:, j:j + 1],
                        jnp.zeros((), jnp.float32))
        tile = sel if tile is None else tile + sel           # collisions sum
    s_ref[...] = tile.astype(s_ref.dtype)


def build_sjlt_matrix(rand_indices, rand_signs, proj_dim, c, *,
                      s_dtype=jnp.bfloat16, tk=None, tn=None):
    """One-time build of the dense S matrix [D, proj_dim]."""
    D = rand_indices.shape[0]
    assert rand_indices.shape == (D, c) and rand_signs.shape == (D, c)
    tk = tk if tk is not None else _pick_tile(D, 512, 8)
    tn = tn if tn is not None else _pick_tn(proj_dim)
    assert D % tk == 0 and proj_dim % tn == 0

    idx = rand_indices.astype(jnp.int32)
    sgn = rand_signs.astype(jnp.float32)
    s_item = jnp.dtype(s_dtype).itemsize

    vmem = _vmem_limit(2 * 2 * tk * 128 * 4      # idx/sgn blocks (lane-padded)
                       + 2 * tk * tn * s_item    # output blocks
                       + 4 * tk * tn * 4)        # select/accumulate temporaries

    kernel = functools.partial(_build_s_kernel, c=c, tn=tn)
    return pl.pallas_call(
        kernel,
        out_shape=jax.ShapeDtypeStruct((D, proj_dim), s_dtype),
        grid_spec=pltpu.PrefetchScalarGridSpec(
            num_scalar_prefetch=0,
            grid=(D // tk, proj_dim // tn),
            in_specs=[
                pl.BlockSpec((tk, c), lambda i, j: (i, 0)),
                pl.BlockSpec((tk, c), lambda i, j: (i, 0)),
            ],
            out_specs=pl.BlockSpec((tk, tn), lambda i, j: (i, j)),
        ),
        compiler_params=pltpu.CompilerParams(
            dimension_semantics=("parallel", "parallel"),
            vmem_limit_bytes=vmem),
    )(idx, sgn)


# ---------------------------------------------------------------------------
# Forward pass: tiled MXU matmul  out = (x @ S) / sqrt(c)
# ---------------------------------------------------------------------------

def _apply_kernel(x_ref, s_ref, o_ref, acc_ref, *, scale, tk, x_resident):
    k = pl.program_id(2)

    @pl.when(k == 0)
    def _():
        acc_ref[...] = jnp.zeros_like(acc_ref)

    if x_resident:
        k0 = pl.multiple_of(k * tk, tk)
        x_tile = x_ref[:, pl.ds(k0, tk)]
    else:
        x_tile = x_ref[...]

    acc_ref[...] += jnp.dot(x_tile, s_ref[...],
                            preferred_element_type=jnp.float32)

    @pl.when(k == pl.num_programs(2) - 1)
    def _():
        o_ref[...] = (acc_ref[...] * scale).astype(o_ref.dtype)


def sjlt_apply(x, s_matrix, c, *, tm=None, tn=None, tk=None,
               compute_dtype=None, out_dtype=None):
    """out = (x @ S) / sqrt(c) as a tiled MXU matmul; f32 accumulation."""
    B, D = x.shape
    D2, proj_dim = s_matrix.shape
    assert D == D2
    if compute_dtype is None:
        compute_dtype = s_matrix.dtype
    compute_dtype = jnp.dtype(compute_dtype)
    out_dtype = out_dtype if out_dtype is not None else x.dtype

    tm = tm if tm is not None else _pick_tm(B, compute_dtype)
    tk = tk if tk is not None else _pick_tile(D, 512, 128)
    tn = tn if tn is not None else _pick_tn(proj_dim)
    assert B % tm == 0 and D % tk == 0 and proj_dim % tn == 0

    x_c = x.astype(compute_dtype)
    s_c = s_matrix.astype(compute_dtype)
    x_item = jnp.dtype(compute_dtype).itemsize
    scale = 1.0 / math.sqrt(c)

    # If one batch block covers all of x and it is small, keep x VMEM-resident
    # so it is not re-DMA'd for every proj_dim block.
    x_resident = (tm == B) and (B * D * x_item <= (4 << 20))
    if x_resident:
        x_spec = pl.BlockSpec((B, D), lambda i, j, k: (0, 0))
        x_vmem = 2 * B * D * x_item
    else:
        x_spec = pl.BlockSpec((tm, tk), lambda i, j, k: (i, k))
        x_vmem = 2 * tm * tk * x_item

    vmem = _vmem_limit(x_vmem
                       + 2 * tk * tn * x_item
                       + 2 * tm * tn * jnp.dtype(out_dtype).itemsize
                       + tm * tn * 4)

    kernel = functools.partial(_apply_kernel, scale=scale, tk=tk,
                               x_resident=x_resident)
    return pl.pallas_call(
        kernel,
        out_shape=jax.ShapeDtypeStruct((B, proj_dim), out_dtype),
        grid_spec=pltpu.PrefetchScalarGridSpec(
            num_scalar_prefetch=0,
            grid=(B // tm, proj_dim // tn, D // tk),
            in_specs=[x_spec,
                      pl.BlockSpec((tk, tn), lambda i, j, k: (k, j))],
            out_specs=pl.BlockSpec((tm, tn), lambda i, j, k: (i, j)),
            scratch_shapes=[pltpu.VMEM((tm, tn), jnp.float32)],
        ),
        compiler_params=pltpu.CompilerParams(
            dimension_semantics=("parallel", "parallel", "arbitrary"),
            vmem_limit_bytes=vmem),
    )(x_c, s_c)


# ---------------------------------------------------------------------------
# Fused fallback (builds S tiles on the fly) — only for huge D * proj_dim
# ---------------------------------------------------------------------------

def _fused_kernel(x_ref, idx_ref, sgn_ref, o_ref, acc_ref, *, c, tn, scale,
                  compute_dtype):
    k = pl.program_id(2)

    @pl.when(k == 0)
    def _():
        acc_ref[...] = jnp.zeros_like(acc_ref)

    n0 = pl.program_id(1) * tn
    col = jax.lax.broadcasted_iota(jnp.int32, (1, tn), 1)   # small (1, tn) iota
    idx = idx_ref[...] - n0                                  # (tk, c)
    sgn = sgn_ref[...]                                       # (tk, c) f32
    s_tile = None
    for j in range(c):
        sel = jnp.where(idx[:, j:j + 1] == col, sgn[:, j:j + 1],
                        jnp.zeros((), jnp.float32))
        s_tile = sel if s_tile is None else s_tile + sel
    if compute_dtype != jnp.float32:
        s_tile = s_tile.astype(compute_dtype)   # entries +-1/0: lossless cast

    acc_ref[...] += jnp.dot(x_ref[...], s_tile,
                            preferred_element_type=jnp.float32)

    @pl.when(k == pl.num_programs(2) - 1)
    def _():
        o_ref[...] = (acc_ref[...] * scale).astype(o_ref.dtype)


def sjlt_projection_fused(x, rand_indices, rand_signs, proj_dim, c, *,
                          tm=None, tn=None, tk=None,
                          compute_dtype=jnp.bfloat16):
    """Single-kernel path; prefer the cached-S matmul path when S fits in HBM."""
    B, D = x.shape
    assert rand_indices.shape == (D, c) and rand_signs.shape == (D, c)
    compute_dtype = jnp.dtype(compute_dtype)
    out_dtype = x.dtype

    tm = tm if tm is not None else _pick_tm(B, compute_dtype)
    tk = tk if tk is not None else _pick_tile(D, 512, 128)
    tn = tn if tn is not None else _pick_tn(proj_dim)
    assert B % tm == 0 and D % tk == 0 and proj_dim % tn == 0

    x_c = x.astype(compute_dtype)
    idx = rand_indices.astype(jnp.int32)
    sgn = rand_signs.astype(jnp.float32)
    scale = 1.0 / math.sqrt(c)
    x_item = jnp.dtype(compute_dtype).itemsize

    vmem = _vmem_limit(2 * tm * tk * x_item
                       + 2 * 2 * tk * 128 * 4           # idx/sgn (lane-padded)
                       + 2 * tm * tn * jnp.dtype(out_dtype).itemsize
                       + tm * tn * 4
                       + 4 * tk * tn * 4)                # s_tile temporaries

    kernel = functools.partial(_fused_kernel, c=c, tn=tn, scale=scale,
                               compute_dtype=compute_dtype)
    return pl.pallas_call(
        kernel,
        out_shape=jax.ShapeDtypeStruct((B, proj_dim), out_dtype),
        grid_spec=pltpu.PrefetchScalarGridSpec(
            num_scalar_prefetch=0,
            grid=(B // tm, proj_dim // tn, D // tk),
            in_specs=[
                pl.BlockSpec((tm, tk), lambda i, j, k: (i, k)),
                pl.BlockSpec((tk, c), lambda i, j, k: (k, 0)),  # bounded in D
                pl.BlockSpec((tk, c), lambda i, j, k: (k, 0)),
            ],
            out_specs=pl.BlockSpec((tm, tn), lambda i, j, k: (i, j)),
            scratch_shapes=[pltpu.VMEM((tm, tn), jnp.float32)],
        ),
        compiler_params=pltpu.CompilerParams(
            dimension_semantics=("parallel", "parallel", "arbitrary"),
            vmem_limit_bytes=vmem),
    )(x_c, idx, sgn)


# ---------------------------------------------------------------------------
# Public API
# ---------------------------------------------------------------------------

def sjlt_projection(x, rand_indices, rand_signs, proj_dim, c, *,
                    compute_dtype=jnp.bfloat16, s_matrix=None,
                    max_dense_s_bytes=256 << 20):
    """Functional forward.  Pass a precomputed `s_matrix` (or use the
    SJLTProjection class / build_sjlt_matrix) to amortize the S build."""
    D = x.shape[1]
    compute_dtype = jnp.dtype(compute_dtype)
    if s_matrix is None:
        if D * proj_dim * compute_dtype.itemsize > max_dense_s_bytes:
            return sjlt_projection_fused(x, rand_indices, rand_signs, proj_dim,
                                         c, compute_dtype=compute_dtype)
        s_matrix = build_sjlt_matrix(rand_indices, rand_signs, proj_dim, c,
                                     s_dtype=compute_dtype)
    return sjlt_apply(x, s_matrix, c, compute_dtype=compute_dtype)


class SJLTProjection:
    """TPU/Pallas port of the CUDA SJLTProjection module.

    The random index/sign buffers are static, so the dense +-1/0 matrix S is
    built once at construction (bf16 by default; lossless for +-1 entries) and
    each forward is a pure tiled MXU matmul.  `threads` / `fixed_blocks` are
    CUDA launch parameters with no TPU equivalent and are ignored.
    Use compute_dtype=jnp.float32 for closer parity with the f32 CUDA path.
    """

    def __init__(self, original_dim, proj_dim, c=1, *, key=None,
                 compute_dtype=jnp.bfloat16):
        if key is None:
            key = jax.random.PRNGKey(0)
        ki, ks = jax.random.split(key)
        self.original_dim = original_dim
        self.proj_dim = proj_dim
        self.c = c
        self.compute_dtype = jnp.dtype(compute_dtype)
        self.rand_indices = jax.random.randint(
            ki, (original_dim, c), 0, proj_dim, dtype=jnp.int32)
        self.rand_signs = (jax.random.randint(
            ks, (original_dim, c), 0, 2, dtype=jnp.int32) * 2 - 1).astype(jnp.int8)
        self.s_matrix = build_sjlt_matrix(
            self.rand_indices, self.rand_signs, proj_dim, c,
            s_dtype=self.compute_dtype)

    def __call__(self, x):
        return sjlt_apply(x, self.s_matrix, self.c,
                          compute_dtype=self.compute_dtype)


# ---------------------------------------------------------------------------
# Reference + self-test
# ---------------------------------------------------------------------------

def _reference(x, rand_indices, rand_signs, proj_dim, c):
    """Pure-JAX reference: dense scatter matrix build, same math."""
    D = x.shape[1]
    S = jnp.zeros((D, proj_dim), jnp.float32)
    rows = jnp.repeat(jnp.arange(D), c)
    cols = rand_indices.reshape(-1)
    vals = rand_signs.astype(jnp.float32).reshape(-1)
    S = S.at[rows, cols].add(vals)
    return (x.astype(jnp.float32) @ S) / math.sqrt(c)


if __name__ == "__main__":
    batch = 8
    original_dim = 512
    proj_dim = 512
    c = 2

    key = jax.random.PRNGKey(0)
    kx, ki, ks = jax.random.split(key, 3)

    x = jax.random.normal(kx, (batch, original_dim), dtype=jnp.float32)
    rand_indices = jax.random.randint(ki, (original_dim, c), 0, proj_dim,
                                      dtype=jnp.int32)
    rand_signs = (jax.random.randint(ks, (original_dim, c), 0, 2,
                                     dtype=jnp.int32) * 2 - 1).astype(jnp.int8)

    ref = _reference(x, rand_indices, rand_signs, proj_dim, c)

    # Default path: cached bf16 S + bf16 MXU matmul (S is exact; x is rounded).
    out_bf16 = sjlt_projection(x, rand_indices, rand_signs, proj_dim, c)
    out_bf16 = jax.block_until_ready(out_bf16)
    assert out_bf16.shape == (batch, proj_dim)
    assert jnp.allclose(out_bf16, ref, rtol=5e-2, atol=5e-2)

    # f32 path (parity with the reference math).
    out_f32 = sjlt_projection(x, rand_indices, rand_signs, proj_dim, c,
                              compute_dtype=jnp.float32)
    out_f32 = jax.block_until_ready(out_f32)
    assert jnp.allclose(out_f32, ref, rtol=1e-4, atol=1e-4)

    # Fused fallback (for S too large to materialize) — correctness check.
    out_fused = sjlt_projection_fused(x, rand_indices, rand_signs, proj_dim, c,
                                      compute_dtype=jnp.float32)
    out_fused = jax.block_until_ready(out_fused)
    assert jnp.allclose(out_fused, ref, rtol=1e-4, atol=1e-4)

    # Module-style wrapper with cached S (mirrors the PyTorch class).
    mod = SJLTProjection(original_dim, proj_dim, c, key=jax.random.PRNGKey(0))
    ref_mod = _reference(x, mod.rand_indices, mod.rand_signs, proj_dim, c)
    out_mod = jax.block_until_ready(mod(x))
    assert jnp.allclose(out_mod, ref_mod, rtol=5e-2, atol=5e-2)

    print("KERNEL_OK")
</pallas_src>

<mosaic_0001>
module attributes {stable_mosaic.version = 11 : i64} {
  func.func @_build_s_kernel(%arg0: i32, %arg1: i32, %arg2: memref<512x2xi32, #tpu.memory_space<vmem>>, %arg3: memref<512x2xf32, #tpu.memory_space<vmem>>, %arg4: memref<512x256xbf16, #tpu.memory_space<vmem>>) attributes {dimension_semantics = [#tpu.dimension_semantics<parallel>, #tpu.dimension_semantics<parallel>], iteration_bounds = array<i64: 1, 2>, scalar_prefetch = 0 : i64, scratch_operands = 0 : i64, tpu.core_type = #tpu.core_type<tc>, window_params = [{transform_indices = @transform_0, window_bounds = array<i64: 512, 2>}, {transform_indices = @transform_1, window_bounds = array<i64: 512, 2>}, {transform_indices = @transform_2, window_bounds = array<i64: 512, 256>}]} {
    %c256_i32 = arith.constant 256 : i32
    %0 = arith.muli %arg1, %c256_i32 : i32
    %1 = tpu.iota {dimensions = array<i32: 1>} : vector<1x256xi32>
    %c0 = arith.constant 0 : index
    %c0_0 = arith.constant 0 : index
    %2 = vector.load %arg2[%c0, %c0_0] : memref<512x2xi32, #tpu.memory_space<vmem>>, vector<512x2xi32>
    %3 = vector.broadcast %0 : i32 to vector<512x2xi32>
    %4 = arith.subi %2, %3 : vector<512x2xi32>
    %c0_1 = arith.constant 0 : index
    %c0_2 = arith.constant 0 : index
    %5 = vector.load %arg3[%c0_1, %c0_2] : memref<512x2xf32, #tpu.memory_space<vmem>>, vector<512x2xf32>
    %6 = vector.extract_strided_slice %4 {offsets = [0, 0], sizes = [512, 1], strides = [1, 1]} : vector<512x2xi32> to vector<512x1xi32>
    %7 = vector.broadcast %6 : vector<512x1xi32> to vector<512x256xi32>
    %8 = vector.broadcast %1 : vector<1x256xi32> to vector<512x256xi32>
    %9 = arith.cmpi eq, %7, %8 : vector<512x256xi32>
    %10 = vector.extract_strided_slice %5 {offsets = [0, 0], sizes = [512, 1], strides = [1, 1]} : vector<512x2xf32> to vector<512x1xf32>
    %cst = arith.constant 0.000000e+00 : f32
    %11 = vector.shape_cast %10 : vector<512x1xf32> to vector<512x1xf32>
    %12 = vector.broadcast %11 : vector<512x1xf32> to vector<512x256xf32>
    %13 = vector.broadcast %cst : f32 to vector<512x256xf32>
    %14 = arith.select %9, %12, %13 : vector<512x256xi1>, vector<512x256xf32>
    %15 = vector.extract_strided_slice %4 {offsets = [0, 1], sizes = [512, 1], strides = [1, 1]} : vector<512x2xi32> to vector<512x1xi32>
    %16 = vector.broadcast %15 : vector<512x1xi32> to vector<512x256xi32>
    %17 = vector.broadcast %1 : vector<1x256xi32> to vector<512x256xi32>
    %18 = arith.cmpi eq, %16, %17 : vector<512x256xi32>
    %19 = vector.extract_strided_slice %5 {offsets = [0, 1], sizes = [512, 1], strides = [1, 1]} : vector<512x2xf32> to vector<512x1xf32>
    %cst_3 = arith.constant 0.000000e+00 : f32
    %20 = vector.shape_cast %19 : vector<512x1xf32> to vector<512x1xf32>
    %21 = vector.broadcast %20 : vector<512x1xf32> to vector<512x256xf32>
    %22 = vector.broadcast %cst_3 : f32 to vector<512x256xf32>
    %23 = arith.select %18, %21, %22 : vector<512x256xi1>, vector<512x256xf32>
    %24 = arith.addf %14, %23 : vector<512x256xf32>
    %25 = arith.truncf %24 : vector<512x256xf32> to vector<512x256xbf16>
    %c0_4 = arith.constant 0 : index
    %c0_5 = arith.constant 0 : index
    %26 = vector.load %arg4[%c0_4, %c0_5] : memref<512x256xbf16, #tpu.memory_space<vmem>>, vector<512x256xbf16>
    tpu.vector_store %arg4[%c0_4, %c0_5], %25 {strides = array<i32>} : memref<512x256xbf16, #tpu.memory_space<vmem>>, vector<512x256xbf16>,
    return
  }
  func.func @transform_0(%arg0: i32, %arg1: i32) -> (i32, i32) {
    %c0_i32 = arith.constant 0 : i32
    %c0_i32_0 = arith.constant 0 : i32
    return %arg0, %c0_i32 : i32, i32
  }
  func.func @transform_1(%arg0: i32, %arg1: i32) -> (i32, i32) {
    %c0_i32 = arith.constant 0 : i32
    %c0_i32_0 = arith.constant 0 : i32
    return %arg0, %c0_i32 : i32, i32
  }
  func.func @transform_2(%arg0: i32, %arg1: i32) -> (i32, i32) {
    %c0_i32 = arith.constant 0 : i32
    return %arg0, %arg1 : i32, i32
  }
}

</mosaic_0001>

<bundles_post_ra>
// kernel: tpu_custom_call.1
= control target key start
LH: loop header
LB: loop body
LE: loop exit
PB: predicated region body
PF: predicated region fallthrough
CT: control target
= control target key end

     0   :  { %7 = vsyncpa [#allocation3], 0  ;;  %s5759_s0 = inlined_call_operand.vmem [shape: s32[512,2], index: 0, kind: input, shape index: {}]   ;;  %s5760_s1 = inlined_call_operand.vmem [shape: f32[512,2], index: 1, kind: input, shape index: {}]   ;;  %s5761_s2 = inlined_call_operand.hbm [shape: bf16[512,512], index: 2, kind: output, shape index: {}]  }
   0x1   :  { %9 = vsyncpa [#allocation3 + $0x1], 0  ;;  %s2842_s9 = smov 0   ;;  %s2844_s10 = smov 0  }
   0x2   :  { %s2846_s11 = smov 0   ;;  %s2848_s12 = smov 0  }
   0x3   :  { %s2850_s13 = smov 0   ;;  %s2852_s14 = smov 0  }
   0x4 LB: > { %s2535_s15 = sadd.s32 4294967295, %s2819_s14   ;;  %s2536_s16 = sadd.s32 4294967294, %s2819_s14   ;;  %s2819_s14 = sphi %s2852_s14, %s15_s14   ;;  %s2815_s13 = sphi %s2850_s13, %s6538_s13   ;;  %s2811_s12 = sphi %s2848_s12, %s6537_s12   ;;  %s2807_s11 = sphi %s2846_s11, %s6536_s11   ;;  %s2803_s10 = sphi %s2844_s10, %s6535_s10   ;;  %s2799_s9 = sphi %s2842_s9, %s6534_s9  }
   0x5   : > { %s24_s17 = sadd.s32 1, %s2815_s13  ;;  %s88_s18 = sadd.s32 1, %s2807_s11 }
   0x6   : > { %p25_p0 = scmp.ge.s32.totalorder %s24_s17, 2  ;;  %p98_p1 = scmp.ne.s32.totalorder %s2807_s11, %s2803_s10 }
   0x7   : > { %p99_p2 = scmp.eq.s32.totalorder %s2535_s15, 1  ;;  %p104_p3 = scmp.ne.s32.totalorder %s2803_s10, %s2799_s9 }
   0x8   : > { %s6540_s17 = smov (%p25_p0, %s24_s17), 0  ;;  %p105_p5 = scmp.eq.s32.totalorder %s2536_s16, 1 }
   0x9   : > { %p2882_p4 = por %p99_p2, %p98_p1  ;;  %s84_s20 = ssub.s32 %s2815_s13, %s6540_s17 }
   0xa   : > { %p2540_p6 = scmp.ge.s32.totalorder %s2819_s14, 1  ;;  %p86_p7 = scmp.eq.s32.totalorder %s84_s20, 0 }
   0xb   : > { %p2889_p8 = por %p105_p5, %p104_p3  ;;  %p141_p9 = scmp.lt.s32.totalorder %s2819_s14, 3 }
   0xc   : > { %s2895_s22 = scalar_select %p86_p7, %s2807_s11, %s88_s18  }
   0xd   : > { %p142_p10 = pnand %p2540_p6, %p141_p9 }
   0xf   : > { %145 = sbr.rel (%p142_p10) target bundleno = 711 (0x2c7), region = 28 }
  0x16   : > { %s2542_s23 = sshll.u32 %s2811_s12, 8  ;;  %v188_v0 = vld [vmem:[%s5759_s0 + $0x10] sm:$0xff]  ;;  %v186_v1 = vld [vmem:[%s5759_s0] sm:$0xff]  ;;  %v2821_v2 = vmov 0   ;;  %v189_v4 = vld [vmem:[%s5759_s0 + $0x18] sm:$0xff]  ;;  %s165_s28 = sand.u32 1, %s2803_s10  }
  0x17   : > { %2738 = vset.pattern.permute.xlu1 %v2821_v2  ;;  %2737 = vset.pattern.permute.xlu0 %v2821_v2  ;;  %v2904_v3 = vstv %s2542_s23  ;;  %v187_v5 = vld [vmem:[%s5759_s0 + $0x8] sm:$0xff]  ;;  %v190_v11 = vld [vmem:[%s5759_s0 + $0x20] sm:$0xff]  ;;  %v193_v14 = vld [vmem:[%s5759_s0 + $0x38] sm:$0xff]  ;;  %s2541_s29 = sshll.u32 %s165_s28, 9  ;;  %s2676_s3 = sshll.u32 %s2811_s12, 7 }
  0x18   : > { %v2913_v6 = vsub.s32 %v188_v0, %v2904_v3  ;;  %v2916_v7 = vsub.s32 %v186_v1, %v2904_v3  ;;  %v2921_v8 = vsub.s32 %v189_v4, %v2904_v3  ;;  %v2924_v9 = vsub.s32 %v187_v5, %v2904_v3  ;;  %v191_v10 = vld [vmem:[%s5759_s0 + $0x28] sm:$0xff]  ;;  %v192_v15 = vld [vmem:[%s5759_s0 + $0x30] sm:$0xff]  ;;  %v194_v19 = vld [vmem:[%s5759_s0 + $0x40] sm:$0xff]  ;;  %s4828_s30 = scalar_lea.vmem [#allocation2], %s2541_s29  ;;  %s5705_s6 = scalar_lea.hbm %s5761_s2, %s2676_s3 }
  0x19   : > { %v2935_v12 = vsub.s32 %v191_v10, %v2904_v3  ;;  %v2938_v13 = vsub.s32 %v190_v11, %v2904_v3  ;;  %v2949_v16 = vsub.s32 %v193_v14, %v2904_v3  ;;  %v2952_v17 = vsub.s32 %v192_v15, %v2904_v3  ;;  %v195_v18 = vld [vmem:[%s5759_s0 + $0x48] sm:$0xff]  ;;  %v197_v22 = vld [vmem:[%s5759_s0 + $0x58] sm:$0xff]  ;;  %v196_v23 = vld [vmem:[%s5759_s0 + $0x50] sm:$0xff]  ;;  %s2444_s4 = sshll.u32 %s4828_s30, 4  ;;  %s5713_s7 = scalar_lea.sflag [#allocation3], %s165_s28  ;;  %s5707_s4 = int_to_ptr.vmem [resolvable:$true] %s2444_s4 }
  0x1a   : > { %386 = vperm.xlu1 %2738, %v2913_v6   ;;  %380 = vperm.xlu0 %2737, %v2916_v7   ;;  %v2963_v20 = vsub.s32 %v195_v18, %v2904_v3  ;;  %v2966_v21 = vsub.s32 %v194_v19, %v2904_v3  ;;  %v2977_v24 = vsub.s32 %v197_v22, %v2904_v3  ;;  %v199_v26 = vld [vmem:[%s5759_s0 + $0x68] sm:$0xff]  ;;  %v198_v27 = vld [vmem:[%s5759_s0 + $0x60] sm:$0xff]  ;;  %v201_v30 = vld [vmem:[%s5759_s0 + $0x78] sm:$0xff]  ;;  %s2741_s8 = scalar_lea.vmem %s5707_s4, 8192  ;;  %s2823_s15 = smov [#allocation2]  }
  0x1b   : > { %v2980_v25 = vsub.s32 %v196_v23, %v2904_v3  ;;  %v2991_v28 = vsub.s32 %v199_v26, %v2904_v3  ;;  %v2994_v29 = vsub.s32 %v198_v27, %v2904_v3  ;;  %v200_v31 = vld [vmem:[%s5759_s0 + $0x70] sm:$0xff]  ;;  %v3005_v32 = vsub.s32 %v201_v30, %v2904_v3  ;;  %v203_v34 = vld [vmem:[%s5759_s0 + $0x88] sm:$0xff]  ;;  %v202_v35 = vld [vmem:[%s5759_s0 + $0x80] sm:$0xff]  ;;  %p2742_p11 = scmp.ne.s32.totalorder %s5707_s4, %s2741_s8  ;;  %s2745_s16 = sshll.u32 %s2823_s15, 4  ;;  %s2746_s16 = int_to_ptr.vmem [resolvable:$false] %s2745_s16 }
  0x1c   : > { %v3008_v33 = vsub.s32 %v200_v31, %v2904_v3  ;;  %v3019_v36 = vsub.s32 %v203_v34, %v2904_v3  ;;  %v3022_v37 = vsub.s32 %v202_v35, %v2904_v3  ;;  %v205_v38 = vld [vmem:[%s5759_s0 + $0x98] sm:$0xff]  ;;  %v204_v39 = vld [vmem:[%s5759_s0 + $0x90] sm:$0xff]  ;;  %v207_v42 = vld [vmem:[%s5759_s0 + $0xa8] sm:$0xff]  ;;  %s2747_s18 = scalar_lea.vmem %s2746_s16, 16384  ;;  %p2748_p0 = scmp.lt.s32.totalorder %s5707_s4, %s2746_s16 }
  0x1d   : > { %v3033_v40 = vsub.s32 %v205_v38, %v2904_v3  ;;  %v3036_v41 = vsub.s32 %v204_v39, %v2904_v3  ;;  %v206_v43 = vld [vmem:[%s5759_s0 + $0xa0] sm:$0xff]  ;;  %v3047_v44 = vsub.s32 %v207_v42, %v2904_v3  ;;  %v209_v46 = vld [vmem:[%s5759_s0 + $0xb8] sm:$0xff]  ;;  %v208_v47 = vld [vmem:[%s5759_s0 + $0xb0] sm:$0xff]  ;;  %p2743_p12 = pnand %p2742_p11, %p2882_p4  ;;  %p2749_p1 = scmp.lt.s32.totalorder %s2747_s18, %s2741_s8 }
  0x1e   : > { %389 = vperm.xlu1 %2738, %v2921_v8   ;;  %383 = vperm.xlu0 %2737, %v2924_v9   ;;  %v3050_v45 = vsub.s32 %v206_v43, %v2904_v3  ;;  %v3061_v48 = vsub.s32 %v209_v46, %v2904_v3  ;;  %v3064_v49 = vsub.s32 %v208_v47, %v2904_v3  ;;  %v211_v50 = vld [vmem:[%s5759_s0 + $0xc8] sm:$0xff]  ;;  %v210_v51 = vld [vmem:[%s5759_s0 + $0xc0] sm:$0xff]  ;;  %v213_v54 = vld [vmem:[%s5759_s0 + $0xd8] sm:$0xff] }
  0x1f   : > { %v3075_v52 = vsub.s32 %v211_v50, %v2904_v3  ;;  %v3078_v53 = vsub.s32 %v210_v51, %v2904_v3  ;;  %v212_v55 = vld [vmem:[%s5759_s0 + $0xd0] sm:$0xff]  ;;  %v3089_v56 = vsub.s32 %v213_v54, %v2904_v3  ;;  %v215_v58 = vld [vmem:[%s5759_s0 + $0xe8] sm:$0xff]  ;;  %v214_v59 = vld [vmem:[%s5759_s0 + $0xe0] sm:$0xff]  ;;  %p2744_p13 = pneg %p2743_p12  ;;  %p2750_p2 = por %p2749_p1, %p2748_p0 }
  0x20   : > { %v3092_v57 = vsub.s32 %v212_v55, %v2904_v3  ;;  %v3103_v60 = vsub.s32 %v215_v58, %v2904_v3  ;;  %v3106_v61 = vsub.s32 %v214_v59, %v2904_v3  ;;  %v217_v62 = vld [vmem:[%s5759_s0 + $0xf8] sm:$0xff]  ;;  %v216_v63 = vld [vmem:[%s5759_s0 + $0xf0] sm:$0xff]  ;;  %v219_v2 = vld [vmem:[%s5759_s0 + $0x108] sm:$0xff] }
  0x21   : > { %v3117_v0 = vsub.s32 %v217_v62, %v2904_v3  ;;  %v3120_v1 = vsub.s32 %v216_v63, %v2904_v3  ;;  %v218_v4 = vld [vmem:[%s5759_s0 + $0x100] sm:$0xff]  ;;  %v3131_v5 = vsub.s32 %v219_v2, %v2904_v3  ;;  %v221_v11 = vld [vmem:[%s5759_s0 + $0x118] sm:$0xff]  ;;  %v220_v14 = vld [vmem:[%s5759_s0 + $0x110] sm:$0xff]  ;;  %p2751_p3 = pnand %p2750_p2, %p2744_p13 }
  0x22   : > { %395 = vperm.xlu1 %2738, %v2935_v12   ;;  %392 = vperm.xlu0 %2737, %v2938_v13   ;;  %v3134_v10 = vsub.s32 %v218_v4, %v2904_v3  ;;  %v3145_v15 = vsub.s32 %v221_v11, %v2904_v3  ;;  %v3148_v18 = vsub.s32 %v220_v14, %v2904_v3  ;;  %v223_v19 = vld [vmem:[%s5759_s0 + $0x128] sm:$0xff]  ;;  %v222_v22 = vld [vmem:[%s5759_s0 + $0x120] sm:$0xff]  ;;  %v225_v27 = vld [vmem:[%s5759_s0 + $0x138] sm:$0xff] }
  0x23   : > { %v3159_v23 = vsub.s32 %v223_v19, %v2904_v3  ;;  %v3162_v26 = vsub.s32 %v222_v22, %v2904_v3  ;;  %v224_v30 = vld [vmem:[%s5759_s0 + $0x130] sm:$0xff]  ;;  %v3173_v31 = vsub.s32 %v225_v27, %v2904_v3  ;;  %v227_v35 = vld [vmem:[%s5759_s0 + $0x148] sm:$0xff]  ;;  %v226_v38 = vld [vmem:[%s5759_s0 + $0x140] sm:$0xff] }
  0x24   : > { %v3176_v34 = vsub.s32 %v224_v30, %v2904_v3  ;;  %v3187_v39 = vsub.s32 %v227_v35, %v2904_v3  ;;  %v3190_v42 = vsub.s32 %v226_v38, %v2904_v3  ;;  %v229_v43 = vld [vmem:[%s5759_s0 + $0x158] sm:$0xff]  ;;  %v228_v46 = vld [vmem:[%s5759_s0 + $0x150] sm:$0xff]  ;;  %v231_v51 = vld [vmem:[%s5759_s0 + $0x168] sm:$0xff] }
  0x25   : > { %v3201_v47 = vsub.s32 %v229_v43, %v2904_v3  ;;  %v3204_v50 = vsub.s32 %v228_v46, %v2904_v3  ;;  %v230_v54 = vld [vmem:[%s5759_s0 + $0x160] sm:$0xff]  ;;  %v3215_v55 = vsub.s32 %v231_v51, %v2904_v3  ;;  %v233_v59 = vld [vmem:[%s5759_s0 + $0x178] sm:$0xff]  ;;  %v232_v62 = vld [vmem:[%s5759_s0 + $0x170] sm:$0xff] }
  0x26   : > { %401 = vperm.xlu1 %2738, %v2949_v16   ;;  %398 = vperm.xlu0 %2737, %v2952_v17   ;;  %v3218_v58 = vsub.s32 %v230_v54, %v2904_v3  ;;  %v3229_v63 = vsub.s32 %v233_v59, %v2904_v3  ;;  %v3232_v2 = vsub.s32 %v232_v62, %v2904_v3  ;;  %v235_v4 = vld [vmem:[%s5759_s0 + $0x188] sm:$0xff]  ;;  %v234_v11 = vld [vmem:[%s5759_s0 + $0x180] sm:$0xff]  ;;  %v237_v22 = vld [vmem:[%s5759_s0 + $0x198] sm:$0xff] }
  0x27   : > { %v3243_v14 = vsub.s32 %v235_v4, %v2904_v3  ;;  %v3246_v19 = vsub.s32 %v234_v11, %v2904_v3  ;;  %v236_v27 = vld [vmem:[%s5759_s0 + $0x190] sm:$0xff]  ;;  %v3257_v30 = vsub.s32 %v237_v22, %v2904_v3  ;;  %v239_v38 = vld [vmem:[%s5759_s0 + $0x1a8] sm:$0xff]  ;;  %v238_v43 = vld [vmem:[%s5759_s0 + $0x1a0] sm:$0xff] }
  0x28   : > { %v3260_v35 = vsub.s32 %v236_v27, %v2904_v3  ;;  %v3271_v46 = vsub.s32 %v239_v38, %v2904_v3  ;;  %v3274_v51 = vsub.s32 %v238_v43, %v2904_v3  ;;  %v241_v54 = vld [vmem:[%s5759_s0 + $0x1b8] sm:$0xff]  ;;  %v240_v59 = vld [vmem:[%s5759_s0 + $0x1b0] sm:$0xff]  ;;  %v243_v11 = vld [vmem:[%s5759_s0 + $0x1c8] sm:$0xff] }
  0x29   : > { %v3285_v62 = vsub.s32 %v241_v54, %v2904_v3  ;;  %v3288_v4 = vsub.s32 %v240_v59, %v2904_v3  ;;  %v242_v22 = vld [vmem:[%s5759_s0 + $0x1c0] sm:$0xff]  ;;  %v3299_v27 = vsub.s32 %v243_v11, %v2904_v3  ;;  %v245_v43 = vld [vmem:[%s5759_s0 + $0x1d8] sm:$0xff]  ;;  %v244_v54 = vld [vmem:[%s5759_s0 + $0x1d0] sm:$0xff] }
  0x2a   : > { %407 = vperm.xlu1 %2738, %v2963_v20   ;;  %404 = vperm.xlu0 %2737, %v2966_v21   ;;  %v3302_v38 = vsub.s32 %v242_v22, %v2904_v3  ;;  %v3313_v59 = vsub.s32 %v245_v43, %v2904_v3  ;;  %v3316_v11 = vsub.s32 %v244_v54, %v2904_v3  ;;  %v247_v22 = vld [vmem:[%s5759_s0 + $0x1e8] sm:$0xff]  ;;  %v249_v54 = vld [vmem:[%s5759_s0 + $0x1f8] sm:$0xff] }
  0x2b   : > { %5991 = vst [vmem:[#allocation5_spill] sm:$0xff] %v3285_v62  ;;  %5992 = vst [vmem:[#allocation6_spill] sm:$0xff] %v3299_v27 }
  0x2c   : > { %5993 = vst [vmem:[#allocation7_spill] sm:$0xff] %v3302_v38  ;;  %5994 = vst [vmem:[#allocation8_spill] sm:$0xff] %v3313_v59 }
  0x2e   : > { %413 = vperm.xlu1 %2738, %v2977_v24   ;;  %410 = vperm.xlu0 %2737, %v2980_v25  }
  0x32   : > { %419 = vperm.xlu1 %2738, %v2991_v28   ;;  %416 = vperm.xlu0 %2737, %v2994_v29  }
  0x36   : > { %425 = vperm.xlu1 %2738, %v3005_v32   ;;  %422 = vperm.xlu0 %2737, %v3008_v33  }
  0x3a   : > { %431 = vperm.xlu1 %2738, %v3019_v36   ;;  %428 = vperm.xlu0 %2737, %v3022_v37  }
  0x3e   : > { %437 = vperm.xlu1 %2738, %v3033_v40   ;;  %434 = vperm.xlu0 %2737, %v3036_v41  }
  0x42   : > { %443 = vperm.xlu1 %2738, %v3047_v44   ;;  %440 = vperm.xlu0 %2737, %v3050_v45  }
  0x46   : > { %449 = vperm.xlu1 %2738, %v3061_v48   ;;  %446 = vperm.xlu0 %2737, %v3064_v49  }
  0x4a   : > { %455 = vperm.xlu1 %2738, %v3075_v52   ;;  %452 = vperm.xlu0 %2737, %v3078_v53  }
  0x4e   : > { %461 = vperm.xlu1 %2738, %v3089_v56   ;;  %458 = vperm.xlu0 %2737, %v3092_v57  }
  0x52   : > { %467 = vperm.xlu1 %2738, %v3103_v60   ;;  %464 = vperm.xlu0 %2737, %v3106_v61  }
  0x56   : > { %473 = vperm.xlu1 %2738, %v3117_v0   ;;  %470 = vperm.xlu0 %2737, %v3120_v1  }
  0x5a   : > { %479 = vperm.xlu1 %2738, %v3131_v5   ;;  %476 = vperm.xlu0 %2737, %v3134_v10  }
  0x5e   : > { %485 = vperm.xlu1 %2738, %v3145_v15   ;;  %482 = vperm.xlu0 %2737, %v3148_v18  }
  0x62   : > { %491 = vperm.xlu1 %2738, %v3159_v23   ;;  %488 = vperm.xlu0 %2737, %v3162_v26  }
  0x66   : > { %497 = vperm.xlu1 %2738, %v3173_v31   ;;  %494 = vperm.xlu0 %2737, %v3176_v34  }
  0x6a   : > { %503 = vperm.xlu1 %2738, %v3187_v39   ;;  %500 = vperm.xlu0 %2737, %v3190_v42  }
  0x6e   : > { %509 = vperm.xlu1 %2738, %v3201_v47   ;;  %506 = vperm.xlu0 %2737, %v3204_v50  }
  0x72   : > { %515 = vperm.xlu1 %2738, %v3215_v55   ;;  %512 = vperm.xlu0 %2737, %v3218_v58  }
  0x76   : > { %521 = vperm.xlu1 %2738, %v3229_v63   ;;  %518 = vperm.xlu0 %2737, %v3232_v2  }
  0x7a   : > { %527 = vperm.xlu1 %2738, %v3243_v14   ;;  %524 = vperm.xlu0 %2737, %v3246_v19  }
  0x7e   : > { %533 = vperm.xlu1 %2738, %v3257_v30   ;;  %530 = vperm.xlu0 %2737, %v3260_v35  }
  0x82   : > { %539 = vperm.xlu1 %2738, %v3271_v46   ;;  %536 = vperm.xlu0 %2737, %v3274_v51  }
  0x86   : > { %545 = vperm.xlu1 %2738, %v3285_v62   ;;  %542 = vperm.xlu0 %2737, %v3288_v4   ;;  %v246_v62 = vld [vmem:[%s5759_s0 + $0x1e0] sm:$0xff] }
  0x87   : > { %v3330_v43 = vsub.s32 %v246_v62, %v2904_v3  ;;  %v3351_v62 = vld [vmem:[%s5760_s1 + $0x8] sm:$0xff] }
  0x88   : > { %5999 = vst [vmem:[#allocation13_spill] sm:$0xff] %v3351_v62 }
  0x89   : > { %5996 = vst [vmem:[#allocation10_spill] sm:$0xff] %v3330_v43 }
  0x8a   : > { %551 = vperm.xlu1 %2738, %v3299_v27   ;;  %548 = vperm.xlu0 %2737, %v3302_v38   ;;  %v3327_v27 = vsub.s32 %v247_v22, %v2904_v3  ;;  %v248_v38 = vld [vmem:[%s5759_s0 + $0x1f0] sm:$0xff] }
  0x8b   : > { %v3344_v22 = vsub.s32 %v248_v38, %v2904_v3  ;;  %v3372_v38 = vld [vmem:[%s5760_s1 + $0x10] sm:$0xff] }
  0x8c   : > { %5995 = vst [vmem:[#allocation9_spill] sm:$0xff] %v3327_v27  ;;  %6004 = vst [vmem:[#allocation18_spill] sm:$0xff] %v3372_v38 }
  0x8d   : > { %5998 = vst [vmem:[#allocation12_spill] sm:$0xff] %v3344_v22 }
  0x8e   : > { %557 = vperm.xlu1 %2738, %v3313_v59   ;;  %554 = vperm.xlu0 %2737, %v3316_v11   ;;  %v3341_v59 = vsub.s32 %v249_v54, %v2904_v3  ;;  %v3367_v3 = vld [vmem:[%s5760_s1 + $0x18] sm:$0xff] }
  0x8f   : > { %6003 = vst [vmem:[#allocation17_spill] sm:$0xff] %v3367_v3 }
  0x90   : > { %5997 = vst [vmem:[#allocation11_spill] sm:$0xff] %v3341_v59 }
  0x92   : > { %563 = vperm.xlu1 %2738, %v3327_v27   ;;  %560 = vperm.xlu0 %2737, %v3330_v43   ;;  %v3356_v27 = vld [vmem:[%s5760_s1] sm:$0xff] }
  0x93   : > { %6000 = vst [vmem:[#allocation14_spill] sm:$0xff] %v3356_v27 }
  0x96   : > { %569 = vperm.xlu1 %2738, %v3341_v59   ;;  %566 = vperm.xlu0 %2737, %v3344_v22  }
  0x99   : > { %v3358_v43 = vpop.permute.xlu1 %386  ;;  %v3360_v54 = vpop.permute.xlu0 %380 }
  0x9a   : > { %6001 = vst [vmem:[#allocation15_spill] sm:$0xff] %v3358_v43  ;;  %6002 = vst [vmem:[#allocation16_spill] sm:$0xff] %v3360_v54  ;;  %706 = vperm.xlu1 %2738, %v3351_v62   ;;  %701 = vperm.xlu0 %2737, %v3356_v27   ;;  %v3383_v43 = vld [vmem:[%s5760_s1 + $0x28] sm:$0xff]  ;;  %v3388_v54 = vld [vmem:[%s5760_s1 + $0x20] sm:$0xff] }
  0x9b   : > { %6007 = vst [vmem:[#allocation21_spill] sm:$0xff] %v3383_v43  ;;  %6008 = vst [vmem:[#allocation22_spill] sm:$0xff] %v3388_v54 }
  0x9d   : > { %v3374_v59 = vpop.permute.xlu1 %389  ;;  %v3376_v22 = vpop.permute.xlu0 %383 }
  0x9e   : > { %6005 = vst [vmem:[#allocation19_spill] sm:$0xff] %v3374_v59  ;;  %6006 = vst [vmem:[#allocation20_spill] sm:$0xff] %v3376_v22  ;;  %716 = vperm.xlu1 %2738, %v3367_v3   ;;  %711 = vperm.xlu0 %2737, %v3372_v38   ;;  %v3399_v22 = vld [vmem:[%s5760_s1 + $0x38] sm:$0xff]  ;;  %v3404_v59 = vld [vmem:[%s5760_s1 + $0x30] sm:$0xff] }
  0x9f   : > { %6011 = vst [vmem:[#allocation25_spill] sm:$0xff] %v3399_v22  ;;  %6012 = vst [vmem:[#allocation26_spill] sm:$0xff] %v3404_v59 }
  0xa1   : > { %v3390_v62 = vpop.permute.xlu1 %395  ;;  %v3392_v27 = vpop.permute.xlu0 %392 }
  0xa2   : > { %6009 = vst [vmem:[#allocation23_spill] sm:$0xff] %v3390_v62  ;;  %6010 = vst [vmem:[#allocation24_spill] sm:$0xff] %v3392_v27  ;;  %726 = vperm.xlu1 %2738, %v3383_v43   ;;  %721 = vperm.xlu0 %2737, %v3388_v54   ;;  %v3415_v27 = vld [vmem:[%s5760_s1 + $0x48] sm:$0xff]  ;;  %v3420_v62 = vld [vmem:[%s5760_s1 + $0x40] sm:$0xff] }
  0xa3   : > { %6015 = vst [vmem:[#allocation29_spill] sm:$0xff] %v3415_v27  ;;  %6016 = vst [vmem:[#allocation30_spill] sm:$0xff] %v3420_v62 }
  0xa5   : > { %v3406_v3 = vpop.permute.xlu1 %401  ;;  %v3408_v38 = vpop.permute.xlu0 %398 }
  0xa6   : > { %6013 = vst [vmem:[#allocation27_spill] sm:$0xff] %v3406_v3  ;;  %6014 = vst [vmem:[#allocation28_spill] sm:$0xff] %v3408_v38  ;;  %736 = vperm.xlu1 %2738, %v3399_v22   ;;  %731 = vperm.xlu0 %2737, %v3404_v59   ;;  %v3431_v38 = vld [vmem:[%s5760_s1 + $0x58] sm:$0xff]  ;;  %v3436_v3 = vld [vmem:[%s5760_s1 + $0x50] sm:$0xff] }
  0xa7   : > { %6019 = vst [vmem:[#allocation33_spill] sm:$0xff] %v3431_v38  ;;  %6020 = vst [vmem:[#allocation34_spill] sm:$0xff] %v3436_v3 }
  0xa9   : > { %v3422_v43 = vpop.permute.xlu1 %407  ;;  %v3424_v54 = vpop.permute.xlu0 %404 }
  0xaa   : > { %6017 = vst [vmem:[#allocation31_spill] sm:$0xff] %v3422_v43  ;;  %6018 = vst [vmem:[#allocation32_spill] sm:$0xff] %v3424_v54  ;;  %746 = vperm.xlu1 %2738, %v3415_v27   ;;  %741 = vperm.xlu0 %2737, %v3420_v62   ;;  %v3447_v54 = vld [vmem:[%s5760_s1 + $0x68] sm:$0xff]  ;;  %v3452_v43 = vld [vmem:[%s5760_s1 + $0x60] sm:$0xff] }
  0xab   : > { %6023 = vst [vmem:[#allocation37_spill] sm:$0xff] %v3447_v54  ;;  %6024 = vst [vmem:[#allocation38_spill] sm:$0xff] %v3452_v43 }
  0xad   : > { %v3438_v22 = vpop.permute.xlu1 %413  ;;  %v3440_v59 = vpop.permute.xlu0 %410 }
  0xae   : > { %6021 = vst [vmem:[#allocation35_spill] sm:$0xff] %v3438_v22  ;;  %6022 = vst [vmem:[#allocation36_spill] sm:$0xff] %v3440_v59  ;;  %756 = vperm.xlu1 %2738, %v3431_v38   ;;  %751 = vperm.xlu0 %2737, %v3436_v3   ;;  %v3463_v59 = vld [vmem:[%s5760_s1 + $0x78] sm:$0xff]  ;;  %v3468_v22 = vld [vmem:[%s5760_s1 + $0x70] sm:$0xff] }
  0xaf   : > { %6027 = vst [vmem:[#allocation41_spill] sm:$0xff] %v3463_v59  ;;  %6028 = vst [vmem:[#allocation42_spill] sm:$0xff] %v3468_v22 }
  0xb1   : > { %v3454_v27 = vpop.permute.xlu1 %419  ;;  %v3456_v62 = vpop.permute.xlu0 %416 }
  0xb2   : > { %6025 = vst [vmem:[#allocation39_spill] sm:$0xff] %v3454_v27  ;;  %6026 = vst [vmem:[#allocation40_spill] sm:$0xff] %v3456_v62  ;;  %766 = vperm.xlu1 %2738, %v3447_v54   ;;  %761 = vperm.xlu0 %2737, %v3452_v43   ;;  %v3479_v62 = vld [vmem:[%s5760_s1 + $0x88] sm:$0xff]  ;;  %v3484_v27 = vld [vmem:[%s5760_s1 + $0x80] sm:$0xff] }
  0xb3   : > { %6031 = vst [vmem:[#allocation45_spill] sm:$0xff] %v3479_v62  ;;  %6032 = vst [vmem:[#allocation46_spill] sm:$0xff] %v3484_v27 }
  0xb5   : > { %v3470_v38 = vpop.permute.xlu1 %425  ;;  %v3472_v3 = vpop.permute.xlu0 %422 }
  0xb6   : > { %6029 = vst [vmem:[#allocation43_spill] sm:$0xff] %v3470_v38  ;;  %6030 = vst [vmem:[#allocation44_spill] sm:$0xff] %v3472_v3  ;;  %776 = vperm.xlu1 %2738, %v3463_v59   ;;  %771 = vperm.xlu0 %2737, %v3468_v22   ;;  %v3495_v3 = vld [vmem:[%s5760_s1 + $0x98] sm:$0xff]  ;;  %v3500_v38 = vld [vmem:[%s5760_s1 + $0x90] sm:$0xff] }
  0xb7   : > { %6035 = vst [vmem:[#allocation49_spill] sm:$0xff] %v3495_v3  ;;  %6036 = vst [vmem:[#allocation50_spill] sm:$0xff] %v3500_v38 }
  0xb9   : > { %v3486_v54 = vpop.permute.xlu1 %431  ;;  %v3488_v43 = vpop.permute.xlu0 %428 }
  0xba   : > { %6033 = vst [vmem:[#allocation47_spill] sm:$0xff] %v3486_v54  ;;  %6034 = vst [vmem:[#allocation48_spill] sm:$0xff] %v3488_v43  ;;  %786 = vperm.xlu1 %2738, %v3479_v62   ;;  %781 = vperm.xlu0 %2737, %v3484_v27   ;;  %v3511_v43 = vld [vmem:[%s5760_s1 + $0xa8] sm:$0xff]  ;;  %v3516_v54 = vld [vmem:[%s5760_s1 + $0xa0] sm:$0xff] }
  0xbb   : > { %6039 = vst [vmem:[#allocation53_spill] sm:$0xff] %v3511_v43  ;;  %6040 = vst [vmem:[#allocation54_spill] sm:$0xff] %v3516_v54 }
  0xbd   : > { %v3502_v59 = vpop.permute.xlu1 %437  ;;  %v3504_v22 = vpop.permute.xlu0 %434 }
  0xbe   : > { %6037 = vst [vmem:[#allocation51_spill] sm:$0xff] %v3502_v59  ;;  %6038 = vst [vmem:[#allocation52_spill] sm:$0xff] %v3504_v22  ;;  %796 = vperm.xlu1 %2738, %v3495_v3   ;;  %791 = vperm.xlu0 %2737, %v3500_v38   ;;  %v3527_v22 = vld [vmem:[%s5760_s1 + $0xb8] sm:$0xff]  ;;  %v3532_v59 = vld [vmem:[%s5760_s1 + $0xb0] sm:$0xff] }
  0xbf   : > { %6043 = vst [vmem:[#allocation57_spill] sm:$0xff] %v3527_v22  ;;  %6044 = vst [vmem:[#allocation58_spill] sm:$0xff] %v3532_v59 }
  0xc1   : > { %v3518_v62 = vpop.permute.xlu1 %443  ;;  %v3520_v27 = vpop.permute.xlu0 %440 }
  0xc2   : > { %6041 = vst [vmem:[#allocation55_spill] sm:$0xff] %v3518_v62  ;;  %6042 = vst [vmem:[#allocation56_spill] sm:$0xff] %v3520_v27  ;;  %806 = vperm.xlu1 %2738, %v3511_v43   ;;  %801 = vperm.xlu0 %2737, %v3516_v54   ;;  %v3543_v27 = vld [vmem:[%s5760_s1 + $0xc8] sm:$0xff]  ;;  %v3548_v62 = vld [vmem:[%s5760_s1 + $0xc0] sm:$0xff] }
  0xc3   : > { %6047 = vst [vmem:[#allocation61_spill] sm:$0xff] %v3543_v27  ;;  %6048 = vst [vmem:[#allocation62_spill] sm:$0xff] %v3548_v62 }
  0xc5   : > { %v3534_v3 = vpop.permute.xlu1 %449  ;;  %v3536_v38 = vpop.permute.xlu0 %446 }
  0xc6   : > { %6045 = vst [vmem:[#allocation59_spill] sm:$0xff] %v3534_v3  ;;  %6046 = vst [vmem:[#allocation60_spill] sm:$0xff] %v3536_v38  ;;  %816 = vperm.xlu1 %2738, %v3527_v22   ;;  %811 = vperm.xlu0 %2737, %v3532_v59   ;;  %v3559_v38 = vld [vmem:[%s5760_s1 + $0xd8] sm:$0xff]  ;;  %v3564_v3 = vld [vmem:[%s5760_s1 + $0xd0] sm:$0xff] }
  0xc7   : > { %6051 = vst [vmem:[#allocation65_spill] sm:$0xff] %v3559_v38  ;;  %6052 = vst [vmem:[#allocation66_spill] sm:$0xff] %v3564_v3 }
  0xc9   : > { %v3550_v43 = vpop.permute.xlu1 %455  ;;  %v3552_v54 = vpop.permute.xlu0 %452 }
  0xca   : > { %6049 = vst [vmem:[#allocation63_spill] sm:$0xff] %v3550_v43  ;;  %6050 = vst [vmem:[#allocation64_spill] sm:$0xff] %v3552_v54  ;;  %826 = vperm.xlu1 %2738, %v3543_v27   ;;  %821 = vperm.xlu0 %2737, %v3548_v62   ;;  %v3575_v54 = vld [vmem:[%s5760_s1 + $0xe8] sm:$0xff]  ;;  %v3580_v43 = vld [vmem:[%s5760_s1 + $0xe0] sm:$0xff] }
  0xcb   : > { %6055 = vst [vmem:[#allocation69_spill] sm:$0xff] %v3575_v54  ;;  %6056 = vst [vmem:[#allocation70_spill] sm:$0xff] %v3580_v43 }
  0xcd   : > { %v3566_v22 = vpop.permute.xlu1 %461  ;;  %v3568_v59 = vpop.permute.xlu0 %458 }
  0xce   : > { %6053 = vst [vmem:[#allocation67_spill] sm:$0xff] %v3566_v22  ;;  %6054 = vst [vmem:[#allocation68_spill] sm:$0xff] %v3568_v59  ;;  %836 = vperm.xlu1 %2738, %v3559_v38   ;;  %831 = vperm.xlu0 %2737, %v3564_v3   ;;  %v3591_v59 = vld [vmem:[%s5760_s1 + $0xf8] sm:$0xff]  ;;  %v3596_v22 = vld [vmem:[%s5760_s1 + $0xf0] sm:$0xff] }
  0xcf   : > { %6059 = vst [vmem:[#allocation73_spill] sm:$0xff] %v3591_v59  ;;  %6060 = vst [vmem:[#allocation74_spill] sm:$0xff] %v3596_v22 }
  0xd1   : > { %v3582_v27 = vpop.permute.xlu1 %467  ;;  %v3584_v62 = vpop.permute.xlu0 %464 }
  0xd2   : > { %6057 = vst [vmem:[#allocation71_spill] sm:$0xff] %v3582_v27  ;;  %6058 = vst [vmem:[#allocation72_spill] sm:$0xff] %v3584_v62  ;;  %846 = vperm.xlu1 %2738, %v3575_v54   ;;  %841 = vperm.xlu0 %2737, %v3580_v43   ;;  %v3607_v62 = vld [vmem:[%s5760_s1 + $0x108] sm:$0xff]  ;;  %v3612_v27 = vld [vmem:[%s5760_s1 + $0x100] sm:$0xff] }
  0xd3   : > { %6063 = vst [vmem:[#allocation77_spill] sm:$0xff] %v3607_v62  ;;  %6064 = vst [vmem:[#allocation78_spill] sm:$0xff] %v3612_v27 }
  0xd5   : > { %v3598_v38 = vpop.permute.xlu1 %473  ;;  %v3600_v3 = vpop.permute.xlu0 %470 }
  0xd6   : > { %6061 = vst [vmem:[#allocation75_spill] sm:$0xff] %v3598_v38  ;;  %6062 = vst [vmem:[#allocation76_spill] sm:$0xff] %v3600_v3  ;;  %856 = vperm.xlu1 %2738, %v3591_v59   ;;  %851 = vperm.xlu0 %2737, %v3596_v22   ;;  %v3623_v3 = vld [vmem:[%s5760_s1 + $0x118] sm:$0xff]  ;;  %v3628_v38 = vld [vmem:[%s5760_s1 + $0x110] sm:$0xff] }
  0xd7   : > { %6067 = vst [vmem:[#allocation81_spill] sm:$0xff] %v3623_v3  ;;  %6068 = vst [vmem:[#allocation82_spill] sm:$0xff] %v3628_v38 }
  0xd9   : > { %v3614_v54 = vpop.permute.xlu1 %479  ;;  %v3616_v43 = vpop.permute.xlu0 %476 }
  0xda   : > { %6065 = vst [vmem:[#allocation79_spill] sm:$0xff] %v3614_v54  ;;  %6066 = vst [vmem:[#allocation80_spill] sm:$0xff] %v3616_v43  ;;  %866 = vperm.xlu1 %2738, %v3607_v62   ;;  %861 = vperm.xlu0 %2737, %v3612_v27   ;;  %v3639_v43 = vld [vmem:[%s5760_s1 + $0x128] sm:$0xff]  ;;  %v3644_v54 = vld [vmem:[%s5760_s1 + $0x120] sm:$0xff] }
  0xdb   : > { %6071 = vst [vmem:[#allocation85_spill] sm:$0xff] %v3639_v43  ;;  %6072 = vst [vmem:[#allocation86_spill] sm:$0xff] %v3644_v54 }
  0xdd   : > { %v3630_v59 = vpop.permute.xlu1 %485  ;;  %v3632_v22 = vpop.permute.xlu0 %482 }
  0xde   : > { %6069 = vst [vmem:[#allocation83_spill] sm:$0xff] %v3630_v59  ;;  %6070 = vst [vmem:[#allocation84_spill] sm:$0xff] %v3632_v22  ;;  %876 = vperm.xlu1 %2738, %v3623_v3   ;;  %871 = vperm.xlu0 %2737, %v3628_v38   ;;  %v3655_v22 = vld [vmem:[%s5760_s1 + $0x138] sm:$0xff]  ;;  %v3660_v59 = vld [vmem:[%s5760_s1 + $0x130] sm:$0xff] }
  0xdf   : > { %6075 = vst [vmem:[#allocation89_spill] sm:$0xff] %v3655_v22  ;;  %6076 = vst [vmem:[#allocation90_spill] sm:$0xff] %v3660_v59 }
  0xe1   : > { %v3646_v62 = vpop.permute.xlu1 %491  ;;  %v3648_v27 = vpop.permute.xlu0 %488 }
  0xe2   : > { %6073 = vst [vmem:[#allocation87_spill] sm:$0xff] %v3646_v62  ;;  %6074 = vst [vmem:[#allocation88_spill] sm:$0xff] %v3648_v27  ;;  %886 = vperm.xlu1 %2738, %v3639_v43   ;;  %881 = vperm.xlu0 %2737, %v3644_v54   ;;  %v3671_v27 = vld [vmem:[%s5760_s1 + $0x148] sm:$0xff]  ;;  %v3676_v62 = vld [vmem:[%s5760_s1 + $0x140] sm:$0xff] }
  0xe3   : > { %6079 = vst [vmem:[#allocation93_spill] sm:$0xff] %v3671_v27  ;;  %6080 = vst [vmem:[#allocation94_spill] sm:$0xff] %v3676_v62 }
  0xe5   : > { %v3662_v3 = vpop.permute.xlu1 %497  ;;  %v3664_v38 = vpop.permute.xlu0 %494 }
  0xe6   : > { %6077 = vst [vmem:[#allocation91_spill] sm:$0xff] %v3662_v3  ;;  %6078 = vst [vmem:[#allocation92_spill] sm:$0xff] %v3664_v38  ;;  %896 = vperm.xlu1 %2738, %v3655_v22   ;;  %891 = vperm.xlu0 %2737, %v3660_v59   ;;  %v3687_v38 = vld [vmem:[%s5760_s1 + $0x158] sm:$0xff]  ;;  %v3692_v3 = vld [vmem:[%s5760_s1 + $0x150] sm:$0xff] }
  0xe7   : > { %6083 = vst [vmem:[#allocation97_spill] sm:$0xff] %v3687_v38  ;;  %6084 = vst [vmem:[#allocation98_spill] sm:$0xff] %v3692_v3 }
  0xe9   : > { %v3678_v43 = vpop.permute.xlu1 %503  ;;  %v3680_v54 = vpop.permute.xlu0 %500 }
  0xea   : > { %6081 = vst [vmem:[#allocation95_spill] sm:$0xff] %v3678_v43  ;;  %6082 = vst [vmem:[#allocation96_spill] sm:$0xff] %v3680_v54  ;;  %906 = vperm.xlu1 %2738, %v3671_v27   ;;  %901 = vperm.xlu0 %2737, %v3676_v62   ;;  %v3703_v54 = vld [vmem:[%s5760_s1 + $0x168] sm:$0xff]  ;;  %v3708_v43 = vld [vmem:[%s5760_s1 + $0x160] sm:$0xff] }
  0xeb   : > { %6087 = vst [vmem:[#allocation101_spill] sm:$0xff] %v3703_v54  ;;  %6088 = vst [vmem:[#allocation102_spill] sm:$0xff] %v3708_v43 }
  0xed   : > { %v3694_v22 = vpop.permute.xlu1 %509  ;;  %v3696_v59 = vpop.permute.xlu0 %506 }
  0xee   : > { %6085 = vst [vmem:[#allocation99_spill] sm:$0xff] %v3694_v22  ;;  %6086 = vst [vmem:[#allocation100_spill] sm:$0xff] %v3696_v59  ;;  %916 = vperm.xlu1 %2738, %v3687_v38   ;;  %911 = vperm.xlu0 %2737, %v3692_v3   ;;  %v3719_v59 = vld [vmem:[%s5760_s1 + $0x178] sm:$0xff]  ;;  %v3724_v22 = vld [vmem:[%s5760_s1 + $0x170] sm:$0xff] }
  0xef   : > { %6091 = vst [vmem:[#allocation105_spill] sm:$0xff] %v3719_v59  ;;  %6092 = vst [vmem:[#allocation106_spill] sm:$0xff] %v3724_v22 }
  0xf1   : > { %v3710_v27 = vpop.permute.xlu1 %515  ;;  %v3712_v62 = vpop.permute.xlu0 %512 }
  0xf2   : > { %6089 = vst [vmem:[#allocation103_spill] sm:$0xff] %v3710_v27  ;;  %6090 = vst [vmem:[#allocation104_spill] sm:$0xff] %v3712_v62  ;;  %926 = vperm.xlu1 %2738, %v3703_v54   ;;  %921 = vperm.xlu0 %2737, %v3708_v43   ;;  %v3735_v62 = vld [vmem:[%s5760_s1 + $0x188] sm:$0xff]  ;;  %v3740_v27 = vld [vmem:[%s5760_s1 + $0x180] sm:$0xff] }
  0xf3   : > { %6095 = vst [vmem:[#allocation109_spill] sm:$0xff] %v3735_v62  ;;  %6096 = vst [vmem:[#allocation110_spill] sm:$0xff] %v3740_v27 }
  0xf5   : > { %v3726_v38 = vpop.permute.xlu1 %521  ;;  %v3728_v3 = vpop.permute.xlu0 %518 }
  0xf6   : > { %6093 = vst [vmem:[#allocation107_spill] sm:$0xff] %v3726_v38  ;;  %6094 = vst [vmem:[#allocation108_spill] sm:$0xff] %v3728_v3  ;;  %936 = vperm.xlu1 %2738, %v3719_v59   ;;  %931 = vperm.xlu0 %2737, %v3724_v22   ;;  %v3751_v3 = vld [vmem:[%s5760_s1 + $0x198] sm:$0xff]  ;;  %v3756_v38 = vld [vmem:[%s5760_s1 + $0x190] sm:$0xff] }
  0xf7   : > { %6099 = vst [vmem:[#allocation113_spill] sm:$0xff] %v3751_v3  ;;  %6100 = vst [vmem:[#allocation114_spill] sm:$0xff] %v3756_v38 }
  0xf9   : > { %v3742_v54 = vpop.permute.xlu1 %527  ;;  %v3744_v43 = vpop.permute.xlu0 %524 }
  0xfa   : > { %6097 = vst [vmem:[#allocation111_spill] sm:$0xff] %v3742_v54  ;;  %6098 = vst [vmem:[#allocation112_spill] sm:$0xff] %v3744_v43  ;;  %946 = vperm.xlu1 %2738, %v3735_v62   ;;  %941 = vperm.xlu0 %2737, %v3740_v27   ;;  %v3767_v43 = vld [vmem:[%s5760_s1 + $0x1a8] sm:$0xff]  ;;  %v3772_v54 = vld [vmem:[%s5760_s1 + $0x1a0] sm:$0xff] }
  0xfb   : > { %6103 = vst [vmem:[#allocation117_spill] sm:$0xff] %v3767_v43  ;;  %6104 = vst [vmem:[#allocation118_spill] sm:$0xff] %v3772_v54 }
  0xfd   : > { %v3758_v59 = vpop.permute.xlu1 %533  ;;  %v3760_v22 = vpop.permute.xlu0 %530 }
  0xfe   : > { %6101 = vst [vmem:[#allocation115_spill] sm:$0xff] %v3758_v59  ;;  %6102 = vst [vmem:[#allocation116_spill] sm:$0xff] %v3760_v22  ;;  %956 = vperm.xlu1 %2738, %v3751_v3   ;;  %951 = vperm.xlu0 %2737, %v3756_v38   ;;  %v3783_v22 = vld [vmem:[%s5760_s1 + $0x1b8] sm:$0xff]  ;;  %v3788_v59 = vld [vmem:[%s5760_s1 + $0x1b0] sm:$0xff] }
  0xff   : > { %6107 = vst [vmem:[#allocation121_spill] sm:$0xff] %v3783_v22  ;;  %6108 = vst [vmem:[#allocation122_spill] sm:$0xff] %v3788_v59 }
 0x101   : > { %v3774_v62 = vpop.permute.xlu1 %539  ;;  %v3776_v27 = vpop.permute.xlu0 %536 }
 0x102   : > { %6105 = vst [vmem:[#allocation119_spill] sm:$0xff] %v3774_v62  ;;  %6106 = vst [vmem:[#allocation120_spill] sm:$0xff] %v3776_v27  ;;  %966 = vperm.xlu1 %2738, %v3767_v43   ;;  %961 = vperm.xlu0 %2737, %v3772_v54   ;;  %v3799_v27 = vld [vmem:[%s5760_s1 + $0x1c8] sm:$0xff]  ;;  %v3804_v62 = vld [vmem:[%s5760_s1 + $0x1c0] sm:$0xff] }
 0x103   : > { %6111 = vst [vmem:[#allocation125_spill] sm:$0xff] %v3799_v27  ;;  %6112 = vst [vmem:[#allocation126_spill] sm:$0xff] %v3804_v62 }
 0x105   : > { %v3790_v3 = vpop.permute.xlu1 %545  ;;  %v3792_v38 = vpop.permute.xlu0 %542 }
 0x106   : > { %6109 = vst [vmem:[#allocation123_spill] sm:$0xff] %v3790_v3  ;;  %6110 = vst [vmem:[#allocation124_spill] sm:$0xff] %v3792_v38  ;;  %976 = vperm.xlu1 %2738, %v3783_v22   ;;  %971 = vperm.xlu0 %2737, %v3788_v59   ;;  %v3815_v38 = vld [vmem:[%s5760_s1 + $0x1d8] sm:$0xff]  ;;  %v3820_v3 = vld [vmem:[%s5760_s1 + $0x1d0] sm:$0xff] }
 0x107   : > { %6115 = vst [vmem:[#allocation129_spill] sm:$0xff] %v3815_v38  ;;  %6116 = vst [vmem:[#allocation130_spill] sm:$0xff] %v3820_v3 }
 0x109   : > { %v3806_v43 = vpop.permute.xlu1 %551  ;;  %v3808_v54 = vpop.permute.xlu0 %548 }
 0x10a   : > { %6113 = vst [vmem:[#allocation127_spill] sm:$0xff] %v3806_v43  ;;  %6114 = vst [vmem:[#allocation128_spill] sm:$0xff] %v3808_v54  ;;  %986 = vperm.xlu1 %2738, %v3799_v27   ;;  %981 = vperm.xlu0 %2737, %v3804_v62   ;;  %v3831_v54 = vld [vmem:[%s5760_s1 + $0x1e8] sm:$0xff]  ;;  %v3836_v43 = vld [vmem:[%s5760_s1 + $0x1e0] sm:$0xff] }
 0x10b   : > { %6119 = vst [vmem:[#allocation133_spill] sm:$0xff] %v3831_v54  ;;  %6120 = vst [vmem:[#allocation134_spill] sm:$0xff] %v3836_v43 }
 0x10d   : > { %v3822_v22 = vpop.permute.xlu1 %557  ;;  %v3824_v59 = vpop.permute.xlu0 %554 }
 0x10e   : > { %6117 = vst [vmem:[#allocation131_spill] sm:$0xff] %v3822_v22  ;;  %6118 = vst [vmem:[#allocation132_spill] sm:$0xff] %v3824_v59  ;;  %996 = vperm.xlu1 %2738, %v3815_v38   ;;  %991 = vperm.xlu0 %2737, %v3820_v3   ;;  %v3847_v59 = vld [vmem:[%s5760_s1 + $0x1f8] sm:$0xff]  ;;  %v3852_v22 = vld [vmem:[%s5760_s1 + $0x1f0] sm:$0xff] }
 0x10f   : > { %6123 = vst [vmem:[#allocation137_spill] sm:$0xff] %v3847_v59 }
 0x111   : > { %v3838_v27 = vpop.permute.xlu1 %563  ;;  %v3840_v62 = vpop.permute.xlu0 %560 }
 0x112   : > { %6121 = vst [vmem:[#allocation135_spill] sm:$0xff] %v3838_v27  ;;  %6122 = vst [vmem:[#allocation136_spill] sm:$0xff] %v3840_v62  ;;  %1006 = vperm.xlu1 %2738, %v3831_v54   ;;  %1001 = vperm.xlu0 %2737, %v3836_v43   ;;  %v2822_v54 = vmov 1  }
 0x115   : > { %v3854_v38 = vpop.permute.xlu1 %569  ;;  %v3856_v3 = vpop.permute.xlu0 %566 }
 0x116   : > { %6124 = vst [vmem:[#allocation138_spill] sm:$0xff] %v3854_v38  ;;  %6125 = vst [vmem:[#allocation139_spill] sm:$0xff] %v3856_v3  ;;  %1016 = vperm.xlu1 %2738, %v3847_v59   ;;  %1011 = vperm.xlu0 %2737, %v3852_v22  }
 0x119   : > { %v3860_v62 = vpop.permute.xlu1 %706  ;;  %v3862_v27 = vpop.permute.xlu0 %701 }
 0x11a   : > { %2740 = vset.pattern.permute.xlu1 %v2822_v54  ;;  %2739 = vset.pattern.permute.xlu0 %v2822_v54 }
 0x11b   : > { %1151 = vperm.xlu1 %2740, %v2924_v9   ;;  %1148 = vperm.xlu0 %2739, %v2916_v7  }
 0x11d   : > { %v3866_v43 = vpop.permute.xlu1 %716  ;;  %v3868_v38 = vpop.permute.xlu0 %711 }
 0x11f   : > { %1154 = vperm.xlu1 %2740, %v2913_v6   ;;  %1157 = vperm.xlu0 %2739, %v2921_v8  }
 0x121   : > { %v3872_v3 = vpop.permute.xlu1 %726  ;;  %v3874_v59 = vpop.permute.xlu0 %721 }
 0x123   : > { %1160 = vperm.xlu1 %2740, %v2938_v13   ;;  %1163 = vperm.xlu0 %2739, %v2935_v12  }
 0x125   : > { %v3878_v54 = vpop.permute.xlu1 %736  ;;  %v3880_v9 = vpop.permute.xlu0 %731 }
 0x127   : > { %1166 = vperm.xlu1 %2740, %v2952_v17   ;;  %1169 = vperm.xlu0 %2739, %v2949_v16  }
 0x129   : > { %v3884_v7 = vpop.permute.xlu1 %746  ;;  %v3886_v6 = vpop.permute.xlu0 %741 }
 0x12b   : > { %1172 = vperm.xlu1 %2740, %v2966_v21   ;;  %1175 = vperm.xlu0 %2739, %v2963_v20  }
 0x12d   : > { %v3890_v8 = vpop.permute.xlu1 %756  ;;  %v3892_v13 = vpop.permute.xlu0 %751 }
 0x12f   : > { %1178 = vperm.xlu1 %2740, %v2980_v25   ;;  %1181 = vperm.xlu0 %2739, %v2977_v24  }
 0x131   : > { %v3896_v12 = vpop.permute.xlu1 %766  ;;  %v3898_v17 = vpop.permute.xlu0 %761 }
 0x133   : > { %1184 = vperm.xlu1 %2740, %v2994_v29   ;;  %1187 = vperm.xlu0 %2739, %v2991_v28  }
 0x135   : > { %v3902_v16 = vpop.permute.xlu1 %776  ;;  %v3904_v21 = vpop.permute.xlu0 %771 }
 0x137   : > { %1190 = vperm.xlu1 %2740, %v3008_v33   ;;  %1193 = vperm.xlu0 %2739, %v3005_v32  }
 0x139   : > { %v3908_v20 = vpop.permute.xlu1 %786  ;;  %v3910_v25 = vpop.permute.xlu0 %781 }
 0x13b   : > { %1196 = vperm.xlu1 %2740, %v3022_v37   ;;  %1199 = vperm.xlu0 %2739, %v3019_v36  }
 0x13d   : > { %v3914_v24 = vpop.permute.xlu1 %796  ;;  %v3916_v29 = vpop.permute.xlu0 %791 }
 0x13f   : > { %1202 = vperm.xlu1 %2740, %v3036_v41   ;;  %1205 = vperm.xlu0 %2739, %v3033_v40  }
 0x141   : > { %v3920_v28 = vpop.permute.xlu1 %806  ;;  %v3922_v33 = vpop.permute.xlu0 %801 }
 0x143   : > { %1208 = vperm.xlu1 %2740, %v3050_v45   ;;  %1211 = vperm.xlu0 %2739, %v3047_v44  }
 0x145   : > { %v3926_v32 = vpop.permute.xlu1 %816  ;;  %v3928_v37 = vpop.permute.xlu0 %811 }
 0x147   : > { %1214 = vperm.xlu1 %2740, %v3064_v49   ;;  %1217 = vperm.xlu0 %2739, %v3061_v48  }
 0x149   : > { %v3932_v36 = vpop.permute.xlu1 %826  ;;  %v3934_v41 = vpop.permute.xlu0 %821 }
 0x14b   : > { %1220 = vperm.xlu1 %2740, %v3078_v53   ;;  %1223 = vperm.xlu0 %2739, %v3075_v52  }
 0x14d   : > { %v3938_v40 = vpop.permute.xlu1 %836  ;;  %v3940_v45 = vpop.permute.xlu0 %831 }
 0x14f   : > { %1226 = vperm.xlu1 %2740, %v3092_v57   ;;  %1229 = vperm.xlu0 %2739, %v3089_v56  }
 0x151   : > { %v3944_v44 = vpop.permute.xlu1 %846  ;;  %v3946_v49 = vpop.permute.xlu0 %841 }
 0x153   : > { %1232 = vperm.xlu1 %2740, %v3106_v61   ;;  %1235 = vperm.xlu0 %2739, %v3103_v60  }
 0x155   : > { %v3950_v48 = vpop.permute.xlu1 %856  ;;  %v3952_v53 = vpop.permute.xlu0 %851 }
 0x157   : > { %1238 = vperm.xlu1 %2740, %v3120_v1   ;;  %1241 = vperm.xlu0 %2739, %v3117_v0  }
 0x159   : > { %v3956_v52 = vpop.permute.xlu1 %866  ;;  %v3958_v57 = vpop.permute.xlu0 %861 }
 0x15b   : > { %1244 = vperm.xlu1 %2740, %v3134_v10   ;;  %1247 = vperm.xlu0 %2739, %v3131_v5  }
 0x15d   : > { %v3962_v56 = vpop.permute.xlu1 %876  ;;  %v3964_v61 = vpop.permute.xlu0 %871 }
 0x15e   : > { %6126 = vst [vmem:[#allocation140_spill] sm:$0xff] %v3962_v56  ;;  %6127 = vst [vmem:[#allocation141_spill] sm:$0xff] %v3964_v61  ;;  %v6290_v61 = vld [vmem:[#allocation47_spill] sm:$0xff] }
 0x15f   : > { %1250 = vperm.xlu1 %2740, %v3148_v18   ;;  %1253 = vperm.xlu0 %2739, %v3145_v15  }
 0x161   : > { %v3968_v60 = vpop.permute.xlu1 %886  ;;  %v3970_v1 = vpop.permute.xlu0 %881 }
 0x162   : > { %6128 = vst [vmem:[#allocation142_spill] sm:$0xff] %v3968_v60  ;;  %6129 = vst [vmem:[#allocation143_spill] sm:$0xff] %v3970_v1  ;;  %v6283_v1 = vld [vmem:[#allocation39_spill] sm:$0xff]  ;;  %v6286_v60 = vld [vmem:[#allocation122_spill] sm:$0xff] }
 0x163   : > { %1256 = vperm.xlu1 %2740, %v3162_v26   ;;  %1259 = vperm.xlu0 %2739, %v3159_v23  }
 0x165   : > { %v3974_v0 = vpop.permute.xlu1 %896  ;;  %v3976_v10 = vpop.permute.xlu0 %891 }
 0x166   : > { %6130 = vst [vmem:[#allocation144_spill] sm:$0xff] %v3974_v0  ;;  %6131 = vst [vmem:[#allocation145_spill] sm:$0xff] %v3976_v10  ;;  %v6197_v10 = vld [vmem:[#allocation45_spill] sm:$0xff] }
 0x167   : > { %1262 = vperm.xlu1 %2740, %v3176_v34   ;;  %1265 = vperm.xlu0 %2739, %v3173_v31   ;;  %v6277_v0 = vld [vmem:[#allocation117_spill] sm:$0xff] }
 0x169   : > { %v3980_v5 = vpop.permute.xlu1 %906  ;;  %v3982_v18 = vpop.permute.xlu0 %901 }
 0x16a   : > { %6132 = vst [vmem:[#allocation146_spill] sm:$0xff] %v3980_v5  ;;  %6133 = vst [vmem:[#allocation147_spill] sm:$0xff] %v3982_v18  ;;  %v6193_v18 = vld [vmem:[#allocation41_spill] sm:$0xff] }
 0x16b   : > { %1268 = vperm.xlu1 %2740, %v3190_v42   ;;  %1271 = vperm.xlu0 %2739, %v3187_v39  }
 0x16d   : > { %v3986_v15 = vpop.permute.xlu1 %916  ;;  %v3988_v26 = vpop.permute.xlu0 %911 }
 0x16e   : > { %6134 = vst [vmem:[#allocation148_spill] sm:$0xff] %v3986_v15  ;;  %6135 = vst [vmem:[#allocation149_spill] sm:$0xff] %v3988_v26  ;;  %v6189_v26 = vld [vmem:[#allocation37_spill] sm:$0xff] }
 0x16f   : > { %1274 = vperm.xlu1 %2740, %v3204_v50   ;;  %1277 = vperm.xlu0 %2739, %v3201_v47  }
 0x171   : > { %v3992_v23 = vpop.permute.xlu1 %926  ;;  %v3994_v34 = vpop.permute.xlu0 %921 }
 0x172   : > { %6136 = vst [vmem:[#allocation150_spill] sm:$0xff] %v3992_v23  ;;  %6137 = vst [vmem:[#allocation151_spill] sm:$0xff] %v3994_v34  ;;  %v6185_v34 = vld [vmem:[#allocation33_spill] sm:$0xff] }
 0x173   : > { %1280 = vperm.xlu1 %2740, %v3218_v58   ;;  %1283 = vperm.xlu0 %2739, %v3215_v55  }
 0x175   : > { %v3998_v31 = vpop.permute.xlu1 %936  ;;  %v4000_v42 = vpop.permute.xlu0 %931 }
 0x176   : > { %6138 = vst [vmem:[#allocation152_spill] sm:$0xff] %v3998_v31  ;;  %6139 = vst [vmem:[#allocation153_spill] sm:$0xff] %v4000_v42  ;;  %v6181_v42 = vld [vmem:[#allocation29_spill] sm:$0xff] }
 0x177   : > { %1286 = vperm.xlu1 %2740, %v3232_v2   ;;  %1289 = vperm.xlu0 %2739, %v3229_v63  }
 0x179   : > { %v4004_v39 = vpop.permute.xlu1 %946  ;;  %v4006_v50 = vpop.permute.xlu0 %941 }
 0x17a   : > { %6140 = vst [vmem:[#allocation154_spill] sm:$0xff] %v4004_v39  ;;  %6141 = vst [vmem:[#allocation155_spill] sm:$0xff] %v4006_v50  ;;  %v6177_v50 = vld [vmem:[#allocation25_spill] sm:$0xff] }
 0x17b   : > { %1292 = vperm.xlu1 %2740, %v3246_v19   ;;  %1295 = vperm.xlu0 %2739, %v3243_v14   ;;  %v6148_v14 = vld [vmem:[#allocation5_spill] sm:$0xff] }
 0x17d   : > { %v4010_v47 = vpop.permute.xlu1 %956  ;;  %v4012_v58 = vpop.permute.xlu0 %951 }
 0x17e   : > { %6142 = vst [vmem:[#allocation156_spill] sm:$0xff] %v4010_v47  ;;  %6143 = vst [vmem:[#allocation157_spill] sm:$0xff] %v4012_v58 }
 0x17f   : > { %1298 = vperm.xlu1 %2740, %v3260_v35   ;;  %1301 = vperm.xlu0 %2739, %v3257_v30   ;;  %v6151_v30 = vld [vmem:[#allocation7_spill] sm:$0xff] }
 0x181   : > { %v4016_v55 = vpop.permute.xlu1 %966  ;;  %v4018_v2 = vpop.permute.xlu0 %961 }
 0x182   : > { %6144 = vst [vmem:[#allocation158_spill] sm:$0xff] %v4016_v55  ;;  %6145 = vst [vmem:[#allocation159_spill] sm:$0xff] %v4018_v2  ;;  %v6152_v55 = vld [vmem:[#allocation6_spill] sm:$0xff] }
 0x183   : > { %1304 = vperm.xlu1 %2740, %v3274_v51   ;;  %1307 = vperm.xlu0 %2739, %v3271_v46   ;;  %v6155_v46 = vld [vmem:[#allocation8_spill] sm:$0xff] }
 0x185   : > { %v4022_v63 = vpop.permute.xlu1 %976  ;;  %v4024_v19 = vpop.permute.xlu0 %971 }
 0x186   : > { %6146 = vst [vmem:[#allocation160_spill] sm:$0xff] %v4022_v63  ;;  %6147 = vst [vmem:[#allocation161_spill] sm:$0xff] %v4024_v19  ;;  %v6173_v63 = vld [vmem:[#allocation21_spill] sm:$0xff] }
 0x187   : > { %1310 = vperm.xlu1 %2740, %v3288_v4   ;;  %1313 = vperm.xlu0 %2739, %v6148_v14   ;;  %v6158_v14 = vld [vmem:[#allocation10_spill] sm:$0xff] }
 0x189   : > { %v4028_v58 = vpop.permute.xlu1 %986  ;;  %v4030_v35 = vpop.permute.xlu0 %981 }
 0x18a   : > { %6149 = vst [vmem:[#allocation5_spill] sm:$0xff] %v4028_v58  ;;  %6150 = vst [vmem:[#allocation162_spill] sm:$0xff] %v4030_v35  ;;  %v6159_v58 = vld [vmem:[#allocation9_spill] sm:$0xff] }
 0x18b   : > { %1316 = vperm.xlu1 %2740, %v6151_v30   ;;  %1319 = vperm.xlu0 %2739, %v6152_v55   ;;  %v6162_v55 = vld [vmem:[#allocation12_spill] sm:$0xff] }
 0x18d   : > { %v4034_v2 = vpop.permute.xlu1 %996  ;;  %v4036_v51 = vpop.permute.xlu0 %991 }
 0x18e   : > { %6153 = vst [vmem:[#allocation7_spill] sm:$0xff] %v4034_v2  ;;  %6154 = vst [vmem:[#allocation6_spill] sm:$0xff] %v4036_v51  ;;  %v6163_v2 = vld [vmem:[#allocation11_spill] sm:$0xff] }
 0x18f   : > { %1322 = vperm.xlu1 %2740, %v3316_v11   ;;  %1325 = vperm.xlu0 %2739, %v6155_v46   ;;  %v6164_v46 = vld [vmem:[#allocation14_spill] sm:$0xff] }
 0x191   : > { %v4040_v19 = vpop.permute.xlu1 %1006  ;;  %v4042_v4 = vpop.permute.xlu0 %1001 }
 0x192   : > { %6156 = vst [vmem:[#allocation8_spill] sm:$0xff] %v4040_v19  ;;  %6157 = vst [vmem:[#allocation163_spill] sm:$0xff] %v4042_v4  ;;  %v6165_v19 = vld [vmem:[#allocation13_spill] sm:$0xff] }
 0x193   : > { %1328 = vperm.xlu1 %2740, %v6158_v14   ;;  %1331 = vperm.xlu0 %2739, %v6159_v58   ;;  %v6168_v58 = vld [vmem:[#allocation18_spill] sm:$0xff] }
 0x195   : > { %v4046_v35 = vpop.permute.xlu1 %1016  ;;  %v4048_v30 = vpop.permute.xlu0 %1011 }
 0x196   : > { %6160 = vst [vmem:[#allocation10_spill] sm:$0xff] %v4046_v35  ;;  %6161 = vst [vmem:[#allocation9_spill] sm:$0xff] %v4048_v30  ;;  %v6169_v35 = vld [vmem:[#allocation17_spill] sm:$0xff] }
 0x197   : > { %1334 = vperm.xlu1 %2740, %v6162_v55   ;;  %1337 = vperm.xlu0 %2739, %v6163_v2   ;;  %v6172_v2 = vld [vmem:[#allocation22_spill] sm:$0xff] }
 0x19a   : > { %v4052_v51 = vpop.permute.xlu1 %1151  ;;  %v4054_v11 = vpop.permute.xlu0 %1148 }
 0x19b   : > { %1468 = vperm.xlu1 %2740, %v6164_v46   ;;  %1472 = vperm.xlu0 %2739, %v6165_v19   ;;  %v6176_v19 = vld [vmem:[#allocation26_spill] sm:$0xff] }
 0x19e   : > { %v4058_v4 = vpop.permute.xlu1 %1154  ;;  %v4060_v14 = vpop.permute.xlu0 %1157 }
 0x19f   : > { %6166 = vst [vmem:[#allocation12_spill] sm:$0xff] %v4058_v4  ;;  %6167 = vst [vmem:[#allocation11_spill] sm:$0xff] %v4060_v14  ;;  %1476 = vperm.xlu1 %2740, %v6168_v58   ;;  %1480 = vperm.xlu0 %2739, %v6169_v35   ;;  %v6180_v35 = vld [vmem:[#allocation30_spill] sm:$0xff] }
 0x1a2   : > { %v4064_v30 = vpop.permute.xlu1 %1160  ;;  %v4066_v55 = vpop.permute.xlu0 %1163 }
 0x1a3   : > { %6170 = vst [vmem:[#allocation14_spill] sm:$0xff] %v4064_v30  ;;  %6171 = vst [vmem:[#allocation13_spill] sm:$0xff] %v4066_v55  ;;  %1484 = vperm.xlu1 %2740, %v6172_v2   ;;  %1488 = vperm.xlu0 %2739, %v6173_v63   ;;  %v6184_v63 = vld [vmem:[#allocation34_spill] sm:$0xff] }
 0x1a6   : > { %v4070_v47 = vpop.permute.xlu1 %1166  ;;  %v4072_v46 = vpop.permute.xlu0 %1169 }
 0x1a7   : > { %6174 = vst [vmem:[#allocation18_spill] sm:$0xff] %v4070_v47  ;;  %6175 = vst [vmem:[#allocation17_spill] sm:$0xff] %v4072_v46  ;;  %1492 = vperm.xlu1 %2740, %v6176_v19   ;;  %1496 = vperm.xlu0 %2739, %v6177_v50   ;;  %v6188_v50 = vld [vmem:[#allocation38_spill] sm:$0xff]  ;;  %v6287_v46 = vld [vmem:[#allocation43_spill] sm:$0xff] }
 0x1a8   : > { %v6289_v47 = vld [vmem:[#allocation121_spill] sm:$0xff] }
 0x1aa   : > { %v4076_v39 = vpop.permute.xlu1 %1172  ;;  %v4078_v58 = vpop.permute.xlu0 %1175 }
 0x1ab   : > { %6178 = vst [vmem:[#allocation22_spill] sm:$0xff] %v4076_v39  ;;  %6179 = vst [vmem:[#allocation21_spill] sm:$0xff] %v4078_v58  ;;  %1500 = vperm.xlu1 %2740, %v6180_v35   ;;  %1504 = vperm.xlu0 %2739, %v6181_v42   ;;  %v6192_v42 = vld [vmem:[#allocation42_spill] sm:$0xff]  ;;  %v6284_v58 = vld [vmem:[#allocation40_spill] sm:$0xff] }
 0x1ae   : > { %v4082_v31 = vpop.permute.xlu1 %1178  ;;  %v4084_v2 = vpop.permute.xlu0 %1181 }
 0x1af   : > { %6182 = vst [vmem:[#allocation26_spill] sm:$0xff] %v4082_v31  ;;  %6183 = vst [vmem:[#allocation25_spill] sm:$0xff] %v4084_v2  ;;  %1508 = vperm.xlu1 %2740, %v6184_v63   ;;  %1512 = vperm.xlu0 %2739, %v6185_v34   ;;  %v6196_v34 = vld [vmem:[#allocation46_spill] sm:$0xff]  ;;  %v6278_v2 = vld [vmem:[#allocation31_spill] sm:$0xff] }
 0x1b2   : > { %v4088_v23 = vpop.permute.xlu1 %1184  ;;  %v4090_v19 = vpop.permute.xlu0 %1187 }
 0x1b3   : > { %6186 = vst [vmem:[#allocation30_spill] sm:$0xff] %v4088_v23  ;;  %6187 = vst [vmem:[#allocation29_spill] sm:$0xff] %v4090_v19  ;;  %1516 = vperm.xlu1 %2740, %v6188_v50   ;;  %1520 = vperm.xlu0 %2739, %v6189_v26   ;;  %v6200_v26 = vld [vmem:[#allocation50_spill] sm:$0xff]  ;;  %v6275_v23 = vld [vmem:[#allocation27_spill] sm:$0xff] }
 0x1b6   : > { %v4094_v15 = vpop.permute.xlu1 %1190  ;;  %v4096_v35 = vpop.permute.xlu0 %1193 }
 0x1b7   : > { %6190 = vst [vmem:[#allocation34_spill] sm:$0xff] %v4094_v15  ;;  %6191 = vst [vmem:[#allocation33_spill] sm:$0xff] %v4096_v35  ;;  %1524 = vperm.xlu1 %2740, %v6192_v42   ;;  %1528 = vperm.xlu0 %2739, %v6193_v18   ;;  %v6201_v15 = vld [vmem:[#allocation49_spill] sm:$0xff]  ;;  %v6204_v18 = vld [vmem:[#allocation54_spill] sm:$0xff] }
 0x1ba   : > { %v4100_v5 = vpop.permute.xlu1 %1196  ;;  %v4102_v63 = vpop.permute.xlu0 %1199 }
 0x1bb   : > { %6194 = vst [vmem:[#allocation38_spill] sm:$0xff] %v4100_v5  ;;  %6195 = vst [vmem:[#allocation37_spill] sm:$0xff] %v4102_v63  ;;  %1532 = vperm.xlu1 %2740, %v6196_v34   ;;  %1536 = vperm.xlu0 %2739, %v6197_v10   ;;  %v6205_v5 = vld [vmem:[#allocation53_spill] sm:$0xff]  ;;  %v6208_v10 = vld [vmem:[#allocation58_spill] sm:$0xff] }
 0x1be   : > { %v4106_v19 = vpop.permute.xlu1 %1202  ;;  %v4108_v50 = vpop.permute.xlu0 %1205 }
 0x1bf   : > { %6198 = vst [vmem:[#allocation42_spill] sm:$0xff] %v4106_v19  ;;  %6199 = vst [vmem:[#allocation41_spill] sm:$0xff] %v4108_v50  ;;  %1540 = vperm.xlu1 %2740, %v6200_v26   ;;  %1544 = vperm.xlu0 %2739, %v6201_v15   ;;  %v6209_v19 = vld [vmem:[#allocation57_spill] sm:$0xff]  ;;  %v6212_v15 = vld [vmem:[#allocation62_spill] sm:$0xff] }
 0x1c2   : > { %v4112_v35 = vpop.permute.xlu1 %1208  ;;  %v4114_v42 = vpop.permute.xlu0 %1211 }
 0x1c3   : > { %6202 = vst [vmem:[#allocation46_spill] sm:$0xff] %v4112_v35  ;;  %6203 = vst [vmem:[#allocation45_spill] sm:$0xff] %v4114_v42  ;;  %1548 = vperm.xlu1 %2740, %v6204_v18   ;;  %1552 = vperm.xlu0 %2739, %v6205_v5   ;;  %v6213_v35 = vld [vmem:[#allocation61_spill] sm:$0xff]  ;;  %v6216_v5 = vld [vmem:[#allocation66_spill] sm:$0xff] }
 0x1c6   : > { %v4118_v63 = vpop.permute.xlu1 %1214  ;;  %v4120_v34 = vpop.permute.xlu0 %1217 }
 0x1c7   : > { %6206 = vst [vmem:[#allocation50_spill] sm:$0xff] %v4118_v63  ;;  %6207 = vst [vmem:[#allocation49_spill] sm:$0xff] %v4120_v34  ;;  %1556 = vperm.xlu1 %2740, %v6208_v10   ;;  %1560 = vperm.xlu0 %2739, %v6209_v19   ;;  %v6217_v63 = vld [vmem:[#allocation65_spill] sm:$0xff]  ;;  %v6220_v19 = vld [vmem:[#allocation70_spill] sm:$0xff] }
 0x1ca   : > { %v4124_v50 = vpop.permute.xlu1 %1220  ;;  %v4126_v26 = vpop.permute.xlu0 %1223 }
 0x1cb   : > { %6210 = vst [vmem:[#allocation54_spill] sm:$0xff] %v4124_v50  ;;  %6211 = vst [vmem:[#allocation53_spill] sm:$0xff] %v4126_v26  ;;  %1564 = vperm.xlu1 %2740, %v6212_v15   ;;  %1568 = vperm.xlu0 %2739, %v6213_v35   ;;  %v6221_v50 = vld [vmem:[#allocation69_spill] sm:$0xff]  ;;  %v6224_v35 = vld [vmem:[#allocation74_spill] sm:$0xff] }
 0x1ce   : > { %v4130_v42 = vpop.permute.xlu1 %1226  ;;  %v4132_v18 = vpop.permute.xlu0 %1229 }
 0x1cf   : > { %6214 = vst [vmem:[#allocation58_spill] sm:$0xff] %v4130_v42  ;;  %6215 = vst [vmem:[#allocation57_spill] sm:$0xff] %v4132_v18  ;;  %1572 = vperm.xlu1 %2740, %v6216_v5   ;;  %1576 = vperm.xlu0 %2739, %v6217_v63   ;;  %v6225_v42 = vld [vmem:[#allocation73_spill] sm:$0xff]  ;;  %v6228_v63 = vld [vmem:[#allocation78_spill] sm:$0xff] }
 0x1d2   : > { %v4136_v34 = vpop.permute.xlu1 %1232  ;;  %v4138_v10 = vpop.permute.xlu0 %1235 }
 0x1d3   : > { %6218 = vst [vmem:[#allocation62_spill] sm:$0xff] %v4136_v34  ;;  %6219 = vst [vmem:[#allocation61_spill] sm:$0xff] %v4138_v10  ;;  %1580 = vperm.xlu1 %2740, %v6220_v19   ;;  %1584 = vperm.xlu0 %2739, %v6221_v50   ;;  %v6229_v34 = vld [vmem:[#allocation77_spill] sm:$0xff]  ;;  %v6232_v50 = vld [vmem:[#allocation82_spill] sm:$0xff] }
 0x1d6   : > { %v4142_v26 = vpop.permute.xlu1 %1238  ;;  %v4144_v15 = vpop.permute.xlu0 %1241 }
 0x1d7   : > { %6222 = vst [vmem:[#allocation66_spill] sm:$0xff] %v4142_v26  ;;  %6223 = vst [vmem:[#allocation65_spill] sm:$0xff] %v4144_v15  ;;  %1588 = vperm.xlu1 %2740, %v6224_v35   ;;  %1592 = vperm.xlu0 %2739, %v6225_v42   ;;  %v6233_v26 = vld [vmem:[#allocation81_spill] sm:$0xff]  ;;  %v6236_v42 = vld [vmem:[#allocation86_spill] sm:$0xff] }
 0x1da   : > { %v4148_v18 = vpop.permute.xlu1 %1244  ;;  %v4150_v5 = vpop.permute.xlu0 %1247 }
 0x1db   : > { %6226 = vst [vmem:[#allocation70_spill] sm:$0xff] %v4148_v18  ;;  %6227 = vst [vmem:[#allocation69_spill] sm:$0xff] %v4150_v5  ;;  %1596 = vperm.xlu1 %2740, %v6228_v63   ;;  %1600 = vperm.xlu0 %2739, %v6229_v34   ;;  %v6237_v18 = vld [vmem:[#allocation85_spill] sm:$0xff]  ;;  %v6240_v34 = vld [vmem:[#allocation90_spill] sm:$0xff] }
 0x1de   : > { %v4154_v10 = vpop.permute.xlu1 %1250  ;;  %v4156_v19 = vpop.permute.xlu0 %1253 }
 0x1df   : > { %6230 = vst [vmem:[#allocation74_spill] sm:$0xff] %v4154_v10  ;;  %6231 = vst [vmem:[#allocation73_spill] sm:$0xff] %v4156_v19  ;;  %1604 = vperm.xlu1 %2740, %v6232_v50   ;;  %1608 = vperm.xlu0 %2739, %v6233_v26   ;;  %v6241_v10 = vld [vmem:[#allocation89_spill] sm:$0xff]  ;;  %v6244_v26 = vld [vmem:[#allocation94_spill] sm:$0xff] }
 0x1e2   : > { %v4160_v15 = vpop.permute.xlu1 %1256  ;;  %v4162_v35 = vpop.permute.xlu0 %1259 }
 0x1e3   : > { %6234 = vst [vmem:[#allocation78_spill] sm:$0xff] %v4160_v15  ;;  %6235 = vst [vmem:[#allocation77_spill] sm:$0xff] %v4162_v35  ;;  %1612 = vperm.xlu1 %2740, %v6236_v42   ;;  %1616 = vperm.xlu0 %2739, %v6237_v18   ;;  %v6245_v15 = vld [vmem:[#allocation93_spill] sm:$0xff]  ;;  %v6248_v18 = vld [vmem:[#allocation98_spill] sm:$0xff] }
 0x1e6   : > { %v4166_v5 = vpop.permute.xlu1 %1262  ;;  %v4168_v63 = vpop.permute.xlu0 %1265 }
 0x1e7   : > { %6238 = vst [vmem:[#allocation82_spill] sm:$0xff] %v4166_v5  ;;  %6239 = vst [vmem:[#allocation81_spill] sm:$0xff] %v4168_v63  ;;  %1620 = vperm.xlu1 %2740, %v6240_v34   ;;  %1624 = vperm.xlu0 %2739, %v6241_v10   ;;  %v6249_v5 = vld [vmem:[#allocation97_spill] sm:$0xff]  ;;  %v6252_v10 = vld [vmem:[#allocation102_spill] sm:$0xff] }
 0x1ea   : > { %v4172_v19 = vpop.permute.xlu1 %1268  ;;  %v4174_v50 = vpop.permute.xlu0 %1271 }
 0x1eb   : > { %6242 = vst [vmem:[#allocation86_spill] sm:$0xff] %v4172_v19  ;;  %6243 = vst [vmem:[#allocation85_spill] sm:$0xff] %v4174_v50  ;;  %1628 = vperm.xlu1 %2740, %v6244_v26   ;;  %1632 = vperm.xlu0 %2739, %v6245_v15   ;;  %v6253_v19 = vld [vmem:[#allocation101_spill] sm:$0xff]  ;;  %v183_v50 = vlaneseq }
 0x1ee   : > { %v4178_v35 = vpop.permute.xlu1 %1274  ;;  %v4180_v42 = vpop.permute.xlu0 %1277 }
 0x1ef   : > { %6246 = vst [vmem:[#allocation90_spill] sm:$0xff] %v4178_v35  ;;  %6247 = vst [vmem:[#allocation89_spill] sm:$0xff] %v4180_v42  ;;  %1636 = vperm.xlu1 %2740, %v6248_v18   ;;  %1640 = vperm.xlu0 %2739, %v6249_v5   ;;  %v6256_v35 = vld [vmem:[#allocation106_spill] sm:$0xff]  ;;  %v6257_v42 = vld [vmem:[#allocation105_spill] sm:$0xff]  ;;  %v4196_v18 = vand.u32 127, %v183_v50 }
 0x1f0   : > { %v6266_v50 = vld [vmem:[#allocation16_spill] sm:$0xff] }
 0x1f1   : > { %vm571_vm0 = vcmp.eq.s32.totalorder %v6266_v50, %v4196_v18 }
 0x1f2   : > { %v4184_v63 = vpop.permute.xlu1 %1280  ;;  %v4186_v34 = vpop.permute.xlu0 %1283  ;;  %v4321_v56 = vsel %vm571_vm0, %v3862_v27, 0.0 }
 0x1f3   : > { %6250 = vst [vmem:[#allocation94_spill] sm:$0xff] %v4184_v63  ;;  %6251 = vst [vmem:[#allocation93_spill] sm:$0xff] %v4186_v34  ;;  %1644 = vperm.xlu1 %2740, %v6252_v10   ;;  %1648 = vperm.xlu0 %2739, %v6253_v19   ;;  %v6260_v34 = vld [vmem:[#allocation110_spill] sm:$0xff]  ;;  %v6261_v10 = vld [vmem:[#allocation109_spill] sm:$0xff]  ;;  %v4205_v19 = vadd.s32 128, %v4196_v18 }
 0x1f5   : > { %vm572_vm1 = vcmp.eq.s32.totalorder %v6266_v50, %v4205_v19  ;;  %vm606_vm14 = vcmp.eq.s32.totalorder %v6290_v61, %v4205_v19 }
 0x1f6   : > { %v4190_v26 = vpop.permute.xlu1 %1286  ;;  %v4192_v15 = vpop.permute.xlu0 %1289  ;;  %v4327_v14 = vsel %vm572_vm1, %v3862_v27, 0.0  ;;  %vm6312_vm1 = vcmp.eq.s32.totalorder %v6275_v23, %v4196_v18 }
 0x1f7   : > { %6254 = vst [vmem:[#allocation98_spill] sm:$0xff] %v4190_v26  ;;  %6255 = vst [vmem:[#allocation97_spill] sm:$0xff] %v4192_v15  ;;  %1652 = vperm.xlu1 %2740, %v6256_v35   ;;  %1656 = vperm.xlu0 %2739, %v6257_v42   ;;  %v6264_v35 = vld [vmem:[#allocation114_spill] sm:$0xff]  ;;  %v6265_v42 = vld [vmem:[#allocation113_spill] sm:$0xff] }
 0x1fa   : > { %v4198_v5 = vpop.permute.xlu1 %1292  ;;  %v4200_v63 = vpop.permute.xlu0 %1295 }
 0x1fb   : > { %6258 = vst [vmem:[#allocation102_spill] sm:$0xff] %v4198_v5  ;;  %6259 = vst [vmem:[#allocation101_spill] sm:$0xff] %v4200_v63  ;;  %1660 = vperm.xlu1 %2740, %v6260_v34   ;;  %1664 = vperm.xlu0 %2739, %v6261_v10   ;;  %v6267_v34 = vld [vmem:[#allocation15_spill] sm:$0xff]  ;;  %v6274_v5 = vld [vmem:[#allocation118_spill] sm:$0xff] }
 0x1fc   : > { %vm575_vm2 = vcmp.eq.s32.totalorder %v6267_v34, %v4196_v18  ;;  %vm576_vm3 = vcmp.eq.s32.totalorder %v6267_v34, %v4205_v19  ;;  %v6268_v10 = vld [vmem:[#allocation19_spill] sm:$0xff] }
 0x1fd   : > { %vm577_vm4 = vcmp.eq.s32.totalorder %v6268_v10, %v4196_v18  ;;  %vm578_vm5 = vcmp.eq.s32.totalorder %v6268_v10, %v4205_v19  ;;  %v6303_v10 = vld [vmem:[#allocation59_spill] sm:$0xff] }
 0x1fe   : > { %v4207_v26 = vpop.permute.xlu1 %1298  ;;  %v4209_v15 = vpop.permute.xlu0 %1301  ;;  %v4343_v27 = vsel %vm577_vm4, %v3866_v43, 0.0  ;;  %v4349_v50 = vsel %vm578_vm5, %v3866_v43, 0.0  ;;  %v6304_v43 = vld [vmem:[#allocation60_spill] sm:$0xff] }
 0x1ff   : > { %6262 = vst [vmem:[#allocation106_spill] sm:$0xff] %v4207_v26  ;;  %6263 = vst [vmem:[#allocation105_spill] sm:$0xff] %v4209_v15  ;;  %1668 = vperm.xlu1 %2740, %v6264_v35   ;;  %1672 = vperm.xlu0 %2739, %v6265_v42   ;;  %v6269_v35 = vld [vmem:[#allocation20_spill] sm:$0xff]  ;;  %v6271_v15 = vld [vmem:[#allocation23_spill] sm:$0xff] }
 0x200   : > { %vm573_vm6 = vcmp.eq.s32.totalorder %v6269_v35, %v4196_v18  ;;  %vm574_vm7 = vcmp.eq.s32.totalorder %v6269_v35, %v4205_v19  ;;  %vm581_vm8 = vcmp.eq.s32.totalorder %v6271_v15, %v4196_v18  ;;  %v6272_v26 = vld [vmem:[#allocation24_spill] sm:$0xff]  ;;  %6299 = vst [vmem:[#allocation20_spill] sm:$0xff] %v4343_v27  ;;  %6300 = vst [vmem:[#allocation23_spill] sm:$0xff] %v4349_v50  ;;  %v4355_v35 = vsel %vm575_vm2, %v3868_v38, 0.0  ;;  %v6302_v27 = vld [vmem:[#allocation126_spill] sm:$0xff] }
 0x201   : > { %v4309_v55 = vsel %vm573_vm6, %v3860_v62, 0.0  ;;  %v4315_v30 = vsel %vm574_vm7, %v3860_v62, 0.0  ;;  %v6298_v62 = vld [vmem:[#allocation56_spill] sm:$0xff]  ;;  %vm6307_vm4 = vcmp.eq.s32.totalorder %v6272_v26, %v4196_v18  ;;  %vm6308_vm5 = vcmp.eq.s32.totalorder %v6272_v26, %v4205_v19  ;;  %v6309_v50 = vld [vmem:[#allocation125_spill] sm:$0xff] }
 0x202   : > { %v4229_v42 = vpop.permute.xlu1 %1304  ;;  %v4239_v63 = vpop.permute.xlu0 %1307  ;;  %6294 = vst [vmem:[#allocation16_spill] sm:$0xff] %v4309_v55  ;;  %6295 = vst [vmem:[#allocation15_spill] sm:$0xff] %v4315_v30  ;;  %v6297_v55 = vld [vmem:[#allocation55_spill] sm:$0xff]  ;;  %vm611_vm15 = vcmp.eq.s32.totalorder %v6298_v62, %v4196_v18  ;;  %vm612_vm0 = vcmp.eq.s32.totalorder %v6298_v62, %v4205_v19 }
 0x203   : > { %6270 = vst [vmem:[#allocation110_spill] sm:$0xff] %v4229_v42  ;;  %6273 = vst [vmem:[#allocation109_spill] sm:$0xff] %v4239_v63  ;;  %1676 = vperm.xlu1 %2740, %v6274_v5   ;;  %v6276_v42 = vld [vmem:[#allocation28_spill] sm:$0xff]  ;;  %1680 = vperm.xlu0 %2739, %v6277_v0   ;;  %v6280_v63 = vld [vmem:[#allocation35_spill] sm:$0xff]  ;;  %vm613_vm6 = vcmp.eq.s32.totalorder %v6297_v55, %v4196_v18  ;;  %vm614_vm7 = vcmp.eq.s32.totalorder %v6297_v55, %v4205_v19 }
 0x204   : > { %v6279_v5 = vld [vmem:[#allocation32_spill] sm:$0xff] }
 0x205   : > { %v6281_v0 = vld [vmem:[#allocation36_spill] sm:$0xff]  ;;  %vm6325_vm2 = vcmp.eq.s32.totalorder %v6279_v5, %v4196_v18 }
 0x206   : > { %v4267_v31 = vpop.permute.xlu1 %1310  ;;  %v4277_v39 = vpop.permute.xlu0 %1313 }
 0x207   : > { %6282 = vst [vmem:[#allocation114_spill] sm:$0xff] %v4267_v31  ;;  %6285 = vst [vmem:[#allocation113_spill] sm:$0xff] %v4277_v39  ;;  %1684 = vperm.xlu1 %2740, %v6286_v60   ;;  %v6288_v31 = vld [vmem:[#allocation44_spill] sm:$0xff]  ;;  %1688 = vperm.xlu0 %2739, %v6289_v47   ;;  %v6292_v39 = vld [vmem:[#allocation51_spill] sm:$0xff] }
 0x208   : > { %v6291_v60 = vld [vmem:[#allocation48_spill] sm:$0xff]  ;;  %vm609_vm12 = vcmp.eq.s32.totalorder %v6292_v39, %v4196_v18  ;;  %vm610_vm13 = vcmp.eq.s32.totalorder %v6292_v39, %v4205_v19 }
 0x209   : > { %vm603_vm11 = vcmp.eq.s32.totalorder %v6291_v60, %v4196_v18  ;;  %vm604_vm9 = vcmp.eq.s32.totalorder %v6291_v60, %v4205_v19  ;;  %v6293_v47 = vld [vmem:[#allocation52_spill] sm:$0xff] }
 0x20a   : > { %vm607_vm10 = vcmp.eq.s32.totalorder %v6293_v47, %v4196_v18  ;;  %v4329_v4 = vpop.permute.xlu1 %1316  ;;  %v4363_v30 = vpop.permute.xlu0 %1319  ;;  %v6357_v39 = vld [vmem:[#allocation80_spill] sm:$0xff] }
 0x20b   : > { %6296 = vst [vmem:[#allocation19_spill] sm:$0xff] %v4329_v4  ;;  %v4361_v4 = vsel %vm576_vm3, %v3868_v38, 0.0  ;;  %6301 = vst [vmem:[#allocation24_spill] sm:$0xff] %v4363_v30  ;;  %1692 = vperm.xlu1 %2740, %v6302_v27   ;;  %v4378_v38 = vsel %vm581_vm8, %v3872_v3, 0.0  ;;  %vm6306_vm3 = vcmp.eq.s32.totalorder %v6271_v15, %v4205_v19  ;;  %v4390_v27 = vsel %vm6307_vm4, %v3874_v59, 0.0  ;;  %1696 = vperm.xlu0 %2739, %v6309_v50  }
 0x20c   : > { %6305 = vst [vmem:[#allocation118_spill] sm:$0xff] %v4378_v38  ;;  %v4384_v34 = vsel %vm6306_vm3, %v3872_v3, 0.0  ;;  %v4396_v30 = vsel %vm6308_vm5, %v3874_v59, 0.0  ;;  %v6310_v38 = vld [vmem:[#allocation63_spill] sm:$0xff]  ;;  %v6311_v3 = vld [vmem:[#allocation64_spill] sm:$0xff]  ;;  %v4411_v59 = vsel %vm6312_vm1, %v3878_v54, 0.0  ;;  %vm6314_vm5 = vcmp.eq.s32.totalorder %v6275_v23, %v4205_v19 }
 0x20d   : > { %6313 = vst [vmem:[#allocation27_spill] sm:$0xff] %v4411_v59  ;;  %v4417_v26 = vsel %vm6314_vm5, %v3878_v54, 0.0  ;;  %vm6316_vm3 = vcmp.eq.s32.totalorder %v6276_v42, %v4196_v18  ;;  %vm6317_vm4 = vcmp.eq.s32.totalorder %v6276_v42, %v4205_v19  ;;  %v6319_v59 = vld [vmem:[#allocation67_spill] sm:$0xff]  ;;  %v6320_v54 = vld [vmem:[#allocation68_spill] sm:$0xff]  ;;  %v4455_v42 = vsel %vm6325_vm2, %v3886_v6, 0.0 }
 0x20e   : > { %6315 = vst [vmem:[#allocation28_spill] sm:$0xff] %v4417_v26  ;;  %v4423_v15 = vsel %vm6316_vm3, %v3880_v9, 0.0  ;;  %v4429_v50 = vsel %vm6317_vm4, %v3880_v9, 0.0  ;;  %vm6321_vm3 = vcmp.eq.s32.totalorder %v6278_v2, %v4196_v18  ;;  %vm6323_vm4 = vcmp.eq.s32.totalorder %v6278_v2, %v4205_v19 }
 0x20f   : > { %6318 = vst [vmem:[#allocation117_spill] sm:$0xff] %v4429_v50  ;;  %v4443_v23 = vsel %vm6321_vm3, %v3884_v7, 0.0  ;;  %v4449_v9 = vsel %vm6323_vm4, %v3884_v7, 0.0  ;;  %vm6326_vm8 = vcmp.eq.s32.totalorder %v6279_v5, %v4205_v19  ;;  %v4463_v50 = vpop.permute.xlu1 %1322  ;;  %v6329_v7 = vld [vmem:[#allocation72_spill] sm:$0xff]  ;;  %vm6330_vm1 = vcmp.eq.s32.totalorder %v6280_v63, %v4196_v18 }
 0x210   : > { %6322 = vst [vmem:[#allocation31_spill] sm:$0xff] %v4443_v23  ;;  %6324 = vst [vmem:[#allocation32_spill] sm:$0xff] %v4449_v9  ;;  %v4461_v26 = vsel %vm6326_vm8, %v3886_v6, 0.0  ;;  %v6328_v23 = vld [vmem:[#allocation71_spill] sm:$0xff]  ;;  %v4477_v6 = vsel %vm6330_vm1, %v3890_v8, 0.0  ;;  %vm6332_vm8 = vcmp.eq.s32.totalorder %v6280_v63, %v4205_v19  ;;  %vm6334_vm4 = vcmp.eq.s32.totalorder %v6281_v0, %v4196_v18  ;;  %v4497_v9 = vpop.permute.xlu0 %1325 }
 0x211   : > { %6327 = vst [vmem:[#allocation35_spill] sm:$0xff] %v4463_v50  ;;  %6331 = vst [vmem:[#allocation36_spill] sm:$0xff] %v4477_v6  ;;  %v4483_v2 = vsel %vm6332_vm8, %v3890_v8, 0.0  ;;  %v4489_v5 = vsel %vm6334_vm4, %v3892_v13, 0.0  ;;  %vm6335_vm2 = vcmp.eq.s32.totalorder %v6281_v0, %v4205_v19  ;;  %v6337_v6 = vld [vmem:[#allocation130_spill] sm:$0xff]  ;;  %v6338_v63 = vld [vmem:[#allocation75_spill] sm:$0xff]  ;;  %vm6342_vm3 = vcmp.eq.s32.totalorder %v6283_v1, %v4205_v19 }
 0x212   : > { %6333 = vst [vmem:[#allocation39_spill] sm:$0xff] %v4483_v2  ;;  %v4495_v50 = vsel %vm6335_vm2, %v3892_v13, 0.0  ;;  %6336 = vst [vmem:[#allocation40_spill] sm:$0xff] %v4497_v9  ;;  %1700 = vperm.xlu1 %2740, %v6337_v6   ;;  %vm633_vm1 = vcmp.eq.s32.totalorder %v6338_v63, %v4196_v18  ;;  %v6339_v8 = vld [vmem:[#allocation76_spill] sm:$0xff]  ;;  %vm6340_vm2 = vcmp.eq.s32.totalorder %v6283_v1, %v4196_v18  ;;  %v4518_v0 = vsel %vm6342_vm3, %v3896_v12, 0.0  ;;  %v6345_v2 = vld [vmem:[#allocation129_spill] sm:$0xff] }
 0x213   : > { %v4512_v13 = vsel %vm6340_vm2, %v3896_v12, 0.0  ;;  %vm6343_vm8 = vcmp.eq.s32.totalorder %v6284_v58, %v4196_v18  ;;  %vm6344_vm5 = vcmp.eq.s32.totalorder %v6284_v58, %v4205_v19  ;;  %1704 = vperm.xlu0 %2739, %v6345_v2   ;;  %vm6347_vm4 = vcmp.eq.s32.totalorder %v6287_v46, %v4196_v18 }
 0x214   : > { %6341 = vst [vmem:[#allocation122_spill] sm:$0xff] %v4512_v13  ;;  %v4524_v6 = vsel %vm6343_vm8, %v3898_v17, 0.0  ;;  %v4530_v9 = vsel %vm6344_vm5, %v3898_v17, 0.0  ;;  %v6346_v13 = vld [vmem:[#allocation79_spill] sm:$0xff]  ;;  %v4541_v12 = vsel %vm6347_vm4, %v3902_v16, 0.0  ;;  %vm6348_vm8 = vcmp.eq.s32.totalorder %v6287_v46, %v4205_v19 }
 0x215   : > { %vm637_vm2 = vcmp.eq.s32.totalorder %v6346_v13, %v4196_v18  ;;  %v4547_v17 = vsel %vm6348_vm8, %v3902_v16, 0.0  ;;  %vm6349_vm5 = vcmp.eq.s32.totalorder %v6288_v31, %v4196_v18  ;;  %vm6350_vm3 = vcmp.eq.s32.totalorder %v6288_v31, %v4205_v19  ;;  %v4585_v31 = vpop.permute.xlu1 %1328 }
 0x216   : > { %v4553_v1 = vsel %vm6349_vm5, %v3904_v21, 0.0  ;;  %v4559_v58 = vsel %vm6350_vm3, %v3904_v21, 0.0  ;;  %vm6351_vm4 = vcmp.eq.s32.totalorder %v6290_v61, %v4196_v18  ;;  %v4571_v16 = vsel %vm606_vm14, %v3908_v20, 0.0  ;;  %6352 = vst [vmem:[#allocation43_spill] sm:$0xff] %v4585_v31  ;;  %v4611_v31 = vpop.permute.xlu0 %1331 }
 0x217   : > { %v4565_v2 = vsel %vm6351_vm4, %v3908_v20, 0.0  ;;  %v4577_v46 = vsel %vm603_vm11, %v3910_v25, 0.0  ;;  %v4583_v21 = vsel %vm604_vm9, %v3910_v25, 0.0  ;;  %v4591_v20 = vsel %vm609_vm12, %v3914_v24, 0.0  ;;  %6355 = vst [vmem:[#allocation121_spill] sm:$0xff] %v4611_v31  ;;  %v6358_v31 = vld [vmem:[#allocation133_spill] sm:$0xff] }
 0x218   : > { %6353 = vst [vmem:[#allocation44_spill] sm:$0xff] %v4591_v20  ;;  %v4597_v61 = vsel %vm610_vm13, %v3914_v24, 0.0  ;;  %v4603_v25 = vsel %vm607_vm10, %v3916_v29, 0.0  ;;  %vm6354_vm9 = vcmp.eq.s32.totalorder %v6293_v47, %v4205_v19  ;;  %v6356_v20 = vld [vmem:[#allocation134_spill] sm:$0xff]  ;;  %vm635_vm11 = vcmp.eq.s32.totalorder %v6357_v39, %v4196_v18  ;;  %1712 = vperm.xlu0 %2739, %v6358_v31  }
 0x219   : > { %v4609_v60 = vsel %vm6354_vm9, %v3916_v29, 0.0  ;;  %1708 = vperm.xlu1 %2740, %v6356_v20   ;;  %vm636_vm12 = vcmp.eq.s32.totalorder %v6357_v39, %v4205_v19  ;;  %v4622_v24 = vsel %vm613_vm6, %v3920_v28, 0.0  ;;  %v4628_v29 = vsel %vm614_vm7, %v3920_v28, 0.0 }
 0x21a   : > { %v4634_v47 = vsel %vm611_vm15, %v3922_v33, 0.0  ;;  %v4640_v20 = vsel %vm612_vm0, %v3922_v33, 0.0  ;;  %vm6359_vm10 = vcmp.eq.s32.totalorder %v6303_v10, %v4196_v18  ;;  %vm6360_vm13 = vcmp.eq.s32.totalorder %v6303_v10, %v4205_v19 }
 0x21b   : > { %v4647_v28 = vsel %vm6359_vm10, %v3926_v32, 0.0  ;;  %v4653_v55 = vsel %vm6360_vm13, %v3926_v32, 0.0  ;;  %vm6361_vm14 = vcmp.eq.s32.totalorder %v6304_v43, %v4196_v18  ;;  %vm6362_vm15 = vcmp.eq.s32.totalorder %v6304_v43, %v4205_v19  ;;  %v4691_v43 = vpop.permute.xlu1 %1334 }
 0x21c   : > { %v4659_v33 = vsel %vm6361_vm14, %v3928_v37, 0.0  ;;  %v4665_v62 = vsel %vm6362_vm15, %v3928_v37, 0.0  ;;  %vm6363_vm6 = vcmp.eq.s32.totalorder %v6310_v38, %v4196_v18  ;;  %vm6364_vm7 = vcmp.eq.s32.totalorder %v6310_v38, %v4205_v19  ;;  %6367 = vst [vmem:[#allocation47_spill] sm:$0xff] %v4691_v43  ;;  %v4717_v43 = vpop.permute.xlu0 %1337 }
 0x21d   : > { %v4671_v31 = vsel %vm6363_vm6, %v3932_v36, 0.0  ;;  %v4677_v32 = vsel %vm6364_vm7, %v3932_v36, 0.0  ;;  %vm6365_vm0 = vcmp.eq.s32.totalorder %v6311_v3, %v4196_v18  ;;  %vm6366_vm3 = vcmp.eq.s32.totalorder %v6311_v3, %v4205_v19  ;;  %6372 = vst [vmem:[#allocation48_spill] sm:$0xff] %v4717_v43  ;;  %1716 = vperm.xlu1 %2740, %v3852_v22   ;;  %v6379_v43 = vld [vmem:[#allocation137_spill] sm:$0xff] }
 0x21e   : > { %v4683_v10 = vsel %vm6365_vm0, %v3934_v41, 0.0  ;;  %v4689_v37 = vsel %vm6366_vm3, %v3934_v41, 0.0  ;;  %vm6368_vm8 = vcmp.eq.s32.totalorder %v6319_v59, %v4196_v18  ;;  %vm6369_vm5 = vcmp.eq.s32.totalorder %v6319_v59, %v4205_v19  ;;  %1720 = vperm.xlu0 %2739, %v6379_v43  }
 0x21f   : > { %v4697_v36 = vsel %vm6368_vm8, %v3938_v40, 0.0  ;;  %v4703_v38 = vsel %vm6369_vm5, %v3938_v40, 0.0  ;;  %vm6370_vm4 = vcmp.eq.s32.totalorder %v6320_v54, %v4196_v18  ;;  %vm6371_vm9 = vcmp.eq.s32.totalorder %v6320_v54, %v4205_v19  ;;  %v6373_v40 = vld [vmem:[#allocation83_spill] sm:$0xff] }
 0x220   : > { %v4709_v41 = vsel %vm6370_vm4, %v3940_v45, 0.0  ;;  %v4715_v3 = vsel %vm6371_vm9, %v3940_v45, 0.0  ;;  %vm641_vm10 = vcmp.eq.s32.totalorder %v6373_v40, %v4196_v18  ;;  %vm642_vm13 = vcmp.eq.s32.totalorder %v6373_v40, %v4205_v19 }
 0x221   : > { %vm6374_vm14 = vcmp.eq.s32.totalorder %v6328_v23, %v4196_v18  ;;  %vm6375_vm15 = vcmp.eq.s32.totalorder %v6328_v23, %v4205_v19  ;;  %vm6377_vm6 = vcmp.eq.s32.totalorder %v6329_v7, %v4196_v18  ;;  %vm6378_vm7 = vcmp.eq.s32.totalorder %v6329_v7, %v4205_v19 }
 0x222   : > { %v4729_v59 = vsel %vm6374_vm14, %v3944_v44, 0.0  ;;  %v4735_v45 = vsel %vm6375_vm15, %v3944_v44, 0.0  ;;  %v4741_v22 = vsel %vm6377_vm6, %v3946_v49, 0.0  ;;  %v4747_v54 = vsel %vm6378_vm7, %v3946_v49, 0.0 }
 0x223   : > { %6376 = vst [vmem:[#allocation51_spill] sm:$0xff] %v4735_v45  ;;  %v4754_v44 = vsel %vm633_vm1, %v3950_v48, 0.0  ;;  %vm6381_vm0 = vcmp.eq.s32.totalorder %v6338_v63, %v4205_v19  ;;  %vm6383_vm3 = vcmp.eq.s32.totalorder %v6339_v8, %v4196_v18  ;;  %vm6385_vm8 = vcmp.eq.s32.totalorder %v6339_v8, %v4205_v19  ;;  %v1469_v63 = vpop.permute.xlu1 %1468 }
 0x224   : > { %6380 = vst [vmem:[#allocation52_spill] sm:$0xff] %v4754_v44  ;;  %v4760_v23 = vsel %vm6381_vm0, %v3950_v48, 0.0  ;;  %v4766_v49 = vsel %vm6383_vm3, %v3952_v53, 0.0  ;;  %v4772_v7 = vsel %vm6385_vm8, %v3952_v53, 0.0  ;;  %v4778_v43 = vsel %vm637_vm2, %v3956_v52, 0.0  ;;  %v6392_v44 = vld [vmem:[#allocation16_spill] sm:$0xff] }
 0x225   : > { %6382 = vst [vmem:[#allocation55_spill] sm:$0xff] %v4760_v23  ;;  %6384 = vst [vmem:[#allocation56_spill] sm:$0xff] %v4766_v49  ;;  %vm6388_vm1 = vcmp.eq.s32.totalorder %v6346_v13, %v4205_v19  ;;  %vm1339_vm5 = vcmp.eq.s32.totalorder %v4054_v11, %v4196_v18  ;;  %vm1340_vm4 = vcmp.eq.s32.totalorder %v4054_v11, %v4205_v19  ;;  %v1473_v13 = vpop.permute.xlu0 %1472  ;;  %v6393_v49 = vld [vmem:[#allocation15_spill] sm:$0xff] }
 0x226   : > { %6386 = vst [vmem:[#allocation126_spill] sm:$0xff] %v4772_v7  ;;  %6387 = vst [vmem:[#allocation59_spill] sm:$0xff] %v4778_v43  ;;  %v4784_v48 = vsel %vm6388_vm1, %v3956_v52, 0.0  ;;  %v1723_v53 = vsel %vm1339_vm5, %v1469_v63, 0.0  ;;  %v1724_v8 = vsel %vm1340_vm4, %v1469_v63, 0.0  ;;  %vm1341_vm2 = vcmp.eq.s32.totalorder %v4052_v51, %v4196_v18  ;;  %v6390_v52 = vld [vmem:[#allocation84_spill] sm:$0xff] }
 0x227   : > { %6389 = vst [vmem:[#allocation60_spill] sm:$0xff] %v4784_v48  ;;  %vm1342_vm9 = vcmp.eq.s32.totalorder %v4052_v51, %v4205_v19  ;;  %vm639_vm14 = vcmp.eq.s32.totalorder %v6390_v52, %v4196_v18  ;;  %vm640_vm15 = vcmp.eq.s32.totalorder %v6390_v52, %v4205_v19  ;;  %v1851_v48 = vadd.f32 %v1723_v53, %v4321_v56 }
 0x228   : > { %v1852_v43 = vadd.f32 %v1724_v8, %v4327_v14  ;;  %v1725_v11 = vsel %vm1341_vm2, %v1473_v13, 0.0  ;;  %v1726_v23 = vsel %vm1342_vm9, %v1473_v13, 0.0  ;;  %v4806_v63 = vsel %vm635_vm11, %v3958_v57, 0.0  ;;  %v6394_v14 = vld [vmem:[#allocation12_spill] sm:$0xff]  ;;  %v1477_v8 = vpop.permute.xlu1 %1476  ;;  %v6395_v13 = vld [vmem:[#allocation11_spill] sm:$0xff] }
 0x229   : > { %6391 = vst [vmem:[#allocation125_spill] sm:$0xff] %v4806_v63  ;;  %v4812_v51 = vsel %vm636_vm12, %v3958_v57, 0.0  ;;  %v1853_v7 = vadd.f32 %v1725_v11, %v6392_v44  ;;  %v1854_v56 = vadd.f32 %v1726_v23, %v6393_v49  ;;  %vm1343_vm6 = vcmp.eq.s32.totalorder %v6394_v14, %v4196_v18  ;;  %v1481_v57 = vpop.permute.xlu0 %1480  ;;  %v6396_v44 = vld [vmem:[#allocation87_spill] sm:$0xff] }
 0x22a   : > { %v2612_v53 = vpack.c.bf16 %v1852_v43, %v1851_v48  ;;  %vm1344_vm7 = vcmp.eq.s32.totalorder %v6394_v14, %v4205_v19  ;;  %vm1345_vm11 = vcmp.eq.s32.totalorder %v6395_v13, %v4196_v18  ;;  %v1727_v45 = vsel %vm1343_vm6, %v1477_v8, 0.0  ;;  %v6397_v48 = vld [vmem:[#allocation140_spill] sm:$0xff] }
 0x22b   : > { %v2613_v63 = vpack.c.bf16 %v1854_v56, %v1853_v7  ;;  %v1728_v39 = vsel %vm1344_vm7, %v1477_v8, 0.0  ;;  %vm1346_vm12 = vcmp.eq.s32.totalorder %v6395_v13, %v4205_v19  ;;  %vm645_vm0 = vcmp.eq.s32.totalorder %v6396_v44, %v4196_v18  ;;  %v6400_v8 = vld [vmem:[#allocation14_spill] sm:$0xff] }
 0x22c   : > { %vm646_vm3 = vcmp.eq.s32.totalorder %v6396_v44, %v4205_v19  ;;  %2363 = vst [vmem:[%s4828_s30] sm:$0xff] %v2612_v53  ;;  %v1855_v23 = vadd.f32 %v1727_v45, %v4355_v35  ;;  %v1856_v49 = vadd.f32 %v1728_v39, %v4361_v4  ;;  %v1729_v7 = vsel %vm1345_vm11, %v1481_v57, 0.0  ;;  %v6398_v53 = vld [vmem:[#allocation20_spill] sm:$0xff]  ;;  %v6399_v45 = vld [vmem:[#allocation23_spill] sm:$0xff]  ;;  %v1485_v13 = vpop.permute.xlu1 %1484  ;;  %v6401_v39 = vld [vmem:[#allocation13_spill] sm:$0xff] }
 0x22d   : > { %v1730_v43 = vsel %vm1346_vm12, %v1481_v57, 0.0  ;;  %v4837_v11 = vsel %vm641_vm10, %v6397_v48, 0.0  ;;  %v4843_v56 = vsel %vm642_vm13, %v6397_v48, 0.0  ;;  %2364 = vst [vmem:[%s4828_s30 + $0x8] sm:$0xff] %v2613_v63  ;;  %v1857_v35 = vadd.f32 %v1729_v7, %v6398_v53  ;;  %v1489_v63 = vpop.permute.xlu0 %1488 }
 0x22e   : > { %v1858_v4 = vadd.f32 %v1730_v43, %v6399_v45  ;;  %v2614_v14 = vpack.c.bf16 %v1856_v49, %v1855_v23  ;;  %vm1347_vm8 = vcmp.eq.s32.totalorder %v6400_v8, %v4196_v18  ;;  %vm1348_vm10 = vcmp.eq.s32.totalorder %v6400_v8, %v4205_v19  ;;  %v6402_v23 = vld [vmem:[#allocation88_spill] sm:$0xff] }
 0x22f   : > { %vm1349_vm1 = vcmp.eq.s32.totalorder %v6401_v39, %v4196_v18  ;;  %v1731_v57 = vsel %vm1347_vm8, %v1485_v13, 0.0  ;;  %v1732_v48 = vsel %vm1348_vm10, %v1485_v13, 0.0  ;;  %vm1350_vm13 = vcmp.eq.s32.totalorder %v6401_v39, %v4205_v19  ;;  %v6405_v13 = vld [vmem:[#allocation18_spill] sm:$0xff] }
 0x230   : > { %v2615_v40 = vpack.c.bf16 %v1858_v4, %v1857_v35  ;;  %vm643_vm5 = vcmp.eq.s32.totalorder %v6402_v23, %v4196_v18  ;;  %vm644_vm4 = vcmp.eq.s32.totalorder %v6402_v23, %v4205_v19  ;;  %2365 = vst [vmem:[%s4828_s30 + $0x10] sm:$0xff] %v2614_v14  ;;  %v1859_v49 = vadd.f32 %v1731_v57, %v4390_v27  ;;  %v6403_v35 = vld [vmem:[#allocation141_spill] sm:$0xff]  ;;  %v6404_v14 = vld [vmem:[#allocation118_spill] sm:$0xff]  ;;  %v1493_v39 = vpop.permute.xlu1 %1492 }
 0x231   : > { %v1860_v7 = vadd.f32 %v1732_v48, %v4396_v30  ;;  %v1733_v43 = vsel %vm1349_vm1, %v1489_v63, 0.0  ;;  %v1734_v53 = vsel %vm1350_vm13, %v1489_v63, 0.0  ;;  %v4867_v45 = vsel %vm639_vm14, %v6403_v35, 0.0  ;;  %v6406_v57 = vld [vmem:[#allocation17_spill] sm:$0xff] }
 0x232   : > { %v4873_v4 = vsel %vm640_vm15, %v6403_v35, 0.0  ;;  %2366 = vst [vmem:[%s4828_s30 + $0x18] sm:$0xff] %v2615_v40  ;;  %v1861_v27 = vadd.f32 %v1733_v43, %v6404_v14  ;;  %v1862_v30 = vadd.f32 %v1734_v53, %v4384_v34  ;;  %vm1351_vm2 = vcmp.eq.s32.totalorder %v6405_v13, %v4196_v18  ;;  %v1497_v40 = vpop.permute.xlu0 %1496  ;;  %v6407_v34 = vld [vmem:[#allocation91_spill] sm:$0xff]  ;;  %v6409_v14 = vld [vmem:[#allocation142_spill] sm:$0xff] }
 0x233   : > { %v2616_v8 = vpack.c.bf16 %v1860_v7, %v1859_v49  ;;  %vm1352_vm9 = vcmp.eq.s32.totalorder %v6405_v13, %v4205_v19  ;;  %vm1353_vm14 = vcmp.eq.s32.totalorder %v6406_v57, %v4196_v18  ;;  %v1735_v48 = vsel %vm1351_vm2, %v1493_v39, 0.0  ;;  %v6408_v7 = vld [vmem:[#allocation117_spill] sm:$0xff]  ;;  %v6411_v13 = vld [vmem:[#allocation28_spill] sm:$0xff] }
 0x234   : > { %v2617_v52 = vpack.c.bf16 %v1862_v30, %v1861_v27  ;;  %v1736_v63 = vsel %vm1352_vm9, %v1493_v39, 0.0  ;;  %vm1354_vm15 = vcmp.eq.s32.totalorder %v6406_v57, %v4205_v19  ;;  %vm649_vm6 = vcmp.eq.s32.totalorder %v6407_v34, %v4196_v18 }
 0x235   : > { %vm650_vm7 = vcmp.eq.s32.totalorder %v6407_v34, %v4205_v19  ;;  %2367 = vst [vmem:[%s4828_s30 + $0x20] sm:$0xff] %v2616_v8  ;;  %v1863_v49 = vadd.f32 %v1735_v48, %v4423_v15  ;;  %v1864_v43 = vadd.f32 %v1736_v63, %v6408_v7  ;;  %v1737_v53 = vsel %vm1353_vm14, %v1497_v40, 0.0  ;;  %v6410_v8 = vld [vmem:[#allocation27_spill] sm:$0xff]  ;;  %v6412_v48 = vld [vmem:[#allocation22_spill] sm:$0xff]  ;;  %v1501_v63 = vpop.permute.xlu1 %1500 }
 0x236   : > { %v1738_v35 = vsel %vm1354_vm15, %v1497_v40, 0.0  ;;  %v4897_v27 = vsel %vm645_vm0, %v6409_v14, 0.0  ;;  %v4903_v30 = vsel %vm646_vm3, %v6409_v14, 0.0  ;;  %2368 = vst [vmem:[%s4828_s30 + $0x28] sm:$0xff] %v2617_v52  ;;  %v1865_v15 = vadd.f32 %v1737_v53, %v6410_v8  ;;  %v6413_v40 = vld [vmem:[#allocation21_spill] sm:$0xff]  ;;  %v1505_v52 = vpop.permute.xlu0 %1504 }
 0x237   : > { %v1866_v39 = vadd.f32 %v1738_v35, %v6411_v13  ;;  %v2618_v57 = vpack.c.bf16 %v1864_v43, %v1863_v49  ;;  %vm1355_vm11 = vcmp.eq.s32.totalorder %v6412_v48, %v4196_v18  ;;  %vm1356_vm12 = vcmp.eq.s32.totalorder %v6412_v48, %v4205_v19  ;;  %v6414_v49 = vld [vmem:[#allocation92_spill] sm:$0xff] }
 0x238   : > { %vm1357_vm0 = vcmp.eq.s32.totalorder %v6413_v40, %v4196_v18  ;;  %v1739_v7 = vsel %vm1355_vm11, %v1501_v63, 0.0  ;;  %v1740_v14 = vsel %vm1356_vm12, %v1501_v63, 0.0  ;;  %vm1358_vm3 = vcmp.eq.s32.totalorder %v6413_v40, %v4205_v19  ;;  %v6417_v48 = vld [vmem:[#allocation32_spill] sm:$0xff]  ;;  %v6418_v40 = vld [vmem:[#allocation26_spill] sm:$0xff] }
 0x239   : > { %v2619_v44 = vpack.c.bf16 %v1866_v39, %v1865_v15  ;;  %vm647_vm8 = vcmp.eq.s32.totalorder %v6414_v49, %v4196_v18  ;;  %vm648_vm10 = vcmp.eq.s32.totalorder %v6414_v49, %v4205_v19  ;;  %2369 = vst [vmem:[%s4828_s30 + $0x30] sm:$0xff] %v2618_v57  ;;  %v1867_v43 = vadd.f32 %v1739_v7, %v4455_v42  ;;  %v6415_v15 = vld [vmem:[#allocation143_spill] sm:$0xff]  ;;  %v1509_v7 = vpop.permute.xlu1 %1508 }
 0x23a   : > { %v1868_v53 = vadd.f32 %v1740_v14, %v4461_v26  ;;  %v1741_v35 = vsel %vm1357_vm0, %v1505_v52, 0.0  ;;  %v1742_v8 = vsel %vm1358_vm3, %v1505_v52, 0.0  ;;  %v4927_v13 = vsel %vm643_vm5, %v6415_v15, 0.0  ;;  %v6416_v57 = vld [vmem:[#allocation31_spill] sm:$0xff]  ;;  %v6419_v14 = vld [vmem:[#allocation25_spill] sm:$0xff] }
 0x23b   : > { %v4933_v39 = vsel %vm644_vm4, %v6415_v15, 0.0  ;;  %2370 = vst [vmem:[%s4828_s30 + $0x38] sm:$0xff] %v2619_v44  ;;  %v1869_v42 = vadd.f32 %v1741_v35, %v6416_v57  ;;  %v1870_v26 = vadd.f32 %v1742_v8, %v6417_v48  ;;  %vm1359_vm1 = vcmp.eq.s32.totalorder %v6418_v40, %v4196_v18  ;;  %v1513_v44 = vpop.permute.xlu0 %1512 }
 0x23c   : > { %v2620_v63 = vpack.c.bf16 %v1868_v53, %v1867_v43  ;;  %vm1360_vm13 = vcmp.eq.s32.totalorder %v6418_v40, %v4205_v19  ;;  %vm1361_vm5 = vcmp.eq.s32.totalorder %v6419_v14, %v4196_v18  ;;  %v1743_v52 = vsel %vm1359_vm1, %v1509_v7, 0.0  ;;  %v6420_v43 = vld [vmem:[#allocation95_spill] sm:$0xff] }
 0x23d   : > { %v2621_v23 = vpack.c.bf16 %v1870_v26, %v1869_v42  ;;  %v1744_v15 = vsel %vm1360_vm13, %v1509_v7, 0.0  ;;  %vm1362_vm4 = vcmp.eq.s32.totalorder %v6419_v14, %v4205_v19  ;;  %vm653_vm2 = vcmp.eq.s32.totalorder %v6420_v43, %v4196_v18  ;;  %v6421_v42 = vld [vmem:[#allocation144_spill] sm:$0xff]  ;;  %v6423_v40 = vld [vmem:[#allocation39_spill] sm:$0xff]  ;;  %v6424_v14 = vld [vmem:[#allocation30_spill] sm:$0xff] }
 0x23e   : > { %vm654_vm9 = vcmp.eq.s32.totalorder %v6420_v43, %v4205_v19  ;;  %2371 = vst [vmem:[%s4828_s30 + $0x40] sm:$0xff] %v2620_v63  ;;  %v1871_v53 = vadd.f32 %v1743_v52, %v4489_v5  ;;  %v1872_v35 = vadd.f32 %v1744_v15, %v4495_v50  ;;  %v1745_v8 = vsel %vm1361_vm5, %v1513_v44, 0.0  ;;  %v6422_v63 = vld [vmem:[#allocation36_spill] sm:$0xff]  ;;  %v1517_v52 = vpop.permute.xlu1 %1516  ;;  %v6425_v15 = vld [vmem:[#allocation29_spill] sm:$0xff] }
 0x23f   : > { %v1746_v57 = vsel %vm1362_vm4, %v1513_v44, 0.0  ;;  %v4957_v48 = vsel %vm649_vm6, %v6421_v42, 0.0  ;;  %v4963_v26 = vsel %vm650_vm7, %v6421_v42, 0.0  ;;  %2372 = vst [vmem:[%s4828_s30 + $0x48] sm:$0xff] %v2621_v23  ;;  %v1873_v5 = vadd.f32 %v1745_v8, %v6422_v63  ;;  %v1521_v23 = vpop.permute.xlu0 %1520 }
 0x240   : > { %v1874_v50 = vadd.f32 %v1746_v57, %v6423_v40  ;;  %v2622_v7 = vpack.c.bf16 %v1872_v35, %v1871_v53  ;;  %vm1363_vm14 = vcmp.eq.s32.totalorder %v6424_v14, %v4196_v18  ;;  %vm1364_vm15 = vcmp.eq.s32.totalorder %v6424_v14, %v4205_v19  ;;  %v6426_v53 = vld [vmem:[#allocation96_spill] sm:$0xff] }
 0x241   : > { %vm1365_vm6 = vcmp.eq.s32.totalorder %v6425_v15, %v4196_v18  ;;  %v1747_v44 = vsel %vm1363_vm14, %v1517_v52, 0.0  ;;  %v1748_v42 = vsel %vm1364_vm15, %v1517_v52, 0.0  ;;  %vm1366_vm7 = vcmp.eq.s32.totalorder %v6425_v15, %v4205_v19  ;;  %v6429_v52 = vld [vmem:[#allocation34_spill] sm:$0xff] }
 0x242   : > { %v2623_v34 = vpack.c.bf16 %v1874_v50, %v1873_v5  ;;  %vm651_vm11 = vcmp.eq.s32.totalorder %v6426_v53, %v4196_v18  ;;  %vm652_vm12 = vcmp.eq.s32.totalorder %v6426_v53, %v4205_v19  ;;  %2373 = vst [vmem:[%s4828_s30 + $0x50] sm:$0xff] %v2622_v7  ;;  %v1875_v35 = vadd.f32 %v1747_v44, %v4524_v6  ;;  %v6427_v5 = vld [vmem:[#allocation145_spill] sm:$0xff]  ;;  %v6428_v7 = vld [vmem:[#allocation122_spill] sm:$0xff]  ;;  %v1525_v15 = vpop.permute.xlu1 %1524 }
 0x243   : > { %v1876_v8 = vadd.f32 %v1748_v42, %v4530_v9  ;;  %v1749_v57 = vsel %vm1365_vm6, %v1521_v23, 0.0  ;;  %v1750_v63 = vsel %vm1366_vm7, %v1521_v23, 0.0  ;;  %v4987_v40 = vsel %vm647_vm8, %v6427_v5, 0.0  ;;  %v6430_v44 = vld [vmem:[#allocation33_spill] sm:$0xff] }
 0x244   : > { %v4993_v50 = vsel %vm648_vm10, %v6427_v5, 0.0  ;;  %2374 = vst [vmem:[%s4828_s30 + $0x58] sm:$0xff] %v2623_v34  ;;  %v1877_v6 = vadd.f32 %v1749_v57, %v6428_v7  ;;  %v1878_v9 = vadd.f32 %v1750_v63, %v4518_v0  ;;  %vm1367_vm0 = vcmp.eq.s32.totalorder %v6429_v52, %v4196_v18  ;;  %v1529_v34 = vpop.permute.xlu0 %1528  ;;  %v6431_v0 = vld [vmem:[#allocation99_spill] sm:$0xff]  ;;  %v6432_v5 = vld [vmem:[#allocation146_spill] sm:$0xff] }
 0x245   : > { %v2624_v14 = vpack.c.bf16 %v1876_v8, %v1875_v35  ;;  %vm1368_vm3 = vcmp.eq.s32.totalorder %v6429_v52, %v4205_v19  ;;  %vm1369_vm8 = vcmp.eq.s32.totalorder %v6430_v44, %v4196_v18  ;;  %v1751_v42 = vsel %vm1367_vm0, %v1525_v15, 0.0 }
 0x246   : > { %v2625_v49 = vpack.c.bf16 %v1878_v9, %v1877_v6  ;;  %v1752_v23 = vsel %vm1368_vm3, %v1525_v15, 0.0  ;;  %vm1370_vm10 = vcmp.eq.s32.totalorder %v6430_v44, %v4205_v19  ;;  %vm657_vm1 = vcmp.eq.s32.totalorder %v6431_v0, %v4196_v18  ;;  %v1533_v52 = vpop.permute.xlu1 %1532  ;;  %v6434_v15 = vld [vmem:[#allocation37_spill] sm:$0xff] }
 0x247   : > { %vm658_vm13 = vcmp.eq.s32.totalorder %v6431_v0, %v4205_v19  ;;  %2375 = vst [vmem:[%s4828_s30 + $0x60] sm:$0xff] %v2624_v14  ;;  %v1879_v35 = vadd.f32 %v1751_v42, %v4553_v1  ;;  %v1880_v8 = vadd.f32 %v1752_v23, %v4559_v58  ;;  %v1753_v57 = vsel %vm1369_vm8, %v1529_v34, 0.0  ;;  %v6433_v14 = vld [vmem:[#allocation38_spill] sm:$0xff] }
 0x248   : > { %v1754_v63 = vsel %vm1370_vm10, %v1529_v34, 0.0  ;;  %v5017_v7 = vsel %vm653_vm2, %v6432_v5, 0.0  ;;  %v5023_v6 = vsel %vm654_vm9, %v6432_v5, 0.0  ;;  %2376 = vst [vmem:[%s4828_s30 + $0x68] sm:$0xff] %v2625_v49  ;;  %v1881_v1 = vadd.f32 %v1753_v57, %v4541_v12  ;;  %v1537_v12 = vpop.permute.xlu0 %1536 }
 0x249   : > { %v1882_v58 = vadd.f32 %v1754_v63, %v4547_v17  ;;  %v2626_v9 = vpack.c.bf16 %v1880_v8, %v1879_v35  ;;  %vm1371_vm5 = vcmp.eq.s32.totalorder %v6433_v14, %v4196_v18  ;;  %vm1372_vm4 = vcmp.eq.s32.totalorder %v6433_v14, %v4205_v19  ;;  %v6435_v17 = vld [vmem:[#allocation100_spill] sm:$0xff]  ;;  %v6436_v8 = vld [vmem:[#allocation147_spill] sm:$0xff] }
 0x24a   : > { %vm1373_vm2 = vcmp.eq.s32.totalorder %v6434_v15, %v4196_v18  ;;  %v1755_v44 = vsel %vm1371_vm5, %v1533_v52, 0.0  ;;  %v1756_v42 = vsel %vm1372_vm4, %v1533_v52, 0.0  ;;  %vm1374_vm9 = vcmp.eq.s32.totalorder %v6434_v15, %v4205_v19 }
 0x24b   : > { %v2627_v43 = vpack.c.bf16 %v1882_v58, %v1881_v1  ;;  %vm655_vm14 = vcmp.eq.s32.totalorder %v6435_v17, %v4196_v18  ;;  %vm656_vm15 = vcmp.eq.s32.totalorder %v6435_v17, %v4205_v19  ;;  %2377 = vst [vmem:[%s4828_s30 + $0x70] sm:$0xff] %v2626_v9  ;;  %v1883_v49 = vadd.f32 %v1755_v44, %v4577_v46  ;;  %v6437_v1 = vld [vmem:[#allocation42_spill] sm:$0xff]  ;;  %v1541_v58 = vpop.permute.xlu1 %1540  ;;  %v6438_v9 = vld [vmem:[#allocation41_spill] sm:$0xff] }
 0x24c   : > { %v1884_v23 = vadd.f32 %v1756_v42, %v4583_v21  ;;  %v1757_v34 = vsel %vm1373_vm2, %v1537_v12, 0.0  ;;  %v1758_v35 = vsel %vm1374_vm9, %v1537_v12, 0.0  ;;  %v5047_v57 = vsel %vm651_vm11, %v6436_v8, 0.0  ;;  %v6440_v12 = vld [vmem:[#allocation148_spill] sm:$0xff] }
 0x24d   : > { %v5053_v63 = vsel %vm652_vm12, %v6436_v8, 0.0  ;;  %2378 = vst [vmem:[%s4828_s30 + $0x78] sm:$0xff] %v2627_v43  ;;  %v1885_v46 = vadd.f32 %v1757_v34, %v4565_v2  ;;  %v1886_v21 = vadd.f32 %v1758_v35, %v4571_v16  ;;  %vm1375_vm6 = vcmp.eq.s32.totalorder %v6437_v1, %v4196_v18  ;;  %v1545_v2 = vpop.permute.xlu0 %1544  ;;  %v6439_v16 = vld [vmem:[#allocation103_spill] sm:$0xff]  ;;  %v6441_v34 = vld [vmem:[#allocation44_spill] sm:$0xff]  ;;  %v6442_v8 = vld [vmem:[#allocation46_spill] sm:$0xff] }
 0x24e   : > { %v2628_v5 = vpack.c.bf16 %v1884_v23, %v1883_v49  ;;  %vm1376_vm7 = vcmp.eq.s32.totalorder %v6437_v1, %v4205_v19  ;;  %vm1377_vm11 = vcmp.eq.s32.totalorder %v6438_v9, %v4196_v18  ;;  %v1759_v14 = vsel %vm1375_vm6, %v1541_v58, 0.0 }
 0x24f   : > { %v2629_v53 = vpack.c.bf16 %v1886_v21, %v1885_v46  ;;  %v1760_v52 = vsel %vm1376_vm7, %v1541_v58, 0.0  ;;  %vm1378_vm12 = vcmp.eq.s32.totalorder %v6438_v9, %v4205_v19  ;;  %vm661_vm0 = vcmp.eq.s32.totalorder %v6439_v16, %v4196_v18  ;;  %v1549_v46 = vpop.permute.xlu1 %1548  ;;  %v6443_v21 = vld [vmem:[#allocation45_spill] sm:$0xff] }
 0x250   : > { %vm662_vm3 = vcmp.eq.s32.totalorder %v6439_v16, %v4205_v19  ;;  %2379 = vst [vmem:[%s4828_s30 + $0x80] sm:$0xff] %v2628_v5  ;;  %v1887_v15 = vadd.f32 %v1759_v14, %v4603_v25  ;;  %v1888_v43 = vadd.f32 %v1760_v52, %v4609_v60  ;;  %v1761_v44 = vsel %vm1377_vm11, %v1545_v2, 0.0 }
 0x251   : > { %v1762_v42 = vsel %vm1378_vm12, %v1545_v2, 0.0  ;;  %v5077_v49 = vsel %vm657_vm1, %v6440_v12, 0.0  ;;  %v5083_v23 = vsel %vm658_vm13, %v6440_v12, 0.0  ;;  %2380 = vst [vmem:[%s4828_s30 + $0x88] sm:$0xff] %v2629_v53  ;;  %v1889_v25 = vadd.f32 %v1761_v44, %v6441_v34  ;;  %v1553_v58 = vpop.permute.xlu0 %1552  ;;  %v6445_v2 = vld [vmem:[#allocation149_spill] sm:$0xff] }
 0x252   : > { %v1890_v60 = vadd.f32 %v1762_v42, %v4597_v61  ;;  %v2630_v35 = vpack.c.bf16 %v1888_v43, %v1887_v15  ;;  %vm1379_vm8 = vcmp.eq.s32.totalorder %v6442_v8, %v4196_v18  ;;  %vm1380_vm10 = vcmp.eq.s32.totalorder %v6442_v8, %v4205_v19  ;;  %v6444_v61 = vld [vmem:[#allocation104_spill] sm:$0xff]  ;;  %v6446_v42 = vld [vmem:[#allocation50_spill] sm:$0xff]  ;;  %v6447_v34 = vld [vmem:[#allocation49_spill] sm:$0xff] }
 0x253   : > { %vm1381_vm1 = vcmp.eq.s32.totalorder %v6443_v21, %v4196_v18  ;;  %v1763_v5 = vsel %vm1379_vm8, %v1549_v46, 0.0  ;;  %v1764_v1 = vsel %vm1380_vm10, %v1549_v46, 0.0  ;;  %vm1382_vm13 = vcmp.eq.s32.totalorder %v6443_v21, %v4205_v19  ;;  %v1557_v12 = vpop.permute.xlu1 %1556 }
 0x254   : > { %v2631_v0 = vpack.c.bf16 %v1890_v60, %v1889_v25  ;;  %vm659_vm5 = vcmp.eq.s32.totalorder %v6444_v61, %v4196_v18  ;;  %vm660_vm4 = vcmp.eq.s32.totalorder %v6444_v61, %v4205_v19  ;;  %2381 = vst [vmem:[%s4828_s30 + $0x90] sm:$0xff] %v2630_v35  ;;  %v1891_v9 = vadd.f32 %v1763_v5, %v4634_v47 }
 0x255   : > { %v1892_v53 = vadd.f32 %v1764_v1, %v4640_v20  ;;  %v1765_v14 = vsel %vm1381_vm1, %v1553_v58, 0.0  ;;  %v1766_v52 = vsel %vm1382_vm13, %v1553_v58, 0.0  ;;  %v5107_v15 = vsel %vm655_vm14, %v6445_v2, 0.0 }
 0x256   : > { %v5113_v43 = vsel %vm656_vm15, %v6445_v2, 0.0  ;;  %2382 = vst [vmem:[%s4828_s30 + $0x98] sm:$0xff] %v2631_v0  ;;  %v1893_v47 = vadd.f32 %v1765_v14, %v4622_v24  ;;  %v1894_v20 = vadd.f32 %v1766_v52, %v4628_v29  ;;  %vm1383_vm2 = vcmp.eq.s32.totalorder %v6446_v42, %v4196_v18  ;;  %v1561_v24 = vpop.permute.xlu0 %1560  ;;  %v6448_v29 = vld [vmem:[#allocation107_spill] sm:$0xff]  ;;  %v6449_v0 = vld [vmem:[#allocation150_spill] sm:$0xff]  ;;  %v6451_v14 = vld [vmem:[#allocation53_spill] sm:$0xff] }
 0x257   : > { %v2632_v44 = vpack.c.bf16 %v1892_v53, %v1891_v9  ;;  %vm1384_vm9 = vcmp.eq.s32.totalorder %v6446_v42, %v4205_v19  ;;  %vm1385_vm14 = vcmp.eq.s32.totalorder %v6447_v34, %v4196_v18  ;;  %v1767_v25 = vsel %vm1383_vm2, %v1557_v12, 0.0  ;;  %v6450_v9 = vld [vmem:[#allocation54_spill] sm:$0xff]  ;;  %v1565_v53 = vpop.permute.xlu1 %1564 }
 0x258   : > { %v2633_v17 = vpack.c.bf16 %v1894_v20, %v1893_v47  ;;  %v1768_v60 = vsel %vm1384_vm9, %v1557_v12, 0.0  ;;  %vm1386_vm15 = vcmp.eq.s32.totalorder %v6447_v34, %v4205_v19  ;;  %vm665_vm6 = vcmp.eq.s32.totalorder %v6448_v29, %v4196_v18  ;;  %v6453_v12 = vld [vmem:[#allocation151_spill] sm:$0xff] }
 0x259   : > { %vm666_vm7 = vcmp.eq.s32.totalorder %v6448_v29, %v4205_v19  ;;  %2383 = vst [vmem:[%s4828_s30 + $0xa0] sm:$0xff] %v2632_v44  ;;  %v1895_v35 = vadd.f32 %v1767_v25, %v4659_v33  ;;  %v1896_v8 = vadd.f32 %v1768_v60, %v4665_v62  ;;  %v1769_v46 = vsel %vm1385_vm14, %v1561_v24, 0.0  ;;  %v6454_v60 = vld [vmem:[#allocation58_spill] sm:$0xff] }
 0x25a   : > { %v1770_v21 = vsel %vm1386_vm15, %v1561_v24, 0.0  ;;  %v5137_v5 = vsel %vm661_vm0, %v6449_v0, 0.0  ;;  %v5143_v1 = vsel %vm662_vm3, %v6449_v0, 0.0  ;;  %2384 = vst [vmem:[%s4828_s30 + $0xa8] sm:$0xff] %v2633_v17  ;;  %v1897_v33 = vadd.f32 %v1769_v46, %v4647_v28  ;;  %v1569_v28 = vpop.permute.xlu0 %1568 }
 0x25b   : > { %v1898_v62 = vadd.f32 %v1770_v21, %v4653_v55  ;;  %v2634_v58 = vpack.c.bf16 %v1896_v8, %v1895_v35  ;;  %vm1387_vm11 = vcmp.eq.s32.totalorder %v6450_v9, %v4196_v18  ;;  %vm1388_vm12 = vcmp.eq.s32.totalorder %v6450_v9, %v4205_v19  ;;  %v6452_v55 = vld [vmem:[#allocation108_spill] sm:$0xff]  ;;  %v1573_v24 = vpop.permute.xlu1 %1572  ;;  %v6455_v35 = vld [vmem:[#allocation57_spill] sm:$0xff] }
 0x25c   : > { %vm1389_vm0 = vcmp.eq.s32.totalorder %v6451_v14, %v4196_v18  ;;  %v1771_v52 = vsel %vm1387_vm11, %v1565_v53, 0.0  ;;  %v1772_v2 = vsel %vm1388_vm12, %v1565_v53, 0.0  ;;  %vm1390_vm3 = vcmp.eq.s32.totalorder %v6451_v14, %v4205_v19 }
 0x25d   : > { %v2635_v16 = vpack.c.bf16 %v1898_v62, %v1897_v33  ;;  %vm663_vm8 = vcmp.eq.s32.totalorder %v6452_v55, %v4196_v18  ;;  %vm664_vm10 = vcmp.eq.s32.totalorder %v6452_v55, %v4205_v19  ;;  %2385 = vst [vmem:[%s4828_s30 + $0xb0] sm:$0xff] %v2634_v58  ;;  %v1899_v47 = vadd.f32 %v1771_v52, %v4683_v10  ;;  %v6457_v58 = vld [vmem:[#allocation152_spill] sm:$0xff] }
 0x25e   : > { %v1900_v20 = vadd.f32 %v1772_v2, %v4689_v37  ;;  %v1773_v44 = vsel %vm1389_vm0, %v1569_v28, 0.0  ;;  %v1774_v42 = vsel %vm1390_vm3, %v1569_v28, 0.0  ;;  %v5167_v34 = vsel %vm659_vm5, %v6453_v12, 0.0  ;;  %v6459_v2 = vld [vmem:[#allocation61_spill] sm:$0xff] }
 0x25f   : > { %v5173_v17 = vsel %vm660_vm4, %v6453_v12, 0.0  ;;  %2386 = vst [vmem:[%s4828_s30 + $0xb8] sm:$0xff] %v2635_v16  ;;  %v1901_v10 = vadd.f32 %v1773_v44, %v4671_v31  ;;  %v1902_v37 = vadd.f32 %v1774_v42, %v4677_v32  ;;  %vm1391_vm1 = vcmp.eq.s32.totalorder %v6454_v60, %v4196_v18  ;;  %v1577_v31 = vpop.permute.xlu0 %1576  ;;  %v6456_v32 = vld [vmem:[#allocation111_spill] sm:$0xff]  ;;  %v6458_v16 = vld [vmem:[#allocation62_spill] sm:$0xff]  ;;  %v1581_v52 = vpop.permute.xlu1 %1580 }
 0x260   : > { %v2636_v25 = vpack.c.bf16 %v1900_v20, %v1899_v47  ;;  %vm1392_vm13 = vcmp.eq.s32.totalorder %v6454_v60, %v4205_v19  ;;  %vm1393_vm5 = vcmp.eq.s32.totalorder %v6455_v35, %v4196_v18  ;;  %v1775_v8 = vsel %vm1391_vm1, %v1573_v24, 0.0  ;;  %v6462_v60 = vld [vmem:[#allocation51_spill] sm:$0xff] }
 0x261   : > { %v2637_v61 = vpack.c.bf16 %v1902_v37, %v1901_v10  ;;  %v1776_v46 = vsel %vm1392_vm13, %v1573_v24, 0.0  ;;  %vm1394_vm4 = vcmp.eq.s32.totalorder %v6455_v35, %v4205_v19  ;;  %vm669_vm2 = vcmp.eq.s32.totalorder %v6456_v32, %v4196_v18  ;;  %v6461_v10 = vld [vmem:[#allocation153_spill] sm:$0xff]  ;;  %v6463_v24 = vld [vmem:[#allocation66_spill] sm:$0xff] }
 0x262   : > { %vm670_vm9 = vcmp.eq.s32.totalorder %v6456_v32, %v4205_v19  ;;  %2387 = vst [vmem:[%s4828_s30 + $0xc0] sm:$0xff] %v2636_v25  ;;  %v1903_v21 = vadd.f32 %v1775_v8, %v4709_v41  ;;  %v1904_v0 = vadd.f32 %v1776_v46, %v4715_v3  ;;  %v1777_v33 = vsel %vm1393_vm5, %v1577_v31, 0.0  ;;  %v6464_v35 = vld [vmem:[#allocation65_spill] sm:$0xff] }
 0x263   : > { %v1778_v62 = vsel %vm1394_vm4, %v1577_v31, 0.0  ;;  %v5197_v9 = vsel %vm665_vm6, %v6457_v58, 0.0  ;;  %v5203_v53 = vsel %vm666_vm7, %v6457_v58, 0.0  ;;  %2388 = vst [vmem:[%s4828_s30 + $0xc8] sm:$0xff] %v2637_v61  ;;  %v1905_v41 = vadd.f32 %v1777_v33, %v4697_v36  ;;  %v1585_v36 = vpop.permute.xlu0 %1584  ;;  %v1589_v55 = vpop.permute.xlu1 %1588 }
 0x264   : > { %v1906_v3 = vadd.f32 %v1778_v62, %v4703_v38  ;;  %v2638_v14 = vpack.c.bf16 %v1904_v0, %v1903_v21  ;;  %vm1395_vm14 = vcmp.eq.s32.totalorder %v6458_v16, %v4196_v18  ;;  %vm1396_vm15 = vcmp.eq.s32.totalorder %v6458_v16, %v4205_v19  ;;  %v6460_v38 = vld [vmem:[#allocation112_spill] sm:$0xff]  ;;  %v6465_v21 = vld [vmem:[#allocation115_spill] sm:$0xff]  ;;  %v6467_v62 = vld [vmem:[#allocation126_spill] sm:$0xff] }
 0x265   : > { %vm1397_vm6 = vcmp.eq.s32.totalorder %v6459_v2, %v4196_v18  ;;  %v1779_v28 = vsel %vm1395_vm14, %v1581_v52, 0.0  ;;  %v1780_v47 = vsel %vm1396_vm15, %v1581_v52, 0.0  ;;  %vm1398_vm7 = vcmp.eq.s32.totalorder %v6459_v2, %v4205_v19  ;;  %v6466_v0 = vld [vmem:[#allocation56_spill] sm:$0xff] }
 0x266   : > { %v2639_v29 = vpack.c.bf16 %v1906_v3, %v1905_v41  ;;  %vm667_vm11 = vcmp.eq.s32.totalorder %v6460_v38, %v4196_v18  ;;  %vm668_vm12 = vcmp.eq.s32.totalorder %v6460_v38, %v4205_v19  ;;  %2389 = vst [vmem:[%s4828_s30 + $0xd0] sm:$0xff] %v2638_v14  ;;  %v1907_v20 = vadd.f32 %v1779_v28, %v4741_v22  ;;  %v6468_v14 = vld [vmem:[#allocation154_spill] sm:$0xff]  ;;  %v6469_v2 = vld [vmem:[#allocation52_spill] sm:$0xff]  ;;  %v6470_v28 = vld [vmem:[#allocation55_spill] sm:$0xff] }
 0x267   : > { %v1908_v44 = vadd.f32 %v1780_v47, %v4747_v54  ;;  %v1781_v42 = vsel %vm1397_vm6, %v1585_v36, 0.0  ;;  %v1782_v12 = vsel %vm1398_vm7, %v1585_v36, 0.0  ;;  %v5227_v37 = vsel %vm663_vm8, %v6461_v10, 0.0  ;;  %v1593_v31 = vpop.permute.xlu0 %1592  ;;  %v6471_v36 = vld [vmem:[#allocation70_spill] sm:$0xff]  ;;  %v1597_v32 = vpop.permute.xlu1 %1596 }
 0x268   : > { %v5233_v25 = vsel %vm664_vm10, %v6461_v10, 0.0  ;;  %2390 = vst [vmem:[%s4828_s30 + $0xd8] sm:$0xff] %v2639_v29  ;;  %v1909_v22 = vadd.f32 %v1781_v42, %v4729_v59  ;;  %v1910_v54 = vadd.f32 %v1782_v12, %v6462_v60  ;;  %vm1399_vm0 = vcmp.eq.s32.totalorder %v6463_v24, %v4196_v18  ;;  %v6473_v60 = vld [vmem:[#allocation116_spill] sm:$0xff] }
 0x269   : > { %vm1400_vm3 = vcmp.eq.s32.totalorder %v6463_v24, %v4205_v19  ;;  %vm1401_vm8 = vcmp.eq.s32.totalorder %v6464_v35, %v4196_v18  ;;  %v2640_v61 = vpack.c.bf16 %v1908_v44, %v1907_v20  ;;  %vm1402_vm10 = vcmp.eq.s32.totalorder %v6464_v35, %v4205_v19  ;;  %v6472_v20 = vld [vmem:[#allocation69_spill] sm:$0xff] }
 0x26a   : > { %v2641_v8 = vpack.c.bf16 %v1910_v54, %v1909_v22  ;;  %v1783_v46 = vsel %vm1399_vm0, %v1589_v55, 0.0  ;;  %v1784_v59 = vsel %vm1400_vm3, %v1589_v55, 0.0  ;;  %vm673_vm1 = vcmp.eq.s32.totalorder %v6465_v21, %v4196_v18  ;;  %v6474_v54 = vld [vmem:[#allocation125_spill] sm:$0xff] }
 0x26b   : > { %vm674_vm13 = vcmp.eq.s32.totalorder %v6465_v21, %v4205_v19  ;;  %2391 = vst [vmem:[%s4828_s30 + $0xe0] sm:$0xff] %v2640_v61  ;;  %v1911_v33 = vadd.f32 %v1783_v46, %v6466_v0  ;;  %v1912_v58 = vadd.f32 %v1784_v59, %v6467_v62  ;;  %v1785_v41 = vsel %vm1401_vm8, %v1593_v31, 0.0  ;;  %v1601_v22 = vpop.permute.xlu0 %1600  ;;  %v6478_v62 = vld [vmem:[#allocation74_spill] sm:$0xff]  ;;  %v1605_v38 = vpop.permute.xlu1 %1604 }
 0x26c   : > { %v1786_v3 = vsel %vm1402_vm10, %v1593_v31, 0.0  ;;  %v5257_v16 = vsel %vm669_vm2, %v6468_v14, 0.0  ;;  %v5263_v52 = vsel %vm670_vm9, %v6468_v14, 0.0  ;;  %2392 = vst [vmem:[%s4828_s30 + $0xe8] sm:$0xff] %v2641_v8  ;;  %v1913_v29 = vadd.f32 %v1785_v41, %v6469_v2  ;;  %v6475_v8 = vld [vmem:[#allocation155_spill] sm:$0xff] }
 0x26d   : > { %v1914_v47 = vadd.f32 %v1786_v3, %v6470_v28  ;;  %vm1403_vm5 = vcmp.eq.s32.totalorder %v6471_v36, %v4196_v18  ;;  %vm1404_vm4 = vcmp.eq.s32.totalorder %v6471_v36, %v4205_v19  ;;  %vm1405_vm2 = vcmp.eq.s32.totalorder %v6472_v20, %v4196_v18  ;;  %v6476_v31 = vld [vmem:[#allocation59_spill] sm:$0xff] }
 0x26e   : > { %v2642_v44 = vpack.c.bf16 %v1912_v58, %v1911_v33  ;;  %vm1406_vm9 = vcmp.eq.s32.totalorder %v6472_v20, %v4205_v19  ;;  %v1787_v12 = vsel %vm1403_vm5, %v1597_v32, 0.0  ;;  %v1788_v10 = vsel %vm1404_vm4, %v1597_v32, 0.0  ;;  %v6477_v33 = vld [vmem:[#allocation60_spill] sm:$0xff]  ;;  %v6479_v58 = vld [vmem:[#allocation73_spill] sm:$0xff]  ;;  %v6480_v28 = vld [vmem:[#allocation119_spill] sm:$0xff] }
 0x26f   : > { %v2643_v42 = vpack.c.bf16 %v1914_v47, %v1913_v29  ;;  %vm671_vm14 = vcmp.eq.s32.totalorder %v6473_v60, %v4196_v18  ;;  %vm672_vm15 = vcmp.eq.s32.totalorder %v6473_v60, %v4205_v19  ;;  %v1915_v24 = vadd.f32 %v1787_v12, %v6474_v54  ;;  %v1609_v29 = vpop.permute.xlu0 %1608  ;;  %v6481_v32 = vld [vmem:[#allocation156_spill] sm:$0xff]  ;;  %v1613_v21 = vpop.permute.xlu1 %1612 }
 0x270   : > { %2393 = vst [vmem:[%s4828_s30 + $0xf0] sm:$0xff] %v2642_v44  ;;  %v1916_v35 = vadd.f32 %v1788_v10, %v4812_v51  ;;  %v1789_v61 = vsel %vm1405_vm2, %v1601_v22, 0.0  ;;  %v1790_v55 = vsel %vm1406_vm9, %v1601_v22, 0.0  ;;  %v5287_v46 = vsel %vm667_vm11, %v6475_v8, 0.0  ;;  %v6482_v10 = vld [vmem:[#allocation78_spill] sm:$0xff]  ;;  %v6483_v22 = vld [vmem:[#allocation77_spill] sm:$0xff] }
 0x271   : > { %v5293_v59 = vsel %vm668_vm12, %v6475_v8, 0.0  ;;  %2394 = vst [vmem:[%s4828_s30 + $0xf8] sm:$0xff] %v2643_v42  ;;  %v1917_v0 = vadd.f32 %v1789_v61, %v6476_v31  ;;  %v1918_v51 = vadd.f32 %v1790_v55, %v6477_v33  ;;  %vm1407_vm6 = vcmp.eq.s32.totalorder %v6478_v62, %v4196_v18  ;;  %v6485_v33 = vld [vmem:[#allocation157_spill] sm:$0xff] }
 0x272   : > { %vm1408_vm7 = vcmp.eq.s32.totalorder %v6478_v62, %v4205_v19  ;;  %vm1409_vm11 = vcmp.eq.s32.totalorder %v6479_v58, %v4196_v18  ;;  %v2644_v41 = vpack.c.bf16 %v1916_v35, %v1915_v24  ;;  %vm1410_vm12 = vcmp.eq.s32.totalorder %v6479_v58, %v4205_v19  ;;  %v6486_v58 = vld [vmem:[#allocation82_spill] sm:$0xff] }
 0x273   : > { %v2645_v3 = vpack.c.bf16 %v1918_v51, %v1917_v0  ;;  %v1791_v14 = vsel %vm1407_vm6, %v1605_v38, 0.0  ;;  %v1792_v2 = vsel %vm1408_vm7, %v1605_v38, 0.0  ;;  %vm677_vm0 = vcmp.eq.s32.totalorder %v6480_v28, %v4196_v18  ;;  %v1617_v61 = vpop.permute.xlu0 %1616  ;;  %v1621_v60 = vpop.permute.xlu1 %1620 }
 0x274   : > { %vm678_vm3 = vcmp.eq.s32.totalorder %v6480_v28, %v4205_v19  ;;  %2395 = vst [vmem:[%s4828_s30 + $0x100] sm:$0xff] %v2644_v41  ;;  %v1919_v47 = vadd.f32 %v1791_v14, %v4867_v45  ;;  %v1920_v36 = vadd.f32 %v1792_v2, %v4873_v4  ;;  %v1793_v20 = vsel %vm1409_vm11, %v1609_v29, 0.0  ;;  %v6487_v41 = vld [vmem:[#allocation81_spill] sm:$0xff] }
 0x275   : > { %v1794_v44 = vsel %vm1410_vm12, %v1609_v29, 0.0  ;;  %v5317_v42 = vsel %vm673_vm1, %v6481_v32, 0.0  ;;  %v5323_v12 = vsel %vm674_vm13, %v6481_v32, 0.0  ;;  %2396 = vst [vmem:[%s4828_s30 + $0x108] sm:$0xff] %v2645_v3  ;;  %v1921_v45 = vadd.f32 %v1793_v20, %v4837_v11 }
 0x276   : > { %v1922_v4 = vadd.f32 %v1794_v44, %v4843_v56  ;;  %vm1411_vm8 = vcmp.eq.s32.totalorder %v6482_v10, %v4196_v18  ;;  %vm1412_vm10 = vcmp.eq.s32.totalorder %v6482_v10, %v4205_v19  ;;  %vm1413_vm1 = vcmp.eq.s32.totalorder %v6483_v22, %v4196_v18  ;;  %v6484_v56 = vld [vmem:[#allocation120_spill] sm:$0xff]  ;;  %v6489_v44 = vld [vmem:[#allocation158_spill] sm:$0xff]  ;;  %v6491_v10 = vld [vmem:[#allocation85_spill] sm:$0xff] }
 0x277   : > { %v2646_v54 = vpack.c.bf16 %v1920_v36, %v1919_v47  ;;  %vm1414_vm13 = vcmp.eq.s32.totalorder %v6483_v22, %v4205_v19  ;;  %v1795_v35 = vsel %vm1411_vm8, %v1613_v21, 0.0  ;;  %v1796_v11 = vsel %vm1412_vm10, %v1613_v21, 0.0  ;;  %v1625_v2 = vpop.permute.xlu0 %1624  ;;  %v1629_v28 = vpop.permute.xlu1 %1628 }
 0x278   : > { %v2647_v24 = vpack.c.bf16 %v1922_v4, %v1921_v45  ;;  %vm675_vm5 = vcmp.eq.s32.totalorder %v6484_v56, %v4196_v18  ;;  %vm676_vm4 = vcmp.eq.s32.totalorder %v6484_v56, %v4205_v19  ;;  %v1923_v55 = vadd.f32 %v1795_v35, %v4927_v13  ;;  %v6490_v4 = vld [vmem:[#allocation86_spill] sm:$0xff] }
 0x279   : > { %2397 = vst [vmem:[%s4828_s30 + $0x110] sm:$0xff] %v2646_v54  ;;  %v1924_v8 = vadd.f32 %v1796_v11, %v4933_v39  ;;  %v1797_v31 = vsel %vm1413_vm1, %v1617_v61, 0.0  ;;  %v1798_v0 = vsel %vm1414_vm13, %v1617_v61, 0.0  ;;  %v5347_v51 = vsel %vm671_vm14, %v6485_v33, 0.0 }
 0x27a   : > { %v5353_v62 = vsel %vm672_vm15, %v6485_v33, 0.0  ;;  %2398 = vst [vmem:[%s4828_s30 + $0x118] sm:$0xff] %v2647_v24  ;;  %v1925_v13 = vadd.f32 %v1797_v31, %v4897_v27  ;;  %v1926_v39 = vadd.f32 %v1798_v0, %v4903_v30  ;;  %vm1415_vm2 = vcmp.eq.s32.totalorder %v6486_v58, %v4196_v18  ;;  %v6488_v30 = vld [vmem:[#allocation123_spill] sm:$0xff]  ;;  %v6494_v33 = vld [vmem:[#allocation90_spill] sm:$0xff] }
 0x27b   : > { %vm1416_vm9 = vcmp.eq.s32.totalorder %v6486_v58, %v4205_v19  ;;  %vm1417_vm14 = vcmp.eq.s32.totalorder %v6487_v41, %v4196_v18  ;;  %v2648_v38 = vpack.c.bf16 %v1924_v8, %v1923_v55  ;;  %vm1418_vm15 = vcmp.eq.s32.totalorder %v6487_v41, %v4205_v19  ;;  %v1633_v24 = vpop.permute.xlu0 %1632  ;;  %v6493_v8 = vld [vmem:[#allocation159_spill] sm:$0xff]  ;;  %v1637_v56 = vpop.permute.xlu1 %1636 }
 0x27c   : > { %v2649_v3 = vpack.c.bf16 %v1926_v39, %v1925_v13  ;;  %v1799_v14 = vsel %vm1415_vm2, %v1621_v60, 0.0  ;;  %v1800_v27 = vsel %vm1416_vm9, %v1621_v60, 0.0  ;;  %vm681_vm6 = vcmp.eq.s32.totalorder %v6488_v30, %v4196_v18  ;;  %v6495_v13 = vld [vmem:[#allocation89_spill] sm:$0xff] }
 0x27d   : > { %vm682_vm7 = vcmp.eq.s32.totalorder %v6488_v30, %v4205_v19  ;;  %2399 = vst [vmem:[%s4828_s30 + $0x120] sm:$0xff] %v2648_v38  ;;  %v1927_v29 = vadd.f32 %v1799_v14, %v4987_v40  ;;  %v1928_v47 = vadd.f32 %v1800_v27, %v4993_v50  ;;  %v1801_v36 = vsel %vm1417_vm14, %v1625_v2, 0.0 }
 0x27e   : > { %v1802_v20 = vsel %vm1418_vm15, %v1625_v2, 0.0  ;;  %v5377_v32 = vsel %vm677_vm0, %v6489_v44, 0.0  ;;  %v5383_v45 = vsel %vm678_vm3, %v6489_v44, 0.0  ;;  %2400 = vst [vmem:[%s4828_s30 + $0x128] sm:$0xff] %v2649_v3  ;;  %v1929_v40 = vadd.f32 %v1801_v36, %v4957_v48  ;;  %v6497_v2 = vld [vmem:[#allocation160_spill] sm:$0xff]  ;;  %v6498_v36 = vld [vmem:[#allocation94_spill] sm:$0xff] }
 0x27f   : > { %v1930_v50 = vadd.f32 %v1802_v20, %v4963_v26  ;;  %vm1419_vm11 = vcmp.eq.s32.totalorder %v6490_v4, %v4196_v18  ;;  %vm1420_vm12 = vcmp.eq.s32.totalorder %v6490_v4, %v4205_v19  ;;  %vm1421_vm0 = vcmp.eq.s32.totalorder %v6491_v10, %v4196_v18  ;;  %v6492_v26 = vld [vmem:[#allocation124_spill] sm:$0xff]  ;;  %v1641_v38 = vpop.permute.xlu0 %1640  ;;  %v6499_v20 = vld [vmem:[#allocation93_spill] sm:$0xff]  ;;  %v1645_v30 = vpop.permute.xlu1 %1644 }
 0x280   : > { %v2650_v22 = vpack.c.bf16 %v1928_v47, %v1927_v29  ;;  %vm1422_vm3 = vcmp.eq.s32.totalorder %v6491_v10, %v4205_v19  ;;  %v1803_v21 = vsel %vm1419_vm11, %v1629_v28, 0.0  ;;  %v1804_v48 = vsel %vm1420_vm12, %v1629_v28, 0.0 }
 0x281   : > { %v2651_v54 = vpack.c.bf16 %v1930_v50, %v1929_v40  ;;  %vm679_vm8 = vcmp.eq.s32.totalorder %v6492_v26, %v4196_v18  ;;  %vm680_vm10 = vcmp.eq.s32.totalorder %v6492_v26, %v4205_v19  ;;  %v1931_v35 = vadd.f32 %v1803_v21, %v5047_v57  ;;  %v6501_v21 = vld [vmem:[#allocation161_spill] sm:$0xff] }
 0x282   : > { %2401 = vst [vmem:[%s4828_s30 + $0x130] sm:$0xff] %v2650_v22  ;;  %v1932_v11 = vadd.f32 %v1804_v48, %v5053_v63  ;;  %v1805_v61 = vsel %vm1421_vm0, %v1633_v24, 0.0  ;;  %v1806_v55 = vsel %vm1422_vm3, %v1633_v24, 0.0  ;;  %v5407_v31 = vsel %vm675_vm5, %v6493_v8, 0.0 }
 0x283   : > { %v5413_v0 = vsel %vm676_vm4, %v6493_v8, 0.0  ;;  %2402 = vst [vmem:[%s4828_s30 + $0x138] sm:$0xff] %v2651_v54  ;;  %v1933_v57 = vadd.f32 %v1805_v61, %v5017_v7  ;;  %v1934_v63 = vadd.f32 %v1806_v55, %v5023_v6  ;;  %vm1423_vm1 = vcmp.eq.s32.totalorder %v6494_v33, %v4196_v18  ;;  %v6496_v6 = vld [vmem:[#allocation127_spill] sm:$0xff]  ;;  %v1649_v4 = vpop.permute.xlu0 %1648  ;;  %v1653_v26 = vpop.permute.xlu1 %1652 }
 0x284   : > { %vm1424_vm13 = vcmp.eq.s32.totalorder %v6494_v33, %v4205_v19  ;;  %vm1425_vm5 = vcmp.eq.s32.totalorder %v6495_v13, %v4196_v18  ;;  %v2652_v39 = vpack.c.bf16 %v1932_v11, %v1931_v35  ;;  %vm1426_vm4 = vcmp.eq.s32.totalorder %v6495_v13, %v4205_v19  ;;  %v6502_v35 = vld [vmem:[#allocation98_spill] sm:$0xff]  ;;  %v6503_v11 = vld [vmem:[#allocation97_spill] sm:$0xff] }
 0x285   : > { %v2653_v58 = vpack.c.bf16 %v1934_v63, %v1933_v57  ;;  %v1807_v41 = vsel %vm1423_vm1, %v1637_v56, 0.0  ;;  %v1808_v7 = vsel %vm1424_vm13, %v1637_v56, 0.0  ;;  %vm685_vm2 = vcmp.eq.s32.totalorder %v6496_v6, %v4196_v18  ;;  %v6505_v56 = vld [vmem:[#allocation5_spill] sm:$0xff] }
 0x286   : > { %vm686_vm9 = vcmp.eq.s32.totalorder %v6496_v6, %v4205_v19  ;;  %2403 = vst [vmem:[%s4828_s30 + $0x140] sm:$0xff] %v2652_v39  ;;  %v1935_v60 = vadd.f32 %v1807_v41, %v5107_v15  ;;  %v1936_v3 = vadd.f32 %v1808_v7, %v5113_v43  ;;  %v1809_v14 = vsel %vm1425_vm5, %v1641_v38, 0.0  ;;  %v6506_v7 = vld [vmem:[#allocation102_spill] sm:$0xff] }
 0x287   : > { %v1810_v27 = vsel %vm1426_vm4, %v1641_v38, 0.0  ;;  %v5437_v29 = vsel %vm681_vm6, %v6497_v2, 0.0  ;;  %v5443_v47 = vsel %vm682_vm7, %v6497_v2, 0.0  ;;  %2404 = vst [vmem:[%s4828_s30 + $0x148] sm:$0xff] %v2653_v58  ;;  %v1937_v15 = vadd.f32 %v1809_v14, %v5077_v49  ;;  %v1657_v57 = vpop.permute.xlu0 %1656  ;;  %v6507_v38 = vld [vmem:[#allocation101_spill] sm:$0xff]  ;;  %v1661_v6 = vpop.permute.xlu1 %1660 }
 0x288   : > { %v1938_v43 = vadd.f32 %v1810_v27, %v5083_v23  ;;  %vm1427_vm14 = vcmp.eq.s32.totalorder %v6498_v36, %v4196_v18  ;;  %vm1428_vm15 = vcmp.eq.s32.totalorder %v6498_v36, %v4205_v19  ;;  %vm1429_vm6 = vcmp.eq.s32.totalorder %v6499_v20, %v4196_v18  ;;  %v6500_v23 = vld [vmem:[#allocation128_spill] sm:$0xff] }
 0x289   : > { %v2654_v44 = vpack.c.bf16 %v1936_v3, %v1935_v60  ;;  %vm1430_vm7 = vcmp.eq.s32.totalorder %v6499_v20, %v4205_v19  ;;  %v1811_v50 = vsel %vm1427_vm14, %v1645_v30, 0.0  ;;  %v1812_v49 = vsel %vm1428_vm15, %v1645_v30, 0.0  ;;  %v6509_v20 = vld [vmem:[#allocation162_spill] sm:$0xff] }
 0x28a   : > { %v2655_v40 = vpack.c.bf16 %v1938_v43, %v1937_v15  ;;  %vm683_vm11 = vcmp.eq.s32.totalorder %v6500_v23, %v4196_v18  ;;  %vm684_vm12 = vcmp.eq.s32.totalorder %v6500_v23, %v4205_v19  ;;  %v1939_v10 = vadd.f32 %v1811_v50, %v5167_v34  ;;  %v6511_v50 = vld [vmem:[#allocation105_spill] sm:$0xff] }
 0x28b   : > { %2405 = vst [vmem:[%s4828_s30 + $0x150] sm:$0xff] %v2654_v44  ;;  %v1940_v22 = vadd.f32 %v1812_v49, %v5173_v17  ;;  %v1813_v28 = vsel %vm1429_vm6, %v1649_v4, 0.0  ;;  %v1814_v54 = vsel %vm1430_vm7, %v1649_v4, 0.0  ;;  %v5467_v48 = vsel %vm679_vm8, %v6501_v21, 0.0  ;;  %v1665_v27 = vpop.permute.xlu0 %1664  ;;  %v1669_v4 = vpop.permute.xlu1 %1668 }
 0x28c   : > { %v5473_v24 = vsel %vm680_vm10, %v6501_v21, 0.0  ;;  %2406 = vst [vmem:[%s4828_s30 + $0x158] sm:$0xff] %v2655_v40  ;;  %v1941_v34 = vadd.f32 %v1813_v28, %v5137_v5  ;;  %v1942_v17 = vadd.f32 %v1814_v54, %v5143_v1  ;;  %vm1431_vm0 = vcmp.eq.s32.totalorder %v6502_v35, %v4196_v18  ;;  %v6504_v1 = vld [vmem:[#allocation131_spill] sm:$0xff]  ;;  %v6510_v40 = vld [vmem:[#allocation106_spill] sm:$0xff] }
 0x28d   : > { %vm1432_vm3 = vcmp.eq.s32.totalorder %v6502_v35, %v4205_v19  ;;  %vm1433_vm8 = vcmp.eq.s32.totalorder %v6503_v11, %v4196_v18  ;;  %v2656_v61 = vpack.c.bf16 %v1940_v22, %v1939_v10  ;;  %vm1434_vm10 = vcmp.eq.s32.totalorder %v6503_v11, %v4205_v19 }
 0x28e   : > { %v2657_v55 = vpack.c.bf16 %v1942_v17, %v1941_v34  ;;  %v1815_v8 = vsel %vm1431_vm0, %v1653_v26, 0.0  ;;  %v1816_v5 = vsel %vm1432_vm3, %v1653_v26, 0.0  ;;  %vm689_vm1 = vcmp.eq.s32.totalorder %v6504_v1, %v4196_v18  ;;  %v6513_v17 = vld [vmem:[#allocation7_spill] sm:$0xff]  ;;  %v6515_v26 = vld [vmem:[#allocation109_spill] sm:$0xff] }
 0x28f   : > { %vm690_vm13 = vcmp.eq.s32.totalorder %v6504_v1, %v4205_v19  ;;  %2407 = vst [vmem:[%s4828_s30 + $0x160] sm:$0xff] %v2656_v61  ;;  %v1943_v63 = vadd.f32 %v1815_v8, %v5227_v37  ;;  %v1944_v33 = vadd.f32 %v1816_v5, %v5233_v25  ;;  %v1817_v13 = vsel %vm1433_vm8, %v1657_v57, 0.0  ;;  %v1673_v22 = vpop.permute.xlu0 %1672  ;;  %v6514_v61 = vld [vmem:[#allocation110_spill] sm:$0xff]  ;;  %v1677_v8 = vpop.permute.xlu1 %1676 }
 0x290   : > { %v1818_v39 = vsel %vm1434_vm10, %v1657_v57, 0.0  ;;  %v5497_v58 = vsel %vm685_vm2, %v6505_v56, 0.0  ;;  %v5503_v41 = vsel %vm686_vm9, %v6505_v56, 0.0  ;;  %2408 = vst [vmem:[%s4828_s30 + $0x168] sm:$0xff] %v2657_v55  ;;  %v1945_v37 = vadd.f32 %v1817_v13, %v5197_v9  ;;  %v6517_v56 = vld [vmem:[#allocation6_spill] sm:$0xff] }
 0x291   : > { %v1946_v25 = vadd.f32 %v1818_v39, %v5203_v53  ;;  %vm1435_vm5 = vcmp.eq.s32.totalorder %v6506_v7, %v4196_v18  ;;  %vm1436_vm4 = vcmp.eq.s32.totalorder %v6506_v7, %v4205_v19  ;;  %vm1437_vm2 = vcmp.eq.s32.totalorder %v6507_v38, %v4196_v18  ;;  %v6508_v53 = vld [vmem:[#allocation132_spill] sm:$0xff] }
 0x292   : > { %v2658_v60 = vpack.c.bf16 %v1944_v33, %v1943_v63  ;;  %vm1438_vm9 = vcmp.eq.s32.totalorder %v6507_v38, %v4205_v19  ;;  %v1819_v14 = vsel %vm1435_vm5, %v1661_v6, 0.0  ;;  %v1820_v9 = vsel %vm1436_vm4, %v1661_v6, 0.0  ;;  %v6519_v38 = vld [vmem:[#allocation113_spill] sm:$0xff] }
 0x293   : > { %v2659_v3 = vpack.c.bf16 %v1946_v25, %v1945_v37  ;;  %vm687_vm14 = vcmp.eq.s32.totalorder %v6508_v53, %v4196_v18  ;;  %vm688_vm15 = vcmp.eq.s32.totalorder %v6508_v53, %v4205_v19  ;;  %v1947_v2 = vadd.f32 %v1819_v14, %v5287_v46  ;;  %v1681_v1 = vpop.permute.xlu0 %1680  ;;  %v1685_v6 = vpop.permute.xlu1 %1684 }
 0x294   : > { %2409 = vst [vmem:[%s4828_s30 + $0x170] sm:$0xff] %v2658_v60  ;;  %v1948_v15 = vadd.f32 %v1820_v9, %v5293_v59  ;;  %v1821_v43 = vsel %vm1437_vm2, %v1665_v27, 0.0  ;;  %v1822_v36 = vsel %vm1438_vm9, %v1665_v27, 0.0  ;;  %v5527_v44 = vsel %vm683_vm11, %v6509_v20, 0.0 }
 0x295   : > { %v5533_v30 = vsel %vm684_vm12, %v6509_v20, 0.0  ;;  %2410 = vst [vmem:[%s4828_s30 + $0x178] sm:$0xff] %v2659_v3  ;;  %v1949_v46 = vadd.f32 %v1821_v43, %v5257_v16  ;;  %v1950_v59 = vadd.f32 %v1822_v36, %v5263_v52  ;;  %vm1439_vm6 = vcmp.eq.s32.totalorder %v6510_v40, %v4196_v18  ;;  %v6512_v52 = vld [vmem:[#allocation135_spill] sm:$0xff]  ;;  %v6521_v43 = vld [vmem:[#allocation8_spill] sm:$0xff] }
 0x296   : > { %vm1440_vm7 = vcmp.eq.s32.totalorder %v6510_v40, %v4205_v19  ;;  %vm1441_vm11 = vcmp.eq.s32.totalorder %v6511_v50, %v4196_v18  ;;  %v2660_v49 = vpack.c.bf16 %v1948_v15, %v1947_v2  ;;  %vm1442_vm12 = vcmp.eq.s32.totalorder %v6511_v50, %v4205_v19  ;;  %v6520_v15 = vld [vmem:[#allocation138_spill] sm:$0xff] }
 0x297   : > { %v2661_v23 = vpack.c.bf16 %v1950_v59, %v1949_v46  ;;  %v1823_v10 = vsel %vm1439_vm6, %v1669_v4, 0.0  ;;  %v1824_v16 = vsel %vm1440_vm7, %v1669_v4, 0.0  ;;  %vm693_vm0 = vcmp.eq.s32.totalorder %v6512_v52, %v4196_v18  ;;  %v1689_v9 = vpop.permute.xlu0 %1688  ;;  %v6522_v46 = vld [vmem:[#allocation19_spill] sm:$0xff]  ;;  %v6523_v59 = vld [vmem:[#allocation24_spill] sm:$0xff]  ;;  %v1693_v50 = vpop.permute.xlu1 %1692 }
 0x298   : > { %vm694_vm3 = vcmp.eq.s32.totalorder %v6512_v52, %v4205_v19  ;;  %2411 = vst [vmem:[%s4828_s30 + $0x180] sm:$0xff] %v2660_v49  ;;  %v1951_v28 = vadd.f32 %v1823_v10, %v5347_v51  ;;  %v1952_v54 = vadd.f32 %v1824_v16, %v5353_v62  ;;  %v1825_v21 = vsel %vm1441_vm11, %v1673_v22, 0.0  ;;  %v6524_v52 = vld [vmem:[#allocation139_spill] sm:$0xff] }
 0x299   : > { %v1826_v34 = vsel %vm1442_vm12, %v1673_v22, 0.0  ;;  %v5557_v35 = vsel %vm689_vm1, %v6513_v17, 0.0  ;;  %v5563_v11 = vsel %vm690_vm13, %v6513_v17, 0.0  ;;  %2412 = vst [vmem:[%s4828_s30 + $0x188] sm:$0xff] %v2661_v23  ;;  %v1953_v51 = vadd.f32 %v1825_v21, %v5317_v42  ;;  %v6527_v17 = vld [vmem:[#allocation40_spill] sm:$0xff] }
 0x29a   : > { %v1954_v62 = vadd.f32 %v1826_v34, %v5323_v12  ;;  %vm1443_vm8 = vcmp.eq.s32.totalorder %v6514_v61, %v4196_v18  ;;  %vm1444_vm10 = vcmp.eq.s32.totalorder %v6514_v61, %v4205_v19  ;;  %vm1445_vm1 = vcmp.eq.s32.totalorder %v6515_v26, %v4196_v18  ;;  %v6516_v12 = vld [vmem:[#allocation136_spill] sm:$0xff]  ;;  %v6526_v34 = vld [vmem:[#allocation35_spill] sm:$0xff] }
 0x29b   : > { %v2662_v55 = vpack.c.bf16 %v1952_v54, %v1951_v28  ;;  %vm1446_vm13 = vcmp.eq.s32.totalorder %v6515_v26, %v4205_v19  ;;  %v1827_v57 = vsel %vm1443_vm8, %v1677_v8, 0.0  ;;  %v1828_v42 = vsel %vm1444_vm10, %v1677_v8, 0.0  ;;  %v1697_v23 = vpop.permute.xlu0 %1696  ;;  %v6525_v28 = vld [vmem:[#allocation163_spill] sm:$0xff] }
 0x29c   : > { %v2663_v5 = vpack.c.bf16 %v1954_v62, %v1953_v51  ;;  %vm691_vm5 = vcmp.eq.s32.totalorder %v6516_v12, %v4196_v18  ;;  %vm692_vm4 = vcmp.eq.s32.totalorder %v6516_v12, %v4205_v19  ;;  %v1955_v63 = vadd.f32 %v1827_v57, %v5407_v31  ;;  %v1701_v62 = vpop.permute.xlu1 %1700  ;;  %v6528_v12 = vld [vmem:[#allocation10_spill] sm:$0xff] }
 0x29d   : > { %2413 = vst [vmem:[%s4828_s30 + $0x190] sm:$0xff] %v2662_v55  ;;  %v1956_v33 = vadd.f32 %v1828_v42, %v5413_v0  ;;  %v1829_v13 = vsel %vm1445_vm1, %v1681_v1, 0.0  ;;  %v1830_v39 = vsel %vm1446_vm13, %v1681_v1, 0.0  ;;  %v1135_v37 = vsel %vm687_vm14, %v6517_v56, 0.0  ;;  %v6518_v0 = vld [vmem:[#allocation114_spill] sm:$0xff] }
 0x29e   : > { %v1136_v25 = vsel %vm688_vm15, %v6517_v56, 0.0  ;;  %2414 = vst [vmem:[%s4828_s30 + $0x198] sm:$0xff] %v2663_v5  ;;  %v1957_v7 = vadd.f32 %v1829_v13, %v5377_v32  ;;  %v1958_v31 = vadd.f32 %v1830_v39, %v5383_v45  ;;  %vm1447_vm2 = vcmp.eq.s32.totalorder %v6518_v0, %v4196_v18  ;;  %v6529_v13 = vld [vmem:[#allocation43_spill] sm:$0xff] }
 0x29f   : > { %vm1448_vm9 = vcmp.eq.s32.totalorder %v6518_v0, %v4205_v19  ;;  %vm1449_vm6 = vcmp.eq.s32.totalorder %v6519_v38, %v4196_v18  ;;  %v2664_v60 = vpack.c.bf16 %v1956_v33, %v1955_v63  ;;  %vm1450_vm14 = vcmp.eq.s32.totalorder %v6519_v38, %v4205_v19  ;;  %v1705_v55 = vpop.permute.xlu0 %1704 }
 0x2a0   : > { %v2665_v3 = vpack.c.bf16 %v1958_v31, %v1957_v7  ;;  %v1831_v14 = vsel %vm1447_vm2, %v1685_v6, 0.0  ;;  %v1832_v32 = vsel %vm1448_vm9, %v1685_v6, 0.0  ;;  %v1833_v53 = vsel %vm1449_vm6, %v1689_v9, 0.0  ;;  %v1709_v39 = vpop.permute.xlu1 %1708 }
 0x2a1   : > { %2415 = vst [vmem:[%s4828_s30 + $0x1a0] sm:$0xff] %v2664_v60  ;;  %v1959_v45 = vadd.f32 %v1831_v14, %v5467_v48  ;;  %v1960_v27 = vadd.f32 %v1832_v32, %v5473_v24  ;;  %v1834_v2 = vsel %vm1450_vm14, %v1689_v9, 0.0  ;;  %vm697_vm15 = vcmp.eq.s32.totalorder %v6520_v15, %v4196_v18  ;;  %v6531_v14 = vld [vmem:[#allocation9_spill] sm:$0xff] }
 0x2a2   : > { %vm698_vm7 = vcmp.eq.s32.totalorder %v6520_v15, %v4205_v19  ;;  %v5613_v36 = vsel %vm693_vm0, %v6521_v43, 0.0  ;;  %v5619_v48 = vsel %vm694_vm3, %v6521_v43, 0.0  ;;  %2416 = vst [vmem:[%s4828_s30 + $0x1a8] sm:$0xff] %v2665_v3  ;;  %v1961_v24 = vadd.f32 %v1833_v53, %v5437_v29 }
 0x2a3   : > { %v1962_v20 = vadd.f32 %v1834_v2, %v5443_v47  ;;  %vm1451_vm11 = vcmp.eq.s32.totalorder %v6522_v46, %v4196_v18  ;;  %vm1452_vm12 = vcmp.eq.s32.totalorder %v6522_v46, %v4205_v19  ;;  %vm1453_vm0 = vcmp.eq.s32.totalorder %v6523_v59, %v4196_v18  ;;  %v1713_v7 = vpop.permute.xlu0 %1712  ;;  %v6533_v2 = vld [vmem:[#allocation48_spill] sm:$0xff] }
 0x2a4   : > { %v2666_v40 = vpack.c.bf16 %v1960_v27, %v1959_v45  ;;  %vm1454_vm3 = vcmp.eq.s32.totalorder %v6523_v59, %v4205_v19  ;;  %v1835_v4 = vsel %vm1451_vm11, %v1693_v50, 0.0  ;;  %v1836_v29 = vsel %vm1452_vm12, %v1693_v50, 0.0  ;;  %v6532_v27 = vld [vmem:[#allocation47_spill] sm:$0xff]  ;;  %v1717_v53 = vpop.permute.xlu1 %1716 }
 0x2a5   : > { %v2667_v49 = vpack.c.bf16 %v1962_v20, %v1961_v24  ;;  %v1963_v47 = vadd.f32 %v1835_v4, %v5527_v44  ;;  %v1964_v10 = vadd.f32 %v1836_v29, %v5533_v30  ;;  %v1837_v16 = vsel %vm1453_vm0, %v1697_v23, 0.0 }
 0x2a6   : > { %2417 = vst [vmem:[%s4828_s30 + $0x1b0] sm:$0xff] %v2666_v40  ;;  %v1838_v22 = vsel %vm1454_vm3, %v1697_v23, 0.0  ;;  %vm695_vm8 = vcmp.eq.s32.totalorder %v6524_v52, %v4196_v18  ;;  %vm696_vm10 = vcmp.eq.s32.totalorder %v6524_v52, %v4205_v19  ;;  %v1139_v54 = vsel %vm691_vm5, %v6525_v28, 0.0 }
 0x2a7   : > { %v1140_v44 = vsel %vm692_vm4, %v6525_v28, 0.0  ;;  %2418 = vst [vmem:[%s4828_s30 + $0x1b8] sm:$0xff] %v2667_v49  ;;  %v1965_v30 = vadd.f32 %v1837_v16, %v5497_v58  ;;  %v1966_v21 = vadd.f32 %v1838_v22, %v5503_v41  ;;  %vm1455_vm1 = vcmp.eq.s32.totalorder %v6526_v34, %v4196_v18 }
 0x2a8   : > { %vm1456_vm13 = vcmp.eq.s32.totalorder %v6526_v34, %v4205_v19  ;;  %vm1457_vm5 = vcmp.eq.s32.totalorder %v6527_v17, %v4196_v18  ;;  %v2668_v51 = vpack.c.bf16 %v1964_v10, %v1963_v47  ;;  %vm1458_vm4 = vcmp.eq.s32.totalorder %v6527_v17, %v4205_v19 }
 0x2a9   : > { %v2669_v61 = vpack.c.bf16 %v1966_v21, %v1965_v30  ;;  %v1839_v26 = vsel %vm1455_vm1, %v1701_v62, 0.0  ;;  %v1840_v58 = vsel %vm1456_vm13, %v1701_v62, 0.0  ;;  %v1841_v5 = vsel %vm1457_vm5, %v1705_v55, 0.0 }
 0x2aa   : > { %2419 = vst [vmem:[%s4828_s30 + $0x1c0] sm:$0xff] %v2668_v51  ;;  %v1967_v41 = vadd.f32 %v1839_v26, %v1135_v37  ;;  %v1968_v8 = vadd.f32 %v1840_v58, %v1136_v25  ;;  %v1842_v57 = vsel %vm1458_vm4, %v1705_v55, 0.0  ;;  %v1969_v42 = vadd.f32 %v1841_v5, %v5557_v35  ;;  %v6530_v35 = vld [vmem:[#allocation121_spill] sm:$0xff] }
 0x2ab   : > { %2420 = vst [vmem:[%s4828_s30 + $0x1c8] sm:$0xff] %v2669_v61  ;;  %v1970_v1 = vadd.f32 %v1842_v57, %v5563_v11  ;;  %v1145_v63 = vsel %vm697_vm15, %v6528_v12, 0.0  ;;  %v1146_v33 = vsel %vm698_vm7, %v6528_v12, 0.0  ;;  %vm1459_vm2 = vcmp.eq.s32.totalorder %v6529_v13, %v4196_v18 }
 0x2ac   : > { %vm1460_vm9 = vcmp.eq.s32.totalorder %v6529_v13, %v4205_v19  ;;  %vm1461_vm6 = vcmp.eq.s32.totalorder %v6530_v35, %v4196_v18  ;;  %v2670_v11 = vpack.c.bf16 %v1968_v8, %v1967_v41  ;;  %vm1462_vm14 = vcmp.eq.s32.totalorder %v6530_v35, %v4205_v19 }
 0x2ad   : > { %v2671_v56 = vpack.c.bf16 %v1970_v1, %v1969_v42  ;;  %v1843_v37 = vsel %vm1459_vm2, %v1709_v39, 0.0  ;;  %v1844_v25 = vsel %vm1460_vm9, %v1709_v39, 0.0  ;;  %v1845_v38 = vsel %vm1461_vm6, %v1713_v7, 0.0 }
 0x2ae   : > { %2421 = vst [vmem:[%s4828_s30 + $0x1d0] sm:$0xff] %v2670_v11  ;;  %v1971_v31 = vadd.f32 %v1843_v37, %v1139_v54  ;;  %v1972_v0 = vadd.f32 %v1844_v25, %v1140_v44  ;;  %v1846_v60 = vsel %vm1462_vm14, %v1713_v7, 0.0  ;;  %v1973_v6 = vadd.f32 %v1845_v38, %v5613_v36 }
 0x2af   : > { %2422 = vst [vmem:[%s4828_s30 + $0x1d8] sm:$0xff] %v2671_v56  ;;  %v1974_v3 = vadd.f32 %v1846_v60, %v5619_v48  ;;  %v1143_v32 = vsel %vm695_vm8, %v6531_v14, 0.0  ;;  %v1144_v9 = vsel %vm696_vm10, %v6531_v14, 0.0  ;;  %vm1463_vm15 = vcmp.eq.s32.totalorder %v6532_v27, %v4196_v18  ;;  %v1721_v48 = vpop.permute.xlu0 %1720 }
 0x2b0   : > { %v2672_v45 = vpack.c.bf16 %v1972_v0, %v1971_v31  ;;  %vm1464_vm7 = vcmp.eq.s32.totalorder %v6532_v27, %v4205_v19  ;;  %vm1465_vm11 = vcmp.eq.s32.totalorder %v6533_v2, %v4196_v18  ;;  %v1847_v43 = vsel %vm1463_vm15, %v1717_v53, 0.0 }
 0x2b1   : > { %v2673_v15 = vpack.c.bf16 %v1974_v3, %v1973_v6  ;;  %v1848_v36 = vsel %vm1464_vm7, %v1717_v53, 0.0  ;;  %vm1466_vm12 = vcmp.eq.s32.totalorder %v6533_v2, %v4205_v19  ;;  %v1975_v24 = vadd.f32 %v1847_v43, %v1143_v32 }
 0x2b2   : > { %2423 = vst [vmem:[%s4828_s30 + $0x1e0] sm:$0xff] %v2672_v45  ;;  %v1976_v20 = vadd.f32 %v1848_v36, %v1144_v9  ;;  %v1849_v46 = vsel %vm1465_vm11, %v1721_v48, 0.0  ;;  %v1850_v59 = vsel %vm1466_vm12, %v1721_v48, 0.0 }
 0x2b3   : > { %2424 = vst [vmem:[%s4828_s30 + $0x1e8] sm:$0xff] %v2673_v15  ;;  %v1977_v18 = vadd.f32 %v1849_v46, %v1145_v63  ;;  %v1978_v40 = vadd.f32 %v1850_v59, %v1146_v33 }
 0x2b4   : > { %v2674_v50 = vpack.c.bf16 %v1976_v20, %v1975_v24 }
 0x2b5   : > { %v2675_v19 = vpack.c.bf16 %v1978_v40, %v1977_v18 }
 0x2b6   : > { %2425 = vst [vmem:[%s4828_s30 + $0x1f0] sm:$0xff] %v2674_v50 }
 0x2b7   : > { %2426 = vst [vmem:[%s4828_s30 + $0x1f8] sm:$0xff] %v2675_v19 }
 0x2b8   : > { %2754 = shalt.err (!%p2751_p3)
}
 0x2b9   : > { %s2755_s20 = scalar_lea.hbm %s5705_s6, 8192  ;;  %s2759_s25 = scalar_lea.hbm %s5761_s2, 16384 }
 0x2ba   : > { %p2756_p5 = scmp.ne.s32.totalorder %s5705_s6, %s2755_s20  ;;  %p2760_p9 = scmp.lt.u32.totalorder %s5705_s6, %s5761_s2 }
 0x2bb   : > { %p2761_p10 = scmp.lt.u32.totalorder %s2759_s25, %s2755_s20  ;;  %p2763_p12 = scmp.lt.u32.totalorder %s2755_s20, %s5705_s6 }
 0x2bc   : > { %p2757_p6 = pnand %p2756_p5, %p2882_p4 }
 0x2bd   : > { %p2762_p11 = por %p2761_p10, %p2760_p9 }
 0x2be   : > { %p2758_p7 = pneg %p2757_p6 }
 0x2bf   : > { %p2764_p13 = por %p2763_p12, %p2762_p11 }
 0x2c1   : > { %p2765_p0 = pnand %p2764_p13, %p2758_p7 }
 0x2c3   : > { %2768 = shalt.err (!%p2765_p0)
}
 0x2c4   : > { %s2824_s28 = smov 128   ;;  %s2825_s29 = smov 256  }
 0x2c5   : > { %s2826_s30 = smov 8  }
 0x2c6   : > { %2677 = dma.vmem_to_hbm [thread:$0]  (%p2882_p4), %s5707_s4, 8192, %s5705_s6, %s5713_s7, %s2824_s28, %s2825_s29, %s2826_s30  }
 0x2c7 PF: > { %p2683_p1 = scmp.ge.s32.totalorder %s2819_s14, 2  ;;  %s2459_s3 = sand.u32 1, %s2799_s9  }
 0x2c8   : > { %s2460_s12 = scalar_lea.sflag [#allocation3], %s2459_s3 }
 0x2c9   : > { %p2680_p2 = pnand %p2683_p1, %p2889_p8 }
 0x2cb   : > { %2794 = dma.done.wait (!%p2680_p2), %s2460_s12, 8192  }
 0x2cc   : > { %2796 = vsyncadd (!%p2680_p2), %s2460_s12, 4294959104  ;;  %s15_s14 = sadd.s32 1, %s2819_s14   ;;  %s6534_s9 = smov %s2803_s10 }
 0x2cd   : > { %p12_p3 = scmp.ge.s32.totalorder %s15_s14, 4   ;;  %s6535_s10 = smov %s2807_s11 }
 0x2ce   : > { %s6536_s11 = smov %s2895_s22  ;;  %s6537_s12 = smov %s2815_s13 }
 0x2cf   : > { %s6538_s13 = smov %s6540_s17  ;;  %14 = sbr.rel (!%p12_p3) target bundleno = 4 (0x4), region = 66 }
 0x2d6   :  { %2465 = vsyncpa [#allocation3], 1 }
 0x2d7   :  { %2467 = vsyncpa [#allocation3 + $0x1], 1 }

</bundles_post_ra>
